<compile_context>
chip_gen: v7x
topology: tpu7x:2x2x1
jax: 0.10.0
libtpu: 0.0.40
codegen_flags: <defaults>
</compile_context>

<pallas_src>
import functools

import numpy as np
import jax
import jax.numpy as jnp
from jax.experimental import pallas as pl
from jax.experimental.pallas import tpu as pltpu


_GATE_STRIDE = 128  # per-gate lane stride in the fused gate weights (one lane tile)


# ----------------------------------------------------------------------------
# Fused kernel factory: a single grid-less pallas_call for given static sizes.
# PyTorch gate order: i, f, g, o.
# ----------------------------------------------------------------------------
def _build_chars_rnn_call(L, S, B, IN, H, C, G=_GATE_STRIDE):
    n_in = 3 + 3 * L + 2  # x, h0, c0, L*(wih_cat, whh_cat, b_cat), w_fc, b_fc

    def kernel(*refs):
        x_ref, h0_ref, c0_ref = refs[0], refs[1], refs[2]
        layer_w = [(refs[3 + 3 * l], refs[4 + 3 * l], refs[5 + 3 * l])
                   for l in range(L)]
        wfc_ref, bfc_ref = refs[3 + 3 * L], refs[4 + 3 * L]
        out_ref, hn_ref, cn_ref = refs[n_in], refs[n_in + 1], refs[n_in + 2]

        def lstm_cell(gates, c):
            # Gate blocks start at 128-lane boundaries -> lane-aligned extracts.
            i_g = jax.nn.sigmoid(gates[:, 0 * G:0 * G + H])
            f_g = jax.nn.sigmoid(gates[:, 1 * G:1 * G + H])
            g_g = jnp.tanh(gates[:, 2 * G:2 * G + H])
            o_g = jax.nn.sigmoid(gates[:, 3 * G:3 * G + H])
            c_new = f_g * c + i_g * g_g
            h_new = o_g * jnp.tanh(c_new)
            return h_new, c_new

        outs = None  # previous layer's per-step hidden outputs (kept in vregs)
        for l in range(L):
            wih_ref, whh_ref, b_ref = layer_w[l]
            wih = wih_ref[...]          # load each weight once per layer
            whh = whh_ref[...]
            b = b_ref[...]              # (1, 4*G), fused b_ih + b_hh

            if l == 0:
                # Whole-sequence input projection: one fused matmul for all
                # gates and all (b, t) rows; bias folded in.
                x2 = x_ref[...].reshape(B * S, IN)
                xp = (jnp.dot(x2, wih, preferred_element_type=jnp.float32) + b
                      ).reshape(B, S, 4 * G)
                xparts = [xp[:, t, :] for t in range(S)]          # (B, 4*G) each
            else:
                # Per-step input projection from the previous layer's h_t.  This
                # keeps the L x S dataflow a wavefront (depth L + S - 1) and the
                # projection is off the h-recurrence critical chain.
                # Inter-layer LSTM dropout (p=0.5) -> identity in eval mode.
                xparts = [jnp.dot(outs[t], wih,
                                  preferred_element_type=jnp.float32) + b
                          for t in range(S)]

            h = h0_ref[l]               # (B, H) f32
            c = c0_ref[l]               # (B, H) f32
            new_outs = []
            for t in range(S):          # static unroll: S is small
                gates = xparts[t] + jnp.dot(h, whh,
                                            preferred_element_type=jnp.float32)
                h, c = lstm_cell(gates, c)
                new_outs.append(h)
            outs = new_outs
            hn_ref[l] = h               # written once per layer
            cn_ref[l] = c

        # FC head; self.dropout -> identity in eval mode.  Logits are stored
        # directly in PyTorch (b, s) row order; these matmuls/stores depend only
        # on the last layer's h_t and feed nothing, so they are schedule filler.
        wfc = wfc_ref[...]
        bfc = bfc_ref[...]
        for t in range(S):
            out_ref[:, t, :] = (jnp.dot(outs[t], wfc,
                                        preferred_element_type=jnp.float32) + bfc)

    vmem = pltpu.MemorySpace.VMEM
    return pl.pallas_call(
        kernel,
        out_shape=(jax.ShapeDtypeStruct((B, S, C), jnp.float32),
                   jax.ShapeDtypeStruct((L, B, H), jnp.float32),
                   jax.ShapeDtypeStruct((L, B, H), jnp.float32)),
        in_specs=[pl.BlockSpec(memory_space=vmem)] * n_in,
        out_specs=(pl.BlockSpec(memory_space=vmem),
                   pl.BlockSpec(memory_space=vmem),
                   pl.BlockSpec(memory_space=vmem)),
        compiler_params=pltpu.CompilerParams(vmem_limit_bytes=8 * 1024 * 1024),
    )


# ----------------------------------------------------------------------------
# Full forward pass (matches CharsRnn.forward, eval-mode dropout)
# ----------------------------------------------------------------------------
@functools.partial(jax.jit, static_argnames=("hidden_layers",))
def chars_rnn_forward(x, h0, c0, params, hidden_layers):
    """x: (B, S, input_size); h0, c0: (layers, B, H). Returns (logits, (h_n, c_n))."""
    B, S, IN = x.shape
    H = h0.shape[-1]
    w_fc, b_fc = params["fc"]
    C = w_fc.shape[1]

    args = [x, h0, c0]
    for l in range(hidden_layers):
        args += list(params[f"lstm_l{l}"])
    args += [w_fc, b_fc]

    call = _build_chars_rnn_call(hidden_layers, S, B, IN, H, C)
    out3, h_n, c_n = call(*args)

    # (B, S, C) -> (B*S, C) is a contiguous (free) reshape and matches PyTorch's
    # out.contiguous().view(-1, hidden_nodes) row order exactly.
    logits = out3.reshape(B * S, C)
    return logits, (h_n, c_n)


# ----------------------------------------------------------------------------
# Deterministic parameter construction (same shapes/semantics as nn.LSTM/Linear)
# Weights are stored gate-concatenated with 128-lane gate stride:
#   W_cat[:, g*128 : g*128 + H] == W_pytorch[g*H:(g+1)*H, :].T   (gate order i,f,g,o)
#   b_cat[:, g*128 : g*128 + H] == b_ih[g] + b_hh[g]
# ----------------------------------------------------------------------------
def make_params(key, input_size, hidden_nodes, hidden_layers, G=_GATE_STRIDE):
    params = {}
    H = hidden_nodes
    scale = 1.0 / float(np.sqrt(H))
    for l in range(hidden_layers):
        in_dim = input_size if l == 0 else H
        key, k1, k2, k3, k4 = jax.random.split(key, 5)
        w_ih = jax.random.uniform(k1, (4, in_dim, H), jnp.float32, -scale, scale)
        w_hh = jax.random.uniform(k2, (4, H, H), jnp.float32, -scale, scale)
        b_ih = jax.random.uniform(k3, (4, H), jnp.float32, -scale, scale)
        b_hh = jax.random.uniform(k4, (4, H), jnp.float32, -scale, scale)

        wih_cat = jnp.zeros((in_dim, 4 * G), jnp.float32)
        whh_cat = jnp.zeros((H, 4 * G), jnp.float32)
        b_cat = jnp.zeros((1, 4 * G), jnp.float32)
        for g in range(4):
            wih_cat = wih_cat.at[:, g * G:g * G + H].set(w_ih[g])
            whh_cat = whh_cat.at[:, g * G:g * G + H].set(w_hh[g])
            b_cat = b_cat.at[0, g * G:g * G + H].set(b_ih[g] + b_hh[g])
        params[f"lstm_l{l}"] = (wih_cat, whh_cat, b_cat)

    key, k1, k2 = jax.random.split(key, 3)
    # nn.Linear(hidden_nodes, no_chars): weight (C, H) -> stored transposed (H, C)
    w_fc = jax.random.uniform(k1, (H, input_size), jnp.float32, -scale, scale)
    b_fc = jax.random.uniform(k2, (1, input_size), jnp.float32, -scale, scale)
    params["fc"] = (w_fc, b_fc)
    return params


# ----------------------------------------------------------------------------
# Pure-JAX reference (same packed params, same math) for a correctness check.
# ----------------------------------------------------------------------------
def chars_rnn_reference(x, h0, c0, params, hidden_layers, G=_GATE_STRIDE):
    hp = jax.lax.Precision.HIGHEST
    B, S, _ = x.shape
    H = h0.shape[-1]
    layer_in = x
    hs, cs = [], []
    for l in range(hidden_layers):
        wih, whh, b = params[f"lstm_l{l}"]
        h, c = h0[l], c0[l]
        outs = []
        for t in range(S):
            gates = (jnp.dot(layer_in[:, t, :], wih, precision=hp)
                     + jnp.dot(h, whh, precision=hp) + b)
            i_g = jax.nn.sigmoid(gates[:, 0 * G:0 * G + H])
            f_g = jax.nn.sigmoid(gates[:, 1 * G:1 * G + H])
            g_g = jnp.tanh(gates[:, 2 * G:2 * G + H])
            o_g = jax.nn.sigmoid(gates[:, 3 * G:3 * G + H])
            c = f_g * c + i_g * g_g
            h = o_g * jnp.tanh(c)
            outs.append(h)
        layer_in = jnp.stack(outs, axis=1)
        hs.append(h)
        cs.append(c)
    w_fc, b_fc = params["fc"]
    logits = jnp.dot(layer_in.reshape(B * S, H), w_fc, precision=hp) + b_fc
    return logits, (jnp.stack(hs), jnp.stack(cs))


if __name__ == "__main__":
    # chars vocabulary of 32 symbols -> input_size = 32, hidden_nodes = 2*32 = 64
    no_chars = 32
    hidden_nodes = 2 * no_chars
    hidden_layers = 2
    batch = 2
    seq = 8

    key = jax.random.PRNGKey(0)
    key, kx = jax.random.split(key)
    params = make_params(key, no_chars, hidden_nodes, hidden_layers)

    x = jax.random.uniform(kx, (batch, seq, no_chars), jnp.float32)
    # init_hidden(batch): zeros of shape (layers, batch, hidden_nodes)
    h0 = jnp.zeros((hidden_layers, batch, hidden_nodes), jnp.float32)
    c0 = jnp.zeros((hidden_layers, batch, hidden_nodes), jnp.float32)

    logits, (h_n, c_n) = chars_rnn_forward(x, h0, c0, params, hidden_layers)
    jax.block_until_ready((logits, h_n, c_n))

    assert logits.shape == (batch * seq, no_chars)
    assert h_n.shape == (hidden_layers, batch, hidden_nodes)
    assert c_n.shape == (hidden_layers, batch, hidden_nodes)

    # Correctness check against the pure-JAX reference (f32 everywhere).
    ref_logits, (ref_h, ref_c) = chars_rnn_reference(x, h0, c0, params, hidden_layers)
    np.testing.assert_allclose(np.asarray(logits), np.asarray(ref_logits),
                               rtol=2e-3, atol=2e-3)
    np.testing.assert_allclose(np.asarray(h_n), np.asarray(ref_h), rtol=2e-3, atol=2e-3)
    np.testing.assert_allclose(np.asarray(c_n), np.asarray(ref_c), rtol=2e-3, atol=2e-3)

    print("KERNEL_OK")
</pallas_src>

<mosaic_0001>
module attributes {stable_mosaic.version = 11 : i64} {
  func.func @kernel(%arg0: memref<2x8x32xf32, #tpu.memory_space<vmem>>, %arg1: memref<2x2x64xf32, #tpu.memory_space<vmem>>, %arg2: memref<2x2x64xf32, #tpu.memory_space<vmem>>, %arg3: memref<32x512xf32, #tpu.memory_space<vmem>>, %arg4: memref<64x512xf32, #tpu.memory_space<vmem>>, %arg5: memref<1x512xf32, #tpu.memory_space<vmem>>, %arg6: memref<64x512xf32, #tpu.memory_space<vmem>>, %arg7: memref<64x512xf32, #tpu.memory_space<vmem>>, %arg8: memref<1x512xf32, #tpu.memory_space<vmem>>, %arg9: memref<64x32xf32, #tpu.memory_space<vmem>>, %arg10: memref<1x32xf32, #tpu.memory_space<vmem>>, %arg11: memref<2x8x32xf32, #tpu.memory_space<vmem>>, %arg12: memref<2x2x64xf32, #tpu.memory_space<vmem>>, %arg13: memref<2x2x64xf32, #tpu.memory_space<vmem>>) attributes {dimension_semantics = [], scalar_prefetch = 0 : i64, scratch_operands = 0 : i64, tpu.core_type = #tpu.core_type<tc>} {
    %c0 = arith.constant 0 : index
    %c0_0 = arith.constant 0 : index
    %0 = vector.load %arg3[%c0, %c0_0] : memref<32x512xf32, #tpu.memory_space<vmem>>, vector<32x512xf32>
    %c0_1 = arith.constant 0 : index
    %c0_2 = arith.constant 0 : index
    %1 = vector.load %arg4[%c0_1, %c0_2] : memref<64x512xf32, #tpu.memory_space<vmem>>, vector<64x512xf32>
    %c0_3 = arith.constant 0 : index
    %c0_4 = arith.constant 0 : index
    %2 = vector.load %arg5[%c0_3, %c0_4] : memref<1x512xf32, #tpu.memory_space<vmem>>, vector<1x512xf32>
    %c0_5 = arith.constant 0 : index
    %c0_6 = arith.constant 0 : index
    %c0_7 = arith.constant 0 : index
    %3 = vector.load %arg0[%c0_5, %c0_6, %c0_7] : memref<2x8x32xf32, #tpu.memory_space<vmem>>, vector<2x8x32xf32>
    %4 = vector.shape_cast %3 : vector<2x8x32xf32> to vector<16x32xf32>
    %cst = arith.constant dense<0.000000e+00> : vector<16x512xf32>
    %5 = tpu.matmul %4, %0, %cst {dimension_numbers = #tpu.dot_dimension_numbers<[1], [0], [0], [1], [0, 0, 1, 1], [], []>} : vector<16x32xf32>, vector<32x512xf32>, vector<16x512xf32> -> vector<16x512xf32>
    %6 = vector.broadcast %2 : vector<1x512xf32> to vector<16x512xf32>
    %7 = arith.addf %5, %6 : vector<16x512xf32>
    %8 = vector.shape_cast %7 : vector<16x512xf32> to vector<2x8x512xf32>
    %9 = vector.extract_strided_slice %8 {offsets = [0, 0, 0], sizes = [2, 1, 512], strides = [1, 1, 1]} : vector<2x8x512xf32> to vector<2x1x512xf32>
    %10 = vector.shape_cast %9 : vector<2x1x512xf32> to vector<2x512xf32>
    %11 = vector.extract_strided_slice %8 {offsets = [0, 1, 0], sizes = [2, 1, 512], strides = [1, 1, 1]} : vector<2x8x512xf32> to vector<2x1x512xf32>
    %12 = vector.shape_cast %11 : vector<2x1x512xf32> to vector<2x512xf32>
    %13 = vector.extract_strided_slice %8 {offsets = [0, 2, 0], sizes = [2, 1, 512], strides = [1, 1, 1]} : vector<2x8x512xf32> to vector<2x1x512xf32>
    %14 = vector.shape_cast %13 : vector<2x1x512xf32> to vector<2x512xf32>
    %15 = vector.extract_strided_slice %8 {offsets = [0, 3, 0], sizes = [2, 1, 512], strides = [1, 1, 1]} : vector<2x8x512xf32> to vector<2x1x512xf32>
    %16 = vector.shape_cast %15 : vector<2x1x512xf32> to vector<2x512xf32>
    %17 = vector.extract_strided_slice %8 {offsets = [0, 4, 0], sizes = [2, 1, 512], strides = [1, 1, 1]} : vector<2x8x512xf32> to vector<2x1x512xf32>
    %18 = vector.shape_cast %17 : vector<2x1x512xf32> to vector<2x512xf32>
    %19 = vector.extract_strided_slice %8 {offsets = [0, 5, 0], sizes = [2, 1, 512], strides = [1, 1, 1]} : vector<2x8x512xf32> to vector<2x1x512xf32>
    %20 = vector.shape_cast %19 : vector<2x1x512xf32> to vector<2x512xf32>
    %21 = vector.extract_strided_slice %8 {offsets = [0, 6, 0], sizes = [2, 1, 512], strides = [1, 1, 1]} : vector<2x8x512xf32> to vector<2x1x512xf32>
    %22 = vector.shape_cast %21 : vector<2x1x512xf32> to vector<2x512xf32>
    %23 = vector.extract_strided_slice %8 {offsets = [0, 7, 0], sizes = [2, 1, 512], strides = [1, 1, 1]} : vector<2x8x512xf32> to vector<2x1x512xf32>
    %24 = vector.shape_cast %23 : vector<2x1x512xf32> to vector<2x512xf32>
    %c0_8 = arith.constant 0 : index
    %c0_9 = arith.constant 0 : index
    %c0_10 = arith.constant 0 : index
    %25 = vector.load %arg1[%c0_8, %c0_9, %c0_10] : memref<2x2x64xf32, #tpu.memory_space<vmem>>, vector<1x2x64xf32>
    %26 = vector.shape_cast %25 : vector<1x2x64xf32> to vector<2x64xf32>
    %c0_11 = arith.constant 0 : index
    %c0_12 = arith.constant 0 : index
    %c0_13 = arith.constant 0 : index
    %27 = vector.load %arg2[%c0_11, %c0_12, %c0_13] : memref<2x2x64xf32, #tpu.memory_space<vmem>>, vector<1x2x64xf32>
    %28 = vector.shape_cast %27 : vector<1x2x64xf32> to vector<2x64xf32>
    %cst_14 = arith.constant dense<0.000000e+00> : vector<2x512xf32>
    %29 = tpu.matmul %26, %1, %cst_14 {dimension_numbers = #tpu.dot_dimension_numbers<[1], [0], [0], [1], [0, 0, 1, 1], [], []>} : vector<2x64xf32>, vector<64x512xf32>, vector<2x512xf32> -> vector<2x512xf32>
    %30 = arith.addf %10, %29 : vector<2x512xf32>
    %31 = vector.extract_strided_slice %30 {offsets = [0, 0], sizes = [2, 64], strides = [1, 1]} : vector<2x512xf32> to vector<2x64xf32>
    %32 = arith.negf %31 : vector<2x64xf32>
    %33 = math.exp %32 : vector<2x64xf32>
    %cst_15 = arith.constant 1.000000e+00 : f32
    %34 = vector.broadcast %cst_15 : f32 to vector<2x64xf32>
    %35 = arith.addf %34, %33 : vector<2x64xf32>
    %36 = arith.divf %34, %35 : vector<2x64xf32>
    %37 = vector.extract_strided_slice %30 {offsets = [0, 128], sizes = [2, 64], strides = [1, 1]} : vector<2x512xf32> to vector<2x64xf32>
    %38 = arith.negf %37 : vector<2x64xf32>
    %39 = math.exp %38 : vector<2x64xf32>
    %cst_16 = arith.constant 1.000000e+00 : f32
    %40 = vector.broadcast %cst_16 : f32 to vector<2x64xf32>
    %41 = arith.addf %40, %39 : vector<2x64xf32>
    %42 = arith.divf %40, %41 : vector<2x64xf32>
    %43 = vector.extract_strided_slice %30 {offsets = [0, 256], sizes = [2, 64], strides = [1, 1]} : vector<2x512xf32> to vector<2x64xf32>
    %44 = math.tanh %43 : vector<2x64xf32>
    %45 = vector.extract_strided_slice %30 {offsets = [0, 384], sizes = [2, 64], strides = [1, 1]} : vector<2x512xf32> to vector<2x64xf32>
    %46 = arith.negf %45 : vector<2x64xf32>
    %47 = math.exp %46 : vector<2x64xf32>
    %cst_17 = arith.constant 1.000000e+00 : f32
    %48 = vector.broadcast %cst_17 : f32 to vector<2x64xf32>
    %49 = arith.addf %48, %47 : vector<2x64xf32>
    %50 = arith.divf %48, %49 : vector<2x64xf32>
    %51 = arith.mulf %42, %28 : vector<2x64xf32>
    %52 = arith.mulf %36, %44 : vector<2x64xf32>
    %53 = arith.addf %51, %52 : vector<2x64xf32>
    %54 = math.tanh %53 : vector<2x64xf32>
    %55 = arith.mulf %50, %54 : vector<2x64xf32>
    %cst_18 = arith.constant dense<0.000000e+00> : vector<2x512xf32>
    %56 = tpu.matmul %55, %1, %cst_18 {dimension_numbers = #tpu.dot_dimension_numbers<[1], [0], [0], [1], [0, 0, 1, 1], [], []>} : vector<2x64xf32>, vector<64x512xf32>, vector<2x512xf32> -> vector<2x512xf32>
    %57 = arith.addf %12, %56 : vector<2x512xf32>
    %58 = vector.extract_strided_slice %57 {offsets = [0, 0], sizes = [2, 64], strides = [1, 1]} : vector<2x512xf32> to vector<2x64xf32>
    %59 = arith.negf %58 : vector<2x64xf32>
    %60 = math.exp %59 : vector<2x64xf32>
    %cst_19 = arith.constant 1.000000e+00 : f32
    %61 = vector.broadcast %cst_19 : f32 to vector<2x64xf32>
    %62 = arith.addf %61, %60 : vector<2x64xf32>
    %63 = arith.divf %61, %62 : vector<2x64xf32>
    %64 = vector.extract_strided_slice %57 {offsets = [0, 128], sizes = [2, 64], strides = [1, 1]} : vector<2x512xf32> to vector<2x64xf32>
    %65 = arith.negf %64 : vector<2x64xf32>
    %66 = math.exp %65 : vector<2x64xf32>
    %cst_20 = arith.constant 1.000000e+00 : f32
    %67 = vector.broadcast %cst_20 : f32 to vector<2x64xf32>
    %68 = arith.addf %67, %66 : vector<2x64xf32>
    %69 = arith.divf %67, %68 : vector<2x64xf32>
    %70 = vector.extract_strided_slice %57 {offsets = [0, 256], sizes = [2, 64], strides = [1, 1]} : vector<2x512xf32> to vector<2x64xf32>
    %71 = math.tanh %70 : vector<2x64xf32>
    %72 = vector.extract_strided_slice %57 {offsets = [0, 384], sizes = [2, 64], strides = [1, 1]} : vector<2x512xf32> to vector<2x64xf32>
    %73 = arith.negf %72 : vector<2x64xf32>
    %74 = math.exp %73 : vector<2x64xf32>
    %cst_21 = arith.constant 1.000000e+00 : f32
    %75 = vector.broadcast %cst_21 : f32 to vector<2x64xf32>
    %76 = arith.addf %75, %74 : vector<2x64xf32>
    %77 = arith.divf %75, %76 : vector<2x64xf32>
    %78 = arith.mulf %69, %53 : vector<2x64xf32>
    %79 = arith.mulf %63, %71 : vector<2x64xf32>
    %80 = arith.addf %78, %79 : vector<2x64xf32>
    %81 = math.tanh %80 : vector<2x64xf32>
    %82 = arith.mulf %77, %81 : vector<2x64xf32>
    %cst_22 = arith.constant dense<0.000000e+00> : vector<2x512xf32>
    %83 = tpu.matmul %82, %1, %cst_22 {dimension_numbers = #tpu.dot_dimension_numbers<[1], [0], [0], [1], [0, 0, 1, 1], [], []>} : vector<2x64xf32>, vector<64x512xf32>, vector<2x512xf32> -> vector<2x512xf32>
    %84 = arith.addf %14, %83 : vector<2x512xf32>
    %85 = vector.extract_strided_slice %84 {offsets = [0, 0], sizes = [2, 64], strides = [1, 1]} : vector<2x512xf32> to vector<2x64xf32>
    %86 = arith.negf %85 : vector<2x64xf32>
    %87 = math.exp %86 : vector<2x64xf32>
    %cst_23 = arith.constant 1.000000e+00 : f32
    %88 = vector.broadcast %cst_23 : f32 to vector<2x64xf32>
    %89 = arith.addf %88, %87 : vector<2x64xf32>
    %90 = arith.divf %88, %89 : vector<2x64xf32>
    %91 = vector.extract_strided_slice %84 {offsets = [0, 128], sizes = [2, 64], strides = [1, 1]} : vector<2x512xf32> to vector<2x64xf32>
    %92 = arith.negf %91 : vector<2x64xf32>
    %93 = math.exp %92 : vector<2x64xf32>
    %cst_24 = arith.constant 1.000000e+00 : f32
    %94 = vector.broadcast %cst_24 : f32 to vector<2x64xf32>
    %95 = arith.addf %94, %93 : vector<2x64xf32>
    %96 = arith.divf %94, %95 : vector<2x64xf32>
    %97 = vector.extract_strided_slice %84 {offsets = [0, 256], sizes = [2, 64], strides = [1, 1]} : vector<2x512xf32> to vector<2x64xf32>
    %98 = math.tanh %97 : vector<2x64xf32>
    %99 = vector.extract_strided_slice %84 {offsets = [0, 384], sizes = [2, 64], strides = [1, 1]} : vector<2x512xf32> to vector<2x64xf32>
    %100 = arith.negf %99 : vector<2x64xf32>
    %101 = math.exp %100 : vector<2x64xf32>
    %cst_25 = arith.constant 1.000000e+00 : f32
    %102 = vector.broadcast %cst_25 : f32 to vector<2x64xf32>
    %103 = arith.addf %102, %101 : vector<2x64xf32>
    %104 = arith.divf %102, %103 : vector<2x64xf32>
    %105 = arith.mulf %96, %80 : vector<2x64xf32>
    %106 = arith.mulf %90, %98 : vector<2x64xf32>
    %107 = arith.addf %105, %106 : vector<2x64xf32>
    %108 = math.tanh %107 : vector<2x64xf32>
    %109 = arith.mulf %104, %108 : vector<2x64xf32>
    %cst_26 = arith.constant dense<0.000000e+00> : vector<2x512xf32>
    %110 = tpu.matmul %109, %1, %cst_26 {dimension_numbers = #tpu.dot_dimension_numbers<[1], [0], [0], [1], [0, 0, 1, 1], [], []>} : vector<2x64xf32>, vector<64x512xf32>, vector<2x512xf32> -> vector<2x512xf32>
    %111 = arith.addf %16, %110 : vector<2x512xf32>
    %112 = vector.extract_strided_slice %111 {offsets = [0, 0], sizes = [2, 64], strides = [1, 1]} : vector<2x512xf32> to vector<2x64xf32>
    %113 = arith.negf %112 : vector<2x64xf32>
    %114 = math.exp %113 : vector<2x64xf32>
    %cst_27 = arith.constant 1.000000e+00 : f32
    %115 = vector.broadcast %cst_27 : f32 to vector<2x64xf32>
    %116 = arith.addf %115, %114 : vector<2x64xf32>
    %117 = arith.divf %115, %116 : vector<2x64xf32>
    %118 = vector.extract_strided_slice %111 {offsets = [0, 128], sizes = [2, 64], strides = [1, 1]} : vector<2x512xf32> to vector<2x64xf32>
    %119 = arith.negf %118 : vector<2x64xf32>
    %120 = math.exp %119 : vector<2x64xf32>
    %cst_28 = arith.constant 1.000000e+00 : f32
    %121 = vector.broadcast %cst_28 : f32 to vector<2x64xf32>
    %122 = arith.addf %121, %120 : vector<2x64xf32>
    %123 = arith.divf %121, %122 : vector<2x64xf32>
    %124 = vector.extract_strided_slice %111 {offsets = [0, 256], sizes = [2, 64], strides = [1, 1]} : vector<2x512xf32> to vector<2x64xf32>
    %125 = math.tanh %124 : vector<2x64xf32>
    %126 = vector.extract_strided_slice %111 {offsets = [0, 384], sizes = [2, 64], strides = [1, 1]} : vector<2x512xf32> to vector<2x64xf32>
    %127 = arith.negf %126 : vector<2x64xf32>
    %128 = math.exp %127 : vector<2x64xf32>
    %cst_29 = arith.constant 1.000000e+00 : f32
    %129 = vector.broadcast %cst_29 : f32 to vector<2x64xf32>
    %130 = arith.addf %129, %128 : vector<2x64xf32>
    %131 = arith.divf %129, %130 : vector<2x64xf32>
    %132 = arith.mulf %123, %107 : vector<2x64xf32>
    %133 = arith.mulf %117, %125 : vector<2x64xf32>
    %134 = arith.addf %132, %133 : vector<2x64xf32>
    %135 = math.tanh %134 : vector<2x64xf32>
    %136 = arith.mulf %131, %135 : vector<2x64xf32>
    %cst_30 = arith.constant dense<0.000000e+00> : vector<2x512xf32>
    %137 = tpu.matmul %136, %1, %cst_30 {dimension_numbers = #tpu.dot_dimension_numbers<[1], [0], [0], [1], [0, 0, 1, 1], [], []>} : vector<2x64xf32>, vector<64x512xf32>, vector<2x512xf32> -> vector<2x512xf32>
    %138 = arith.addf %18, %137 : vector<2x512xf32>
    %139 = vector.extract_strided_slice %138 {offsets = [0, 0], sizes = [2, 64], strides = [1, 1]} : vector<2x512xf32> to vector<2x64xf32>
    %140 = arith.negf %139 : vector<2x64xf32>
    %141 = math.exp %140 : vector<2x64xf32>
    %cst_31 = arith.constant 1.000000e+00 : f32
    %142 = vector.broadcast %cst_31 : f32 to vector<2x64xf32>
    %143 = arith.addf %142, %141 : vector<2x64xf32>
    %144 = arith.divf %142, %143 : vector<2x64xf32>
    %145 = vector.extract_strided_slice %138 {offsets = [0, 128], sizes = [2, 64], strides = [1, 1]} : vector<2x512xf32> to vector<2x64xf32>
    %146 = arith.negf %145 : vector<2x64xf32>
    %147 = math.exp %146 : vector<2x64xf32>
    %cst_32 = arith.constant 1.000000e+00 : f32
    %148 = vector.broadcast %cst_32 : f32 to vector<2x64xf32>
    %149 = arith.addf %148, %147 : vector<2x64xf32>
    %150 = arith.divf %148, %149 : vector<2x64xf32>
    %151 = vector.extract_strided_slice %138 {offsets = [0, 256], sizes = [2, 64], strides = [1, 1]} : vector<2x512xf32> to vector<2x64xf32>
    %152 = math.tanh %151 : vector<2x64xf32>
    %153 = vector.extract_strided_slice %138 {offsets = [0, 384], sizes = [2, 64], strides = [1, 1]} : vector<2x512xf32> to vector<2x64xf32>
    %154 = arith.negf %153 : vector<2x64xf32>
    %155 = math.exp %154 : vector<2x64xf32>
    %cst_33 = arith.constant 1.000000e+00 : f32
    %156 = vector.broadcast %cst_33 : f32 to vector<2x64xf32>
    %157 = arith.addf %156, %155 : vector<2x64xf32>
    %158 = arith.divf %156, %157 : vector<2x64xf32>
    %159 = arith.mulf %150, %134 : vector<2x64xf32>
    %160 = arith.mulf %144, %152 : vector<2x64xf32>
    %161 = arith.addf %159, %160 : vector<2x64xf32>
    %162 = math.tanh %161 : vector<2x64xf32>
    %163 = arith.mulf %158, %162 : vector<2x64xf32>
    %cst_34 = arith.constant dense<0.000000e+00> : vector<2x512xf32>
    %164 = tpu.matmul %163, %1, %cst_34 {dimension_numbers = #tpu.dot_dimension_numbers<[1], [0], [0], [1], [0, 0, 1, 1], [], []>} : vector<2x64xf32>, vector<64x512xf32>, vector<2x512xf32> -> vector<2x512xf32>
    %165 = arith.addf %20, %164 : vector<2x512xf32>
    %166 = vector.extract_strided_slice %165 {offsets = [0, 0], sizes = [2, 64], strides = [1, 1]} : vector<2x512xf32> to vector<2x64xf32>
    %167 = arith.negf %166 : vector<2x64xf32>
    %168 = math.exp %167 : vector<2x64xf32>
    %cst_35 = arith.constant 1.000000e+00 : f32
    %169 = vector.broadcast %cst_35 : f32 to vector<2x64xf32>
    %170 = arith.addf %169, %168 : vector<2x64xf32>
    %171 = arith.divf %169, %170 : vector<2x64xf32>
    %172 = vector.extract_strided_slice %165 {offsets = [0, 128], sizes = [2, 64], strides = [1, 1]} : vector<2x512xf32> to vector<2x64xf32>
    %173 = arith.negf %172 : vector<2x64xf32>
    %174 = math.exp %173 : vector<2x64xf32>
    %cst_36 = arith.constant 1.000000e+00 : f32
    %175 = vector.broadcast %cst_36 : f32 to vector<2x64xf32>
    %176 = arith.addf %175, %174 : vector<2x64xf32>
    %177 = arith.divf %175, %176 : vector<2x64xf32>
    %178 = vector.extract_strided_slice %165 {offsets = [0, 256], sizes = [2, 64], strides = [1, 1]} : vector<2x512xf32> to vector<2x64xf32>
    %179 = math.tanh %178 : vector<2x64xf32>
    %180 = vector.extract_strided_slice %165 {offsets = [0, 384], sizes = [2, 64], strides = [1, 1]} : vector<2x512xf32> to vector<2x64xf32>
    %181 = arith.negf %180 : vector<2x64xf32>
    %182 = math.exp %181 : vector<2x64xf32>
    %cst_37 = arith.constant 1.000000e+00 : f32
    %183 = vector.broadcast %cst_37 : f32 to vector<2x64xf32>
    %184 = arith.addf %183, %182 : vector<2x64xf32>
    %185 = arith.divf %183, %184 : vector<2x64xf32>
    %186 = arith.mulf %177, %161 : vector<2x64xf32>
    %187 = arith.mulf %171, %179 : vector<2x64xf32>
    %188 = arith.addf %186, %187 : vector<2x64xf32>
    %189 = math.tanh %188 : vector<2x64xf32>
    %190 = arith.mulf %185, %189 : vector<2x64xf32>
    %cst_38 = arith.constant dense<0.000000e+00> : vector<2x512xf32>
    %191 = tpu.matmul %190, %1, %cst_38 {dimension_numbers = #tpu.dot_dimension_numbers<[1], [0], [0], [1], [0, 0, 1, 1], [], []>} : vector<2x64xf32>, vector<64x512xf32>, vector<2x512xf32> -> vector<2x512xf32>
    %192 = arith.addf %22, %191 : vector<2x512xf32>
    %193 = vector.extract_strided_slice %192 {offsets = [0, 0], sizes = [2, 64], strides = [1, 1]} : vector<2x512xf32> to vector<2x64xf32>
    %194 = arith.negf %193 : vector<2x64xf32>
    %195 = math.exp %194 : vector<2x64xf32>
    %cst_39 = arith.constant 1.000000e+00 : f32
    %196 = vector.broadcast %cst_39 : f32 to vector<2x64xf32>
    %197 = arith.addf %196, %195 : vector<2x64xf32>
    %198 = arith.divf %196, %197 : vector<2x64xf32>
    %199 = vector.extract_strided_slice %192 {offsets = [0, 128], sizes = [2, 64], strides = [1, 1]} : vector<2x512xf32> to vector<2x64xf32>
    %200 = arith.negf %199 : vector<2x64xf32>
    %201 = math.exp %200 : vector<2x64xf32>
    %cst_40 = arith.constant 1.000000e+00 : f32
    %202 = vector.broadcast %cst_40 : f32 to vector<2x64xf32>
    %203 = arith.addf %202, %201 : vector<2x64xf32>
    %204 = arith.divf %202, %203 : vector<2x64xf32>
    %205 = vector.extract_strided_slice %192 {offsets = [0, 256], sizes = [2, 64], strides = [1, 1]} : vector<2x512xf32> to vector<2x64xf32>
    %206 = math.tanh %205 : vector<2x64xf32>
    %207 = vector.extract_strided_slice %192 {offsets = [0, 384], sizes = [2, 64], strides = [1, 1]} : vector<2x512xf32> to vector<2x64xf32>
    %208 = arith.negf %207 : vector<2x64xf32>
    %209 = math.exp %208 : vector<2x64xf32>
    %cst_41 = arith.constant 1.000000e+00 : f32
    %210 = vector.broadcast %cst_41 : f32 to vector<2x64xf32>
    %211 = arith.addf %210, %209 : vector<2x64xf32>
    %212 = arith.divf %210, %211 : vector<2x64xf32>
    %213 = arith.mulf %204, %188 : vector<2x64xf32>
    %214 = arith.mulf %198, %206 : vector<2x64xf32>
    %215 = arith.addf %213, %214 : vector<2x64xf32>
    %216 = math.tanh %215 : vector<2x64xf32>
    %217 = arith.mulf %212, %216 : vector<2x64xf32>
    %cst_42 = arith.constant dense<0.000000e+00> : vector<2x512xf32>
    %218 = tpu.matmul %217, %1, %cst_42 {dimension_numbers = #tpu.dot_dimension_numbers<[1], [0], [0], [1], [0, 0, 1, 1], [], []>} : vector<2x64xf32>, vector<64x512xf32>, vector<2x512xf32> -> vector<2x512xf32>
    %219 = arith.addf %24, %218 : vector<2x512xf32>
    %220 = vector.extract_strided_slice %219 {offsets = [0, 0], sizes = [2, 64], strides = [1, 1]} : vector<2x512xf32> to vector<2x64xf32>
    %221 = arith.negf %220 : vector<2x64xf32>
    %222 = math.exp %221 : vector<2x64xf32>
    %cst_43 = arith.constant 1.000000e+00 : f32
    %223 = vector.broadcast %cst_43 : f32 to vector<2x64xf32>
    %224 = arith.addf %223, %222 : vector<2x64xf32>
    %225 = arith.divf %223, %224 : vector<2x64xf32>
    %226 = vector.extract_strided_slice %219 {offsets = [0, 128], sizes = [2, 64], strides = [1, 1]} : vector<2x512xf32> to vector<2x64xf32>
    %227 = arith.negf %226 : vector<2x64xf32>
    %228 = math.exp %227 : vector<2x64xf32>
    %cst_44 = arith.constant 1.000000e+00 : f32
    %229 = vector.broadcast %cst_44 : f32 to vector<2x64xf32>
    %230 = arith.addf %229, %228 : vector<2x64xf32>
    %231 = arith.divf %229, %230 : vector<2x64xf32>
    %232 = vector.extract_strided_slice %219 {offsets = [0, 256], sizes = [2, 64], strides = [1, 1]} : vector<2x512xf32> to vector<2x64xf32>
    %233 = math.tanh %232 : vector<2x64xf32>
    %234 = vector.extract_strided_slice %219 {offsets = [0, 384], sizes = [2, 64], strides = [1, 1]} : vector<2x512xf32> to vector<2x64xf32>
    %235 = arith.negf %234 : vector<2x64xf32>
    %236 = math.exp %235 : vector<2x64xf32>
    %cst_45 = arith.constant 1.000000e+00 : f32
    %237 = vector.broadcast %cst_45 : f32 to vector<2x64xf32>
    %238 = arith.addf %237, %236 : vector<2x64xf32>
    %239 = arith.divf %237, %238 : vector<2x64xf32>
    %240 = arith.mulf %231, %215 : vector<2x64xf32>
    %241 = arith.mulf %225, %233 : vector<2x64xf32>
    %242 = arith.addf %240, %241 : vector<2x64xf32>
    %243 = math.tanh %242 : vector<2x64xf32>
    %244 = arith.mulf %239, %243 : vector<2x64xf32>
    %c0_46 = arith.constant 0 : index
    %c0_47 = arith.constant 0 : index
    %c0_48 = arith.constant 0 : index
    %245 = vector.load %arg12[%c0_46, %c0_47, %c0_48] : memref<2x2x64xf32, #tpu.memory_space<vmem>>, vector<1x2x64xf32>
    %246 = vector.shape_cast %245 : vector<1x2x64xf32> to vector<2x64xf32>
    %247 = vector.shape_cast %244 : vector<2x64xf32> to vector<1x2x64xf32>
    tpu.vector_store %arg12[%c0_46, %c0_47, %c0_48], %247 {strides = array<i32>} : memref<2x2x64xf32, #tpu.memory_space<vmem>>, vector<1x2x64xf32>,
    %c0_49 = arith.constant 0 : index
    %c0_50 = arith.constant 0 : index
    %c0_51 = arith.constant 0 : index
    %248 = vector.load %arg13[%c0_49, %c0_50, %c0_51] : memref<2x2x64xf32, #tpu.memory_space<vmem>>, vector<1x2x64xf32>
    %249 = vector.shape_cast %248 : vector<1x2x64xf32> to vector<2x64xf32>
    %250 = vector.shape_cast %242 : vector<2x64xf32> to vector<1x2x64xf32>
    tpu.vector_store %arg13[%c0_49, %c0_50, %c0_51], %250 {strides = array<i32>} : memref<2x2x64xf32, #tpu.memory_space<vmem>>, vector<1x2x64xf32>,
    %c0_52 = arith.constant 0 : index
    %c0_53 = arith.constant 0 : index
    %251 = vector.load %arg6[%c0_52, %c0_53] : memref<64x512xf32, #tpu.memory_space<vmem>>, vector<64x512xf32>
    %c0_54 = arith.constant 0 : index
    %c0_55 = arith.constant 0 : index
    %252 = vector.load %arg7[%c0_54, %c0_55] : memref<64x512xf32, #tpu.memory_space<vmem>>, vector<64x512xf32>
    %c0_56 = arith.constant 0 : index
    %c0_57 = arith.constant 0 : index
    %253 = vector.load %arg8[%c0_56, %c0_57] : memref<1x512xf32, #tpu.memory_space<vmem>>, vector<1x512xf32>
    %cst_58 = arith.constant dense<0.000000e+00> : vector<2x512xf32>
    %254 = tpu.matmul %55, %251, %cst_58 {dimension_numbers = #tpu.dot_dimension_numbers<[1], [0], [0], [1], [0, 0, 1, 1], [], []>} : vector<2x64xf32>, vector<64x512xf32>, vector<2x512xf32> -> vector<2x512xf32>
    %255 = vector.broadcast %253 : vector<1x512xf32> to vector<2x512xf32>
    %256 = arith.addf %254, %255 : vector<2x512xf32>
    %cst_59 = arith.constant dense<0.000000e+00> : vector<2x512xf32>
    %257 = tpu.matmul %82, %251, %cst_59 {dimension_numbers = #tpu.dot_dimension_numbers<[1], [0], [0], [1], [0, 0, 1, 1], [], []>} : vector<2x64xf32>, vector<64x512xf32>, vector<2x512xf32> -> vector<2x512xf32>
    %258 = vector.broadcast %253 : vector<1x512xf32> to vector<2x512xf32>
    %259 = arith.addf %257, %258 : vector<2x512xf32>
    %cst_60 = arith.constant dense<0.000000e+00> : vector<2x512xf32>
    %260 = tpu.matmul %109, %251, %cst_60 {dimension_numbers = #tpu.dot_dimension_numbers<[1], [0], [0], [1], [0, 0, 1, 1], [], []>} : vector<2x64xf32>, vector<64x512xf32>, vector<2x512xf32> -> vector<2x512xf32>
    %261 = vector.broadcast %253 : vector<1x512xf32> to vector<2x512xf32>
    %262 = arith.addf %260, %261 : vector<2x512xf32>
    %cst_61 = arith.constant dense<0.000000e+00> : vector<2x512xf32>
    %263 = tpu.matmul %136, %251, %cst_61 {dimension_numbers = #tpu.dot_dimension_numbers<[1], [0], [0], [1], [0, 0, 1, 1], [], []>} : vector<2x64xf32>, vector<64x512xf32>, vector<2x512xf32> -> vector<2x512xf32>
    %264 = vector.broadcast %253 : vector<1x512xf32> to vector<2x512xf32>
    %265 = arith.addf %263, %264 : vector<2x512xf32>
    %cst_62 = arith.constant dense<0.000000e+00> : vector<2x512xf32>
    %266 = tpu.matmul %163, %251, %cst_62 {dimension_numbers = #tpu.dot_dimension_numbers<[1], [0], [0], [1], [0, 0, 1, 1], [], []>} : vector<2x64xf32>, vector<64x512xf32>, vector<2x512xf32> -> vector<2x512xf32>
    %267 = vector.broadcast %253 : vector<1x512xf32> to vector<2x512xf32>
    %268 = arith.addf %266, %267 : vector<2x512xf32>
    %cst_63 = arith.constant dense<0.000000e+00> : vector<2x512xf32>
    %269 = tpu.matmul %190, %251, %cst_63 {dimension_numbers = #tpu.dot_dimension_numbers<[1], [0], [0], [1], [0, 0, 1, 1], [], []>} : vector<2x64xf32>, vector<64x512xf32>, vector<2x512xf32> -> vector<2x512xf32>
    %270 = vector.broadcast %253 : vector<1x512xf32> to vector<2x512xf32>
    %271 = arith.addf %269, %270 : vector<2x512xf32>
    %cst_64 = arith.constant dense<0.000000e+00> : vector<2x512xf32>
    %272 = tpu.matmul %217, %251, %cst_64 {dimension_numbers = #tpu.dot_dimension_numbers<[1], [0], [0], [1], [0, 0, 1, 1], [], []>} : vector<2x64xf32>, vector<64x512xf32>, vector<2x512xf32> -> vector<2x512xf32>
    %273 = vector.broadcast %253 : vector<1x512xf32> to vector<2x512xf32>
    %274 = arith.addf %272, %273 : vector<2x512xf32>
    %cst_65 = arith.constant dense<0.000000e+00> : vector<2x512xf32>
    %275 = tpu.matmul %244, %251, %cst_65 {dimension_numbers = #tpu.dot_dimension_numbers<[1], [0], [0], [1], [0, 0, 1, 1], [], []>} : vector<2x64xf32>, vector<64x512xf32>, vector<2x512xf32> -> vector<2x512xf32>
    %276 = vector.broadcast %253 : vector<1x512xf32> to vector<2x512xf32>
    %277 = arith.addf %275, %276 : vector<2x512xf32>
    %c1 = arith.constant 1 : index
    %c0_66 = arith.constant 0 : index
    %c0_67 = arith.constant 0 : index
    %278 = vector.load %arg1[%c1, %c0_66, %c0_67] : memref<2x2x64xf32, #tpu.memory_space<vmem>>, vector<1x2x64xf32>
    %279 = vector.shape_cast %278 : vector<1x2x64xf32> to vector<2x64xf32>
    %c1_68 = arith.constant 1 : index
    %c0_69 = arith.constant 0 : index
    %c0_70 = arith.constant 0 : index
    %280 = vector.load %arg2[%c1_68, %c0_69, %c0_70] : memref<2x2x64xf32, #tpu.memory_space<vmem>>, vector<1x2x64xf32>
    %281 = vector.shape_cast %280 : vector<1x2x64xf32> to vector<2x64xf32>
    %cst_71 = arith.constant dense<0.000000e+00> : vector<2x512xf32>
    %282 = tpu.matmul %279, %252, %cst_71 {dimension_numbers = #tpu.dot_dimension_numbers<[1], [0], [0], [1], [0, 0, 1, 1], [], []>} : vector<2x64xf32>, vector<64x512xf32>, vector<2x512xf32> -> vector<2x512xf32>
    %283 = arith.addf %256, %282 : vector<2x512xf32>
    %284 = vector.extract_strided_slice %283 {offsets = [0, 0], sizes = [2, 64], strides = [1, 1]} : vector<2x512xf32> to vector<2x64xf32>
    %285 = arith.negf %284 : vector<2x64xf32>
    %286 = math.exp %285 : vector<2x64xf32>
    %cst_72 = arith.constant 1.000000e+00 : f32
    %287 = vector.broadcast %cst_72 : f32 to vector<2x64xf32>
    %288 = arith.addf %287, %286 : vector<2x64xf32>
    %289 = arith.divf %287, %288 : vector<2x64xf32>
    %290 = vector.extract_strided_slice %283 {offsets = [0, 128], sizes = [2, 64], strides = [1, 1]} : vector<2x512xf32> to vector<2x64xf32>
    %291 = arith.negf %290 : vector<2x64xf32>
    %292 = math.exp %291 : vector<2x64xf32>
    %cst_73 = arith.constant 1.000000e+00 : f32
    %293 = vector.broadcast %cst_73 : f32 to vector<2x64xf32>
    %294 = arith.addf %293, %292 : vector<2x64xf32>
    %295 = arith.divf %293, %294 : vector<2x64xf32>
    %296 = vector.extract_strided_slice %283 {offsets = [0, 256], sizes = [2, 64], strides = [1, 1]} : vector<2x512xf32> to vector<2x64xf32>
    %297 = math.tanh %296 : vector<2x64xf32>
    %298 = vector.extract_strided_slice %283 {offsets = [0, 384], sizes = [2, 64], strides = [1, 1]} : vector<2x512xf32> to vector<2x64xf32>
    %299 = arith.negf %298 : vector<2x64xf32>
    %300 = math.exp %299 : vector<2x64xf32>
    %cst_74 = arith.constant 1.000000e+00 : f32
    %301 = vector.broadcast %cst_74 : f32 to vector<2x64xf32>
    %302 = arith.addf %301, %300 : vector<2x64xf32>
    %303 = arith.divf %301, %302 : vector<2x64xf32>
    %304 = arith.mulf %295, %281 : vector<2x64xf32>
    %305 = arith.mulf %289, %297 : vector<2x64xf32>
    %306 = arith.addf %304, %305 : vector<2x64xf32>
    %307 = math.tanh %306 : vector<2x64xf32>
    %308 = arith.mulf %303, %307 : vector<2x64xf32>
    %cst_75 = arith.constant dense<0.000000e+00> : vector<2x512xf32>
    %309 = tpu.matmul %308, %252, %cst_75 {dimension_numbers = #tpu.dot_dimension_numbers<[1], [0], [0], [1], [0, 0, 1, 1], [], []>} : vector<2x64xf32>, vector<64x512xf32>, vector<2x512xf32> -> vector<2x512xf32>
    %310 = arith.addf %259, %309 : vector<2x512xf32>
    %311 = vector.extract_strided_slice %310 {offsets = [0, 0], sizes = [2, 64], strides = [1, 1]} : vector<2x512xf32> to vector<2x64xf32>
    %312 = arith.negf %311 : vector<2x64xf32>
    %313 = math.exp %312 : vector<2x64xf32>
    %cst_76 = arith.constant 1.000000e+00 : f32
    %314 = vector.broadcast %cst_76 : f32 to vector<2x64xf32>
    %315 = arith.addf %314, %313 : vector<2x64xf32>
    %316 = arith.divf %314, %315 : vector<2x64xf32>
    %317 = vector.extract_strided_slice %310 {offsets = [0, 128], sizes = [2, 64], strides = [1, 1]} : vector<2x512xf32> to vector<2x64xf32>
    %318 = arith.negf %317 : vector<2x64xf32>
    %319 = math.exp %318 : vector<2x64xf32>
    %cst_77 = arith.constant 1.000000e+00 : f32
    %320 = vector.broadcast %cst_77 : f32 to vector<2x64xf32>
    %321 = arith.addf %320, %319 : vector<2x64xf32>
    %322 = arith.divf %320, %321 : vector<2x64xf32>
    %323 = vector.extract_strided_slice %310 {offsets = [0, 256], sizes = [2, 64], strides = [1, 1]} : vector<2x512xf32> to vector<2x64xf32>
    %324 = math.tanh %323 : vector<2x64xf32>
    %325 = vector.extract_strided_slice %310 {offsets = [0, 384], sizes = [2, 64], strides = [1, 1]} : vector<2x512xf32> to vector<2x64xf32>
    %326 = arith.negf %325 : vector<2x64xf32>
    %327 = math.exp %326 : vector<2x64xf32>
    %cst_78 = arith.constant 1.000000e+00 : f32
    %328 = vector.broadcast %cst_78 : f32 to vector<2x64xf32>
    %329 = arith.addf %328, %327 : vector<2x64xf32>
    %330 = arith.divf %328, %329 : vector<2x64xf32>
    %331 = arith.mulf %322, %306 : vector<2x64xf32>
    %332 = arith.mulf %316, %324 : vector<2x64xf32>
    %333 = arith.addf %331, %332 : vector<2x64xf32>
    %334 = math.tanh %333 : vector<2x64xf32>
    %335 = arith.mulf %330, %334 : vector<2x64xf32>
    %cst_79 = arith.constant dense<0.000000e+00> : vector<2x512xf32>
    %336 = tpu.matmul %335, %252, %cst_79 {dimension_numbers = #tpu.dot_dimension_numbers<[1], [0], [0], [1], [0, 0, 1, 1], [], []>} : vector<2x64xf32>, vector<64x512xf32>, vector<2x512xf32> -> vector<2x512xf32>
    %337 = arith.addf %262, %336 : vector<2x512xf32>
    %338 = vector.extract_strided_slice %337 {offsets = [0, 0], sizes = [2, 64], strides = [1, 1]} : vector<2x512xf32> to vector<2x64xf32>
    %339 = arith.negf %338 : vector<2x64xf32>
    %340 = math.exp %339 : vector<2x64xf32>
    %cst_80 = arith.constant 1.000000e+00 : f32
    %341 = vector.broadcast %cst_80 : f32 to vector<2x64xf32>
    %342 = arith.addf %341, %340 : vector<2x64xf32>
    %343 = arith.divf %341, %342 : vector<2x64xf32>
    %344 = vector.extract_strided_slice %337 {offsets = [0, 128], sizes = [2, 64], strides = [1, 1]} : vector<2x512xf32> to vector<2x64xf32>
    %345 = arith.negf %344 : vector<2x64xf32>
    %346 = math.exp %345 : vector<2x64xf32>
    %cst_81 = arith.constant 1.000000e+00 : f32
    %347 = vector.broadcast %cst_81 : f32 to vector<2x64xf32>
    %348 = arith.addf %347, %346 : vector<2x64xf32>
    %349 = arith.divf %347, %348 : vector<2x64xf32>
    %350 = vector.extract_strided_slice %337 {offsets = [0, 256], sizes = [2, 64], strides = [1, 1]} : vector<2x512xf32> to vector<2x64xf32>
    %351 = math.tanh %350 : vector<2x64xf32>
    %352 = vector.extract_strided_slice %337 {offsets = [0, 384], sizes = [2, 64], strides = [1, 1]} : vector<2x512xf32> to vector<2x64xf32>
    %353 = arith.negf %352 : vector<2x64xf32>
    %354 = math.exp %353 : vector<2x64xf32>
    %cst_82 = arith.constant 1.000000e+00 : f32
    %355 = vector.broadcast %cst_82 : f32 to vector<2x64xf32>
    %356 = arith.addf %355, %354 : vector<2x64xf32>
    %357 = arith.divf %355, %356 : vector<2x64xf32>
    %358 = arith.mulf %349, %333 : vector<2x64xf32>
    %359 = arith.mulf %343, %351 : vector<2x64xf32>
    %360 = arith.addf %358, %359 : vector<2x64xf32>
    %361 = math.tanh %360 : vector<2x64xf32>
    %362 = arith.mulf %357, %361 : vector<2x64xf32>
    %cst_83 = arith.constant dense<0.000000e+00> : vector<2x512xf32>
    %363 = tpu.matmul %362, %252, %cst_83 {dimension_numbers = #tpu.dot_dimension_numbers<[1], [0], [0], [1], [0, 0, 1, 1], [], []>} : vector<2x64xf32>, vector<64x512xf32>, vector<2x512xf32> -> vector<2x512xf32>
    %364 = arith.addf %265, %363 : vector<2x512xf32>
    %365 = vector.extract_strided_slice %364 {offsets = [0, 0], sizes = [2, 64], strides = [1, 1]} : vector<2x512xf32> to vector<2x64xf32>
    %366 = arith.negf %365 : vector<2x64xf32>
    %367 = math.exp %366 : vector<2x64xf32>
    %cst_84 = arith.constant 1.000000e+00 : f32
    %368 = vector.broadcast %cst_84 : f32 to vector<2x64xf32>
    %369 = arith.addf %368, %367 : vector<2x64xf32>
    %370 = arith.divf %368, %369 : vector<2x64xf32>
    %371 = vector.extract_strided_slice %364 {offsets = [0, 128], sizes = [2, 64], strides = [1, 1]} : vector<2x512xf32> to vector<2x64xf32>
    %372 = arith.negf %371 : vector<2x64xf32>
    %373 = math.exp %372 : vector<2x64xf32>
    %cst_85 = arith.constant 1.000000e+00 : f32
    %374 = vector.broadcast %cst_85 : f32 to vector<2x64xf32>
    %375 = arith.addf %374, %373 : vector<2x64xf32>
    %376 = arith.divf %374, %375 : vector<2x64xf32>
    %377 = vector.extract_strided_slice %364 {offsets = [0, 256], sizes = [2, 64], strides = [1, 1]} : vector<2x512xf32> to vector<2x64xf32>
    %378 = math.tanh %377 : vector<2x64xf32>
    %379 = vector.extract_strided_slice %364 {offsets = [0, 384], sizes = [2, 64], strides = [1, 1]} : vector<2x512xf32> to vector<2x64xf32>
    %380 = arith.negf %379 : vector<2x64xf32>
    %381 = math.exp %380 : vector<2x64xf32>
    %cst_86 = arith.constant 1.000000e+00 : f32
    %382 = vector.broadcast %cst_86 : f32 to vector<2x64xf32>
    %383 = arith.addf %382, %381 : vector<2x64xf32>
    %384 = arith.divf %382, %383 : vector<2x64xf32>
    %385 = arith.mulf %376, %360 : vector<2x64xf32>
    %386 = arith.mulf %370, %378 : vector<2x64xf32>
    %387 = arith.addf %385, %386 : vector<2x64xf32>
    %388 = math.tanh %387 : vector<2x64xf32>
    %389 = arith.mulf %384, %388 : vector<2x64xf32>
    %cst_87 = arith.constant dense<0.000000e+00> : vector<2x512xf32>
    %390 = tpu.matmul %389, %252, %cst_87 {dimension_numbers = #tpu.dot_dimension_numbers<[1], [0], [0], [1], [0, 0, 1, 1], [], []>} : vector<2x64xf32>, vector<64x512xf32>, vector<2x512xf32> -> vector<2x512xf32>
    %391 = arith.addf %268, %390 : vector<2x512xf32>
    %392 = vector.extract_strided_slice %391 {offsets = [0, 0], sizes = [2, 64], strides = [1, 1]} : vector<2x512xf32> to vector<2x64xf32>
    %393 = arith.negf %392 : vector<2x64xf32>
    %394 = math.exp %393 : vector<2x64xf32>
    %cst_88 = arith.constant 1.000000e+00 : f32
    %395 = vector.broadcast %cst_88 : f32 to vector<2x64xf32>
    %396 = arith.addf %395, %394 : vector<2x64xf32>
    %397 = arith.divf %395, %396 : vector<2x64xf32>
    %398 = vector.extract_strided_slice %391 {offsets = [0, 128], sizes = [2, 64], strides = [1, 1]} : vector<2x512xf32> to vector<2x64xf32>
    %399 = arith.negf %398 : vector<2x64xf32>
    %400 = math.exp %399 : vector<2x64xf32>
    %cst_89 = arith.constant 1.000000e+00 : f32
    %401 = vector.broadcast %cst_89 : f32 to vector<2x64xf32>
    %402 = arith.addf %401, %400 : vector<2x64xf32>
    %403 = arith.divf %401, %402 : vector<2x64xf32>
    %404 = vector.extract_strided_slice %391 {offsets = [0, 256], sizes = [2, 64], strides = [1, 1]} : vector<2x512xf32> to vector<2x64xf32>
    %405 = math.tanh %404 : vector<2x64xf32>
    %406 = vector.extract_strided_slice %391 {offsets = [0, 384], sizes = [2, 64], strides = [1, 1]} : vector<2x512xf32> to vector<2x64xf32>
    %407 = arith.negf %406 : vector<2x64xf32>
    %408 = math.exp %407 : vector<2x64xf32>
    %cst_90 = arith.constant 1.000000e+00 : f32
    %409 = vector.broadcast %cst_90 : f32 to vector<2x64xf32>
    %410 = arith.addf %409, %408 : vector<2x64xf32>
    %411 = arith.divf %409, %410 : vector<2x64xf32>
    %412 = arith.mulf %403, %387 : vector<2x64xf32>
    %413 = arith.mulf %397, %405 : vector<2x64xf32>
    %414 = arith.addf %412, %413 : vector<2x64xf32>
    %415 = math.tanh %414 : vector<2x64xf32>
    %416 = arith.mulf %411, %415 : vector<2x64xf32>
    %cst_91 = arith.constant dense<0.000000e+00> : vector<2x512xf32>
    %417 = tpu.matmul %416, %252, %cst_91 {dimension_numbers = #tpu.dot_dimension_numbers<[1], [0], [0], [1], [0, 0, 1, 1], [], []>} : vector<2x64xf32>, vector<64x512xf32>, vector<2x512xf32> -> vector<2x512xf32>
    %418 = arith.addf %271, %417 : vector<2x512xf32>
    %419 = vector.extract_strided_slice %418 {offsets = [0, 0], sizes = [2, 64], strides = [1, 1]} : vector<2x512xf32> to vector<2x64xf32>
    %420 = arith.negf %419 : vector<2x64xf32>
    %421 = math.exp %420 : vector<2x64xf32>
    %cst_92 = arith.constant 1.000000e+00 : f32
    %422 = vector.broadcast %cst_92 : f32 to vector<2x64xf32>
    %423 = arith.addf %422, %421 : vector<2x64xf32>
    %424 = arith.divf %422, %423 : vector<2x64xf32>
    %425 = vector.extract_strided_slice %418 {offsets = [0, 128], sizes = [2, 64], strides = [1, 1]} : vector<2x512xf32> to vector<2x64xf32>
    %426 = arith.negf %425 : vector<2x64xf32>
    %427 = math.exp %426 : vector<2x64xf32>
    %cst_93 = arith.constant 1.000000e+00 : f32
    %428 = vector.broadcast %cst_93 : f32 to vector<2x64xf32>
    %429 = arith.addf %428, %427 : vector<2x64xf32>
    %430 = arith.divf %428, %429 : vector<2x64xf32>
    %431 = vector.extract_strided_slice %418 {offsets = [0, 256], sizes = [2, 64], strides = [1, 1]} : vector<2x512xf32> to vector<2x64xf32>
    %432 = math.tanh %431 : vector<2x64xf32>
    %433 = vector.extract_strided_slice %418 {offsets = [0, 384], sizes = [2, 64], strides = [1, 1]} : vector<2x512xf32> to vector<2x64xf32>
    %434 = arith.negf %433 : vector<2x64xf32>
    %435 = math.exp %434 : vector<2x64xf32>
    %cst_94 = arith.constant 1.000000e+00 : f32
    %436 = vector.broadcast %cst_94 : f32 to vector<2x64xf32>
    %437 = arith.addf %436, %435 : vector<2x64xf32>
    %438 = arith.divf %436, %437 : vector<2x64xf32>
    %439 = arith.mulf %430, %414 : vector<2x64xf32>
    %440 = arith.mulf %424, %432 : vector<2x64xf32>
    %441 = arith.addf %439, %440 : vector<2x64xf32>
    %442 = math.tanh %441 : vector<2x64xf32>
    %443 = arith.mulf %438, %442 : vector<2x64xf32>
    %cst_95 = arith.constant dense<0.000000e+00> : vector<2x512xf32>
    %444 = tpu.matmul %443, %252, %cst_95 {dimension_numbers = #tpu.dot_dimension_numbers<[1], [0], [0], [1], [0, 0, 1, 1], [], []>} : vector<2x64xf32>, vector<64x512xf32>, vector<2x512xf32> -> vector<2x512xf32>
    %445 = arith.addf %274, %444 : vector<2x512xf32>
    %446 = vector.extract_strided_slice %445 {offsets = [0, 0], sizes = [2, 64], strides = [1, 1]} : vector<2x512xf32> to vector<2x64xf32>
    %447 = arith.negf %446 : vector<2x64xf32>
    %448 = math.exp %447 : vector<2x64xf32>
    %cst_96 = arith.constant 1.000000e+00 : f32
    %449 = vector.broadcast %cst_96 : f32 to vector<2x64xf32>
    %450 = arith.addf %449, %448 : vector<2x64xf32>
    %451 = arith.divf %449, %450 : vector<2x64xf32>
    %452 = vector.extract_strided_slice %445 {offsets = [0, 128], sizes = [2, 64], strides = [1, 1]} : vector<2x512xf32> to vector<2x64xf32>
    %453 = arith.negf %452 : vector<2x64xf32>
    %454 = math.exp %453 : vector<2x64xf32>
    %cst_97 = arith.constant 1.000000e+00 : f32
    %455 = vector.broadcast %cst_97 : f32 to vector<2x64xf32>
    %456 = arith.addf %455, %454 : vector<2x64xf32>
    %457 = arith.divf %455, %456 : vector<2x64xf32>
    %458 = vector.extract_strided_slice %445 {offsets = [0, 256], sizes = [2, 64], strides = [1, 1]} : vector<2x512xf32> to vector<2x64xf32>
    %459 = math.tanh %458 : vector<2x64xf32>
    %460 = vector.extract_strided_slice %445 {offsets = [0, 384], sizes = [2, 64], strides = [1, 1]} : vector<2x512xf32> to vector<2x64xf32>
    %461 = arith.negf %460 : vector<2x64xf32>
    %462 = math.exp %461 : vector<2x64xf32>
    %cst_98 = arith.constant 1.000000e+00 : f32
    %463 = vector.broadcast %cst_98 : f32 to vector<2x64xf32>
    %464 = arith.addf %463, %462 : vector<2x64xf32>
    %465 = arith.divf %463, %464 : vector<2x64xf32>
    %466 = arith.mulf %457, %441 : vector<2x64xf32>
    %467 = arith.mulf %451, %459 : vector<2x64xf32>
    %468 = arith.addf %466, %467 : vector<2x64xf32>
    %469 = math.tanh %468 : vector<2x64xf32>
    %470 = arith.mulf %465, %469 : vector<2x64xf32>
    %cst_99 = arith.constant dense<0.000000e+00> : vector<2x512xf32>
    %471 = tpu.matmul %470, %252, %cst_99 {dimension_numbers = #tpu.dot_dimension_numbers<[1], [0], [0], [1], [0, 0, 1, 1], [], []>} : vector<2x64xf32>, vector<64x512xf32>, vector<2x512xf32> -> vector<2x512xf32>
    %472 = arith.addf %277, %471 : vector<2x512xf32>
    %473 = vector.extract_strided_slice %472 {offsets = [0, 0], sizes = [2, 64], strides = [1, 1]} : vector<2x512xf32> to vector<2x64xf32>
    %474 = arith.negf %473 : vector<2x64xf32>
    %475 = math.exp %474 : vector<2x64xf32>
    %cst_100 = arith.constant 1.000000e+00 : f32
    %476 = vector.broadcast %cst_100 : f32 to vector<2x64xf32>
    %477 = arith.addf %476, %475 : vector<2x64xf32>
    %478 = arith.divf %476, %477 : vector<2x64xf32>
    %479 = vector.extract_strided_slice %472 {offsets = [0, 128], sizes = [2, 64], strides = [1, 1]} : vector<2x512xf32> to vector<2x64xf32>
    %480 = arith.negf %479 : vector<2x64xf32>
    %481 = math.exp %480 : vector<2x64xf32>
    %cst_101 = arith.constant 1.000000e+00 : f32
    %482 = vector.broadcast %cst_101 : f32 to vector<2x64xf32>
    %483 = arith.addf %482, %481 : vector<2x64xf32>
    %484 = arith.divf %482, %483 : vector<2x64xf32>
    %485 = vector.extract_strided_slice %472 {offsets = [0, 256], sizes = [2, 64], strides = [1, 1]} : vector<2x512xf32> to vector<2x64xf32>
    %486 = math.tanh %485 : vector<2x64xf32>
    %487 = vector.extract_strided_slice %472 {offsets = [0, 384], sizes = [2, 64], strides = [1, 1]} : vector<2x512xf32> to vector<2x64xf32>
    %488 = arith.negf %487 : vector<2x64xf32>
    %489 = math.exp %488 : vector<2x64xf32>
    %cst_102 = arith.constant 1.000000e+00 : f32
    %490 = vector.broadcast %cst_102 : f32 to vector<2x64xf32>
    %491 = arith.addf %490, %489 : vector<2x64xf32>
    %492 = arith.divf %490, %491 : vector<2x64xf32>
    %493 = arith.mulf %484, %468 : vector<2x64xf32>
    %494 = arith.mulf %478, %486 : vector<2x64xf32>
    %495 = arith.addf %493, %494 : vector<2x64xf32>
    %496 = math.tanh %495 : vector<2x64xf32>
    %497 = arith.mulf %492, %496 : vector<2x64xf32>
    %c1_103 = arith.constant 1 : index
    %c0_104 = arith.constant 0 : index
    %c0_105 = arith.constant 0 : index
    %498 = vector.load %arg12[%c1_103, %c0_104, %c0_105] : memref<2x2x64xf32, #tpu.memory_space<vmem>>, vector<1x2x64xf32>
    %499 = vector.shape_cast %498 : vector<1x2x64xf32> to vector<2x64xf32>
    %500 = vector.shape_cast %497 : vector<2x64xf32> to vector<1x2x64xf32>
    tpu.vector_store %arg12[%c1_103, %c0_104, %c0_105], %500 {strides = array<i32>} : memref<2x2x64xf32, #tpu.memory_space<vmem>>, vector<1x2x64xf32>,
    %c1_106 = arith.constant 1 : index
    %c0_107 = arith.constant 0 : index
    %c0_108 = arith.constant 0 : index
    %501 = vector.load %arg13[%c1_106, %c0_107, %c0_108] : memref<2x2x64xf32, #tpu.memory_space<vmem>>, vector<1x2x64xf32>
    %502 = vector.shape_cast %501 : vector<1x2x64xf32> to vector<2x64xf32>
    %503 = vector.shape_cast %495 : vector<2x64xf32> to vector<1x2x64xf32>
    tpu.vector_store %arg13[%c1_106, %c0_107, %c0_108], %503 {strides = array<i32>} : memref<2x2x64xf32, #tpu.memory_space<vmem>>, vector<1x2x64xf32>,
    %c0_109 = arith.constant 0 : index
    %c0_110 = arith.constant 0 : index
    %504 = vector.load %arg9[%c0_109, %c0_110] : memref<64x32xf32, #tpu.memory_space<vmem>>, vector<64x32xf32>
    %c0_111 = arith.constant 0 : index
    %c0_112 = arith.constant 0 : index
    %505 = vector.load %arg10[%c0_111, %c0_112] : memref<1x32xf32, #tpu.memory_space<vmem>>, vector<1x32xf32>
    %cst_113 = arith.constant dense<0.000000e+00> : vector<2x32xf32>
    %506 = tpu.matmul %308, %504, %cst_113 {dimension_numbers = #tpu.dot_dimension_numbers<[1], [0], [0], [1], [0, 0, 1, 1], [], []>} : vector<2x64xf32>, vector<64x32xf32>, vector<2x32xf32> -> vector<2x32xf32>
    %507 = vector.broadcast %505 : vector<1x32xf32> to vector<2x32xf32>
    %508 = arith.addf %506, %507 : vector<2x32xf32>
    %c0_114 = arith.constant 0 : index
    %c0_115 = arith.constant 0 : index
    %c0_116 = arith.constant 0 : index
    %509 = vector.load %arg11[%c0_114, %c0_115, %c0_116] : memref<2x8x32xf32, #tpu.memory_space<vmem>>, vector<2x1x32xf32>
    %510 = vector.shape_cast %509 : vector<2x1x32xf32> to vector<2x32xf32>
    %511 = vector.shape_cast %508 : vector<2x32xf32> to vector<2x1x32xf32>
    tpu.vector_store %arg11[%c0_114, %c0_115, %c0_116], %511 {strides = array<i32>} : memref<2x8x32xf32, #tpu.memory_space<vmem>>, vector<2x1x32xf32>,
    %cst_117 = arith.constant dense<0.000000e+00> : vector<2x32xf32>
    %512 = tpu.matmul %335, %504, %cst_117 {dimension_numbers = #tpu.dot_dimension_numbers<[1], [0], [0], [1], [0, 0, 1, 1], [], []>} : vector<2x64xf32>, vector<64x32xf32>, vector<2x32xf32> -> vector<2x32xf32>
    %513 = vector.broadcast %505 : vector<1x32xf32> to vector<2x32xf32>
    %514 = arith.addf %512, %513 : vector<2x32xf32>
    %c0_118 = arith.constant 0 : index
    %c1_119 = arith.constant 1 : index
    %c0_120 = arith.constant 0 : index
    %515 = vector.load %arg11[%c0_118, %c1_119, %c0_120] : memref<2x8x32xf32, #tpu.memory_space<vmem>>, vector<2x1x32xf32>
    %516 = vector.shape_cast %515 : vector<2x1x32xf32> to vector<2x32xf32>
    %517 = vector.shape_cast %514 : vector<2x32xf32> to vector<2x1x32xf32>
    tpu.vector_store %arg11[%c0_118, %c1_119, %c0_120], %517 {strides = array<i32>} : memref<2x8x32xf32, #tpu.memory_space<vmem>>, vector<2x1x32xf32>,
    %cst_121 = arith.constant dense<0.000000e+00> : vector<2x32xf32>
    %518 = tpu.matmul %362, %504, %cst_121 {dimension_numbers = #tpu.dot_dimension_numbers<[1], [0], [0], [1], [0, 0, 1, 1], [], []>} : vector<2x64xf32>, vector<64x32xf32>, vector<2x32xf32> -> vector<2x32xf32>
    %519 = vector.broadcast %505 : vector<1x32xf32> to vector<2x32xf32>
    %520 = arith.addf %518, %519 : vector<2x32xf32>
    %c0_122 = arith.constant 0 : index
    %c2 = arith.constant 2 : index
    %c0_123 = arith.constant 0 : index
    %521 = vector.load %arg11[%c0_122, %c2, %c0_123] : memref<2x8x32xf32, #tpu.memory_space<vmem>>, vector<2x1x32xf32>
    %522 = vector.shape_cast %521 : vector<2x1x32xf32> to vector<2x32xf32>
    %523 = vector.shape_cast %520 : vector<2x32xf32> to vector<2x1x32xf32>
    tpu.vector_store %arg11[%c0_122, %c2, %c0_123], %523 {strides = array<i32>} : memref<2x8x32xf32, #tpu.memory_space<vmem>>, vector<2x1x32xf32>,
    %cst_124 = arith.constant dense<0.000000e+00> : vector<2x32xf32>
    %524 = tpu.matmul %389, %504, %cst_124 {dimension_numbers = #tpu.dot_dimension_numbers<[1], [0], [0], [1], [0, 0, 1, 1], [], []>} : vector<2x64xf32>, vector<64x32xf32>, vector<2x32xf32> -> vector<2x32xf32>
    %525 = vector.broadcast %505 : vector<1x32xf32> to vector<2x32xf32>
    %526 = arith.addf %524, %525 : vector<2x32xf32>
    %c0_125 = arith.constant 0 : index
    %c3 = arith.constant 3 : index
    %c0_126 = arith.constant 0 : index
    %527 = vector.load %arg11[%c0_125, %c3, %c0_126] : memref<2x8x32xf32, #tpu.memory_space<vmem>>, vector<2x1x32xf32>
    %528 = vector.shape_cast %527 : vector<2x1x32xf32> to vector<2x32xf32>
    %529 = vector.shape_cast %526 : vector<2x32xf32> to vector<2x1x32xf32>
    tpu.vector_store %arg11[%c0_125, %c3, %c0_126], %529 {strides = array<i32>} : memref<2x8x32xf32, #tpu.memory_space<vmem>>, vector<2x1x32xf32>,
    %cst_127 = arith.constant dense<0.000000e+00> : vector<2x32xf32>
    %530 = tpu.matmul %416, %504, %cst_127 {dimension_numbers = #tpu.dot_dimension_numbers<[1], [0], [0], [1], [0, 0, 1, 1], [], []>} : vector<2x64xf32>, vector<64x32xf32>, vector<2x32xf32> -> vector<2x32xf32>
    %531 = vector.broadcast %505 : vector<1x32xf32> to vector<2x32xf32>
    %532 = arith.addf %530, %531 : vector<2x32xf32>
    %c0_128 = arith.constant 0 : index
    %c4 = arith.constant 4 : index
    %c0_129 = arith.constant 0 : index
    %533 = vector.load %arg11[%c0_128, %c4, %c0_129] : memref<2x8x32xf32, #tpu.memory_space<vmem>>, vector<2x1x32xf32>
    %534 = vector.shape_cast %533 : vector<2x1x32xf32> to vector<2x32xf32>
    %535 = vector.shape_cast %532 : vector<2x32xf32> to vector<2x1x32xf32>
    tpu.vector_store %arg11[%c0_128, %c4, %c0_129], %535 {strides = array<i32>} : memref<2x8x32xf32, #tpu.memory_space<vmem>>, vector<2x1x32xf32>,
    %cst_130 = arith.constant dense<0.000000e+00> : vector<2x32xf32>
    %536 = tpu.matmul %443, %504, %cst_130 {dimension_numbers = #tpu.dot_dimension_numbers<[1], [0], [0], [1], [0, 0, 1, 1], [], []>} : vector<2x64xf32>, vector<64x32xf32>, vector<2x32xf32> -> vector<2x32xf32>
    %537 = vector.broadcast %505 : vector<1x32xf32> to vector<2x32xf32>
    %538 = arith.addf %536, %537 : vector<2x32xf32>
    %c0_131 = arith.constant 0 : index
    %c5 = arith.constant 5 : index
    %c0_132 = arith.constant 0 : index
    %539 = vector.load %arg11[%c0_131, %c5, %c0_132] : memref<2x8x32xf32, #tpu.memory_space<vmem>>, vector<2x1x32xf32>
    %540 = vector.shape_cast %539 : vector<2x1x32xf32> to vector<2x32xf32>
    %541 = vector.shape_cast %538 : vector<2x32xf32> to vector<2x1x32xf32>
    tpu.vector_store %arg11[%c0_131, %c5, %c0_132], %541 {strides = array<i32>} : memref<2x8x32xf32, #tpu.memory_space<vmem>>, vector<2x1x32xf32>,
    %cst_133 = arith.constant dense<0.000000e+00> : vector<2x32xf32>
    %542 = tpu.matmul %470, %504, %cst_133 {dimension_numbers = #tpu.dot_dimension_numbers<[1], [0], [0], [1], [0, 0, 1, 1], [], []>} : vector<2x64xf32>, vector<64x32xf32>, vector<2x32xf32> -> vector<2x32xf32>
    %543 = vector.broadcast %505 : vector<1x32xf32> to vector<2x32xf32>
    %544 = arith.addf %542, %543 : vector<2x32xf32>
    %c0_134 = arith.constant 0 : index
    %c6 = arith.constant 6 : index
    %c0_135 = arith.constant 0 : index
    %545 = vector.load %arg11[%c0_134, %c6, %c0_135] : memref<2x8x32xf32, #tpu.memory_space<vmem>>, vector<2x1x32xf32>
    %546 = vector.shape_cast %545 : vector<2x1x32xf32> to vector<2x32xf32>
    %547 = vector.shape_cast %544 : vector<2x32xf32> to vector<2x1x32xf32>
    tpu.vector_store %arg11[%c0_134, %c6, %c0_135], %547 {strides = array<i32>} : memref<2x8x32xf32, #tpu.memory_space<vmem>>, vector<2x1x32xf32>,
    %cst_136 = arith.constant dense<0.000000e+00> : vector<2x32xf32>
    %548 = tpu.matmul %497, %504, %cst_136 {dimension_numbers = #tpu.dot_dimension_numbers<[1], [0], [0], [1], [0, 0, 1, 1], [], []>} : vector<2x64xf32>, vector<64x32xf32>, vector<2x32xf32> -> vector<2x32xf32>
    %549 = vector.broadcast %505 : vector<1x32xf32> to vector<2x32xf32>
    %550 = arith.addf %548, %549 : vector<2x32xf32>
    %c0_137 = arith.constant 0 : index
    %c7 = arith.constant 7 : index
    %c0_138 = arith.constant 0 : index
    %551 = vector.load %arg11[%c0_137, %c7, %c0_138] : memref<2x8x32xf32, #tpu.memory_space<vmem>>, vector<2x1x32xf32>
    %552 = vector.shape_cast %551 : vector<2x1x32xf32> to vector<2x32xf32>
    %553 = vector.shape_cast %550 : vector<2x32xf32> to vector<2x1x32xf32>
    tpu.vector_store %arg11[%c0_137, %c7, %c0_138], %553 {strides = array<i32>} : memref<2x8x32xf32, #tpu.memory_space<vmem>>, vector<2x1x32xf32>,
    return
  }
}

</mosaic_0001>

<bundles_post_ra>
// kernel: chars_rnn_forward.1
= control target key start
LH: loop header
LB: loop body
LE: loop exit
PB: predicated region body
PF: predicated region fallthrough
CT: control target
= control target key end

     0   :  { %19 = vsyncpa [#allocation3], 0  ;;  %s8792_s0 = inlined_call_operand.vmem [shape: f32[2,8,32], index: 0, kind: input, shape index: {}]   ;;  %s8793_s1 = inlined_call_operand.vmem [shape: f32[2,2,64], index: 1, kind: input, shape index: {}]   ;;  %s8794_s2 = inlined_call_operand.vmem [shape: f32[2,2,64], index: 2, kind: input, shape index: {}]   ;;  %s8795_s3 = inlined_call_operand.hbm [shape: f32[32,512], index: 3, kind: input, shape index: {}]   ;;  %s8796_s4 = inlined_call_operand.hbm [shape: f32[64,512], index: 4, kind: input, shape index: {}]   ;;  %s8797_s5 = inlined_call_operand.vmem [shape: f32[1,512], index: 5, kind: input, shape index: {}]   ;;  %s8798_s6 = inlined_call_operand.hbm [shape: f32[64,512], index: 6, kind: input, shape index: {}]   ;;  %s8799_s7 = inlined_call_operand.hbm [shape: f32[64,512], index: 7, kind: input, shape index: {}]   ;;  %s8800_s8 = inlined_call_operand.vmem [shape: f32[1,512], index: 8, kind: input, shape index: {}]   ;;  %s8801_s9 = inlined_call_operand.vmem [shape: f32[64,32], index: 9, kind: input, shape index: {}]   ;;  %s8802_s10 = inlined_call_operand.vmem [shape: f32[1,32], index: 10, kind: input, shape index: {}]   ;;  %s8803_s11 = inlined_call_operand.hbm [shape: f32[2,8,32], index: 11, kind: output, shape index: {0}]   ;;  %s8804_s12 = inlined_call_operand.hbm [shape: f32[2,2,64], index: 12, kind: output, shape index: {1}]   ;;  %s8805_s13 = inlined_call_operand.hbm [shape: f32[2,2,64], index: 13, kind: output, shape index: {2}]  }
   0x1   :  { %20 = vsyncpa [#allocation6], 0 }
   0x2   :  { %21 = vsyncpa [#allocation9], 0 }
   0x3   :  { %22 = vsyncpa [#allocation4], 0 }
   0x4   :  { %23 = vsyncpa [#allocation12], 0  ;;  %s7515_s25 = smov [#allocation5]   ;;  %s7516_s27 = smov [#allocation2]  }
   0x5   :  { %s47_s26 = sshll.u32 %s7515_s25, 4  ;;  %s35_s28 = sshll.u32 %s7516_s27, 4  ;;  %s48_s26 = int_to_ptr.vmem [resolvable:$true] %s47_s26  ;;  %s7601_s28 = int_to_ptr.vmem [resolvable:$true] %s35_s28 }
   0x6   :  { %s7351_s14 = scalar_lea.hbm %s8796_s4, 4096 }
   0x7   :  { %p7352_p0 = scmp.ne.s32.totalorder %s8796_s4, %s7351_s14  ;;  %p7355_p1 = scmp.lt.u32.totalorder %s7351_s14, %s8796_s4 }
   0x9   :  { %p7357_p2 = pnand %p7355_p1, %p7352_p0 }
   0xb   :  { %7360 = shalt.err (!%p7357_p2)
}
   0xc   :  { %s7361_s19 = scalar_lea.vmem %s48_s26, 4096  ;;  %p7366_p4 = scmp.lt.s32.totalorder %s48_s26, %s48_s26 }
   0xd   :  { %p7362_p3 = scmp.ne.s32.totalorder %s48_s26, %s7361_s19  ;;  %p7367_p5 = scmp.lt.s32.totalorder %s7361_s19, %s7361_s19 }
   0xf   :  { %p7368_p6 = por %p7367_p5, %p7366_p4 }
  0x11   :  { %p7369_p7 = pnand %p7368_p6, %p7362_p3 }
  0x13   :  { %7372 = shalt.err (!%p7369_p7)
}
  0x14   :  { %s7517_s20 = smov 512   ;;  %s7518_s21 = smov 32  }
  0x15   :  { %53 = dma.hbm_to_vmem [thread:$0]  %s8796_s4, 4096, %s48_s26, [#allocation6], %s7517_s20, %s7517_s20, %s7518_s21  }
  0x16   :  { %s7373_s27 = scalar_lea.hbm %s8795_s3, 2048 }
  0x17   :  { %p7374_p8 = scmp.ne.s32.totalorder %s8795_s3, %s7373_s27  ;;  %p7377_p9 = scmp.lt.u32.totalorder %s7373_s27, %s8795_s3 }
  0x19   :  { %p7379_p10 = pnand %p7377_p9, %p7374_p8 }
  0x1b   :  { %7382 = shalt.err (!%p7379_p10)
}
  0x1c   :  { %s7383_s16 = scalar_lea.vmem %s7601_s28, 2048  ;;  %p7388_p12 = scmp.lt.s32.totalorder %s7601_s28, %s7601_s28 }
  0x1d   :  { %p7384_p11 = scmp.ne.s32.totalorder %s7601_s28, %s7383_s16  ;;  %p7389_p13 = scmp.lt.s32.totalorder %s7383_s16, %s7383_s16 }
  0x1f   :  { %p7390_p0 = por %p7389_p13, %p7388_p12 }
  0x21   :  { %p7391_p1 = pnand %p7390_p0, %p7384_p11 }
  0x23   :  { %7394 = shalt.err (!%p7391_p1)
}
  0x24   :  { %41 = dma.hbm_to_vmem [thread:$0]  %s8795_s3, 2048, %s7601_s28, [#allocation3], %s7517_s20, %s7517_s20, %s7518_s21  }
  0x25   :  { %s7519_s17 = smov [#allocation7]   ;;  %s7520_s19 = smov [#allocation8]  }
  0x26   :  { %s61_s18 = sshll.u32 %s7519_s17, 4  ;;  %s73_s22 = sshll.u32 %s7520_s19, 4  ;;  %s62_s18 = int_to_ptr.vmem [resolvable:$true] %s61_s18  ;;  %s7638_s22 = int_to_ptr.vmem [resolvable:$true] %s73_s22 }
  0x27   :  { %s7395_s25 = scalar_lea.hbm %s8798_s6, 4096 }
  0x28   :  { %p7396_p2 = scmp.ne.s32.totalorder %s8798_s6, %s7395_s25  ;;  %p7399_p3 = scmp.lt.u32.totalorder %s7395_s25, %s8798_s6 }
  0x2a   :  { %p7401_p4 = pnand %p7399_p3, %p7396_p2 }
  0x2c   :  { %7404 = shalt.err (!%p7401_p4)
}
  0x2d   :  { %s7405_s3 = scalar_lea.vmem %s62_s18, 4096  ;;  %p7410_p6 = scmp.lt.s32.totalorder %s62_s18, %s62_s18 }
  0x2e   :  { %p7406_p5 = scmp.ne.s32.totalorder %s62_s18, %s7405_s3  ;;  %p7411_p7 = scmp.lt.s32.totalorder %s7405_s3, %s7405_s3 }
  0x30   :  { %p7412_p8 = por %p7411_p7, %p7410_p6 }
  0x32   :  { %p7413_p9 = pnand %p7412_p8, %p7406_p5 }
  0x34   :  { %7416 = shalt.err (!%p7413_p9)
}
  0x35   :  { %67 = dma.hbm_to_vmem [thread:$0]  %s8798_s6, 4096, %s62_s18, [#allocation6], %s7517_s20, %s7517_s20, %s7518_s21  }
  0x36   :  { %s7417_s26 = scalar_lea.hbm %s8799_s7, 4096 }
  0x37   :  { %p7418_p10 = scmp.ne.s32.totalorder %s8799_s7, %s7417_s26  ;;  %p7421_p11 = scmp.lt.u32.totalorder %s7417_s26, %s8799_s7 }
  0x39   :  { %p7423_p12 = pnand %p7421_p11, %p7418_p10 }
  0x3b   :  { %7426 = shalt.err (!%p7423_p12)
}
  0x3c   :  { %s7427_s25 = scalar_lea.vmem %s7638_s22, 4096  ;;  %p7432_p0 = scmp.lt.s32.totalorder %s7638_s22, %s7638_s22 }
  0x3d   :  { %p7428_p13 = scmp.ne.s32.totalorder %s7638_s22, %s7427_s25  ;;  %p7433_p1 = scmp.lt.s32.totalorder %s7427_s25, %s7427_s25 }
  0x3f   :  { %p7434_p2 = por %p7433_p1, %p7432_p0 }
  0x41   :  { %p7435_p3 = pnand %p7434_p2, %p7428_p13 }
  0x43   :  { %7438 = shalt.err (!%p7435_p3)
}
  0x44   :  { %79 = dma.hbm_to_vmem [thread:$0]  %s8799_s7, 4096, %s7638_s22, [#allocation9], %s7517_s20, %s7517_s20, %s7518_s21  }
  0x45   :  { %7505 = dma.done.wait [#allocation3], 2048  }
  0x46   :  { %7506 = vsyncadd [#allocation3], 4294965248 }
  0x47   :  { %7507 = dma.done.wait [#allocation6], 8192  }
  0x48   :  { %7508 = vsyncadd [#allocation6], 4294959104 }
  0x49   :  { %7509 = dma.done.wait [#allocation9], 4096  }
  0x4a   :  { %7510 = vsyncadd [#allocation9], 4294963200  ;;  %v7521_v0 = vmov 0.0   ;;  %v99_v1 = vld [vmem:[#allocation2 + $0x8] sm:$0xff]  ;;  %v98_v3 = vld [vmem:[#allocation2] sm:$0xff]  ;;  %vm170_vm0 = vcmask 261120  }
  0x4b   :  { %241 = vmatprep.mubr.f32.mxu0 %v7521_v0  ;;  %318 = vmatprep.mubr.f32.mxu1 %v7521_v0  ;;  %v103_v2 = vld [vmem:[#allocation2 + $0x28] sm:$0xff]  ;;  %v102_v5 = vld [vmem:[#allocation2 + $0x20] sm:$0xff]  ;;  %v101_v6 = vld [vmem:[#allocation2 + $0x18] sm:$0xff]  ;;  %vm333_vm1 = vcmask 523264   ;;  %vm558_vm2 = vcmask 1041409   ;;  %vm2172_vm3 = vcmask 523271  }
  0x4c   :  { %v6007_v4 = vpack.c.bf16 %v103_v2, %v99_v1  ;;  %v105_v7 = vld [vmem:[#allocation2 + $0x38] sm:$0xff]  ;;  %v6009_v8 = vpack.c.bf16 %v102_v5, %v98_v3  ;;  %v100_v10 = vld [vmem:[#allocation2 + $0x10] sm:$0xff]  ;;  %v107_v12 = vld [vmem:[#allocation2 + $0x48] sm:$0xff]  ;;  %vm2174_vm4 = vcmask 516096   ;;  %vm7523_vm5 = vmmov 0  }
  0x4d   :  { %v6015_v9 = vpack.c.bf16 %v105_v7, %v101_v6  ;;  %v104_v11 = vld [vmem:[#allocation2 + $0x30] sm:$0xff]  ;;  %v111_v14 = vld [vmem:[#allocation2 + $0x68] sm:$0xff]  ;;  %v106_v15 = vld [vmem:[#allocation2 + $0x40] sm:$0xff]  ;;  %vm4913_vm6 = vcmask 253952   ;;  %vm4799_vm7 = vcmask 517120  }
  0x4e   :  { %6008 = vmatprep.subr.bf16.mxu0 %v6007_v4  ;;  %v6017_v13 = vpack.c.bf16 %v104_v11, %v100_v10  ;;  %v110_v16 = vld [vmem:[#allocation2 + $0x60] sm:$0xff]  ;;  %v6011_v17 = vpack.c.bf16 %v111_v14, %v107_v12  ;;  %v109_v19 = vld [vmem:[#allocation2 + $0x58] sm:$0xff]  ;;  %v108_v21 = vld [vmem:[#allocation2 + $0x50] sm:$0xff] }
  0x4f   :  { %6010 = vmatpush1.bf16.msra.mxu0 %v6009_v8  ;;  %6016 = vmatprep.subr.bf16.mxu1 %v6015_v9  ;;  %v6013_v18 = vpack.c.bf16 %v110_v16, %v106_v15  ;;  %v113_v20 = vld [vmem:[#allocation2 + $0x78] sm:$0xff]  ;;  %v112_v23 = vld [vmem:[#allocation2 + $0x70] sm:$0xff]  ;;  %v115_v24 = vld [vmem:[#allocation5 + $0x8] sm:$0xff] }
  0x50   :  { %6018 = vmatpush1.bf16.msra.mxu1 %v6017_v13  ;;  %v6019_v22 = vpack.c.bf16 %v113_v20, %v109_v19  ;;  %6012 = vmatprep.subr.bf16.mxu0 %v6011_v17  ;;  %v6021_v25 = vpack.c.bf16 %v112_v23, %v108_v21  ;;  %v147_v26 = vld [vmem:[%s8792_s0] sm:$0xff]  ;;  %v119_v27 = vld [vmem:[#allocation5 + $0x28] sm:$0xff]  ;;  %v117_v31 = vld [vmem:[#allocation5 + $0x18] sm:$0xff]  ;;  %v150_v13 = vlaneseq }
  0x51   :  { %v114_v28 = vld [vmem:[#allocation5] sm:$0xff]  ;;  %v7680_v30 = vpack.c.bf16 %v119_v27, %v115_v24  ;;  %v121_v32 = vld [vmem:[#allocation5 + $0x38] sm:$0xff]  ;;  %v116_v33 = vld [vmem:[#allocation5 + $0x10] sm:$0xff] }
  0x52   :  { %v118_v29 = vld [vmem:[#allocation5 + $0x20] sm:$0xff]  ;;  %6020 = vmatprep.subr.bf16.mxu1 %v6019_v22  ;;  %v7684_v35 = vpack.c.bf16 %v121_v32, %v117_v31  ;;  %v120_v36 = vld [vmem:[#allocation5 + $0x30] sm:$0xff]  ;;  %v123_v37 = vld [vmem:[#allocation5 + $0x48] sm:$0xff] }
  0x53   :  { %6014 = vmatpush1.bf16.msra.mxu0 %v6013_v18  ;;  %v7682_v34 = vpack.c.bf16 %v118_v29, %v114_v28  ;;  %v127_v38 = vld [vmem:[#allocation5 + $0x68] sm:$0xff]  ;;  %v7687_v39 = vpack.c.bf16 %v120_v36, %v116_v33  ;;  %v122_v41 = vld [vmem:[#allocation5 + $0x40] sm:$0xff]  ;;  %v125_v43 = vld [vmem:[#allocation5 + $0x58] sm:$0xff]  ;;  %v7764_v18 = vshrl.u32 %v150_v13, 7 }
  0x54   :  { %6022 = vmatpush1.bf16.msra.mxu1 %v6021_v25  ;;  %6024 = vmatprep.subr.bf16.mxu0 %v7680_v30  ;;  %v7689_v40 = vpack.c.bf16 %v127_v38, %v123_v37  ;;  %v126_v42 = vld [vmem:[#allocation5 + $0x60] sm:$0xff]  ;;  %v129_v44 = vld [vmem:[#allocation5 + $0x78] sm:$0xff]  ;;  %v124_v45 = vld [vmem:[#allocation5 + $0x50] sm:$0xff] }
  0x55   :  { %6040 = vmatprep.subr.bf16.mxu1 %v7684_v35  ;;  %v128_v46 = vld [vmem:[#allocation5 + $0x70] sm:$0xff]  ;;  %v7693_v47 = vpack.c.bf16 %v129_v44, %v125_v43  ;;  %v131_v48 = vld [vmem:[#allocation5 + $0x88] sm:$0xff]  ;;  %v7697_v50 = vpack.c.bf16 %v126_v42, %v122_v41  ;;  %v130_v51 = vld [vmem:[#allocation5 + $0x80] sm:$0xff]  ;;  %v152_v23 = vsub.s32 0, %v7764_v18  ;;  %v156_v25 = vsub.s32 1, %v7764_v18 }
  0x56   :  { %5648 = vmatmul.mubr.msk.f32.vlgmr.msra.gmra.mrb[0].mxu0 %vm170_vm0, %v147_v26  ;;  %v135_v49 = vld [vmem:[#allocation5 + $0xa8] sm:$0xff]  ;;  %v133_v52 = vld [vmem:[#allocation5 + $0x98] sm:$0xff]  ;;  %v7701_v54 = vpack.c.bf16 %v128_v46, %v124_v45  ;;  %v134_v56 = vld [vmem:[#allocation5 + $0xa0] sm:$0xff]  ;;  %v164_v28 = vsub.s32 3, %v7764_v18  ;;  %v160_v29 = vsub.s32 2, %v7764_v18 }
  0x57   :  { %6026 = vmatpush1.bf16.msra.mxu0 %v7682_v34  ;;  %5650 = vmatmul.mubr.msk.f32.vlgmr.msra.gmra.mrb[0].mxu1 %vm170_vm0, %v147_v26  ;;  %v137_v53 = vld [vmem:[#allocation5 + $0xb8] sm:$0xff]  ;;  %v7703_v55 = vpack.c.bf16 %v135_v49, %v131_v48  ;;  %v132_v57 = vld [vmem:[#allocation5 + $0x90] sm:$0xff]  ;;  %v148_v58 = vld [vmem:[%s8792_s0 + $0x8] sm:$0xff]  ;;  %v7715_v2 = vpack.c.bf16 %v134_v56, %v130_v51 }
  0x58   :  { %6042 = vmatpush1.bf16.msra.mxu1 %v7687_v39  ;;  %6028 = vmatprep.subr.bf16.mxu0 %v7689_v40  ;;  %v7709_v59 = vpack.c.bf16 %v137_v53, %v133_v52  ;;  %v136_v60 = vld [vmem:[#allocation5 + $0xb0] sm:$0xff]  ;;  %v139_v61 = vld [vmem:[#allocation5 + $0xc8] sm:$0xff]  ;;  %v141_v63 = vld [vmem:[#allocation5 + $0xd8] sm:$0xff] }
  0x59   :  { %6044 = vmatprep.subr.bf16.mxu1 %v7693_v47  ;;  %247 = vmatprep.mubr.f32.mxu0 %v7521_v0  ;;  %v143_v62 = vld [vmem:[#allocation5 + $0xe8] sm:$0xff]  ;;  %v145_v1 = vld [vmem:[#allocation5 + $0xf8] sm:$0xff]  ;;  %v7720_v3 = vpack.c.bf16 %v136_v60, %v132_v57  ;;  %v138_v5 = vld [vmem:[#allocation5 + $0xc0] sm:$0xff] }
  0x5a   :  { %5649 = vmatmul.mubr.msk.f32.gmra.mrb[2].mxu0 %vm170_vm0, %v148_v58  ;;  %324 = vmatprep.mubr.f32.mxu1 %v7521_v0  ;;  %v7722_v4 = vpack.c.bf16 %v143_v62, %v139_v61  ;;  %v142_v6 = vld [vmem:[#allocation5 + $0xe0] sm:$0xff]  ;;  %v7725_v7 = vpack.c.bf16 %v145_v1, %v141_v63  ;;  %v140_v8 = vld [vmem:[#allocation5 + $0xd0] sm:$0xff] }
  0x5b   :  { %6030 = vmatpush1.bf16.msra.mxu0 %v7697_v50  ;;  %5651 = vmatmul.mubr.msk.f32.gmra.mrb[2].mxu1 %vm170_vm0, %v148_v58  ;;  %v144_v9 = vld [vmem:[#allocation5 + $0xf0] sm:$0xff]  ;;  %v7730_v10 = vpack.c.bf16 %v142_v6, %v138_v5  ;;  %v331_v12 = vld [vmem:[%s8793_s1] sm:$0x3] }
  0x5c   :  { %6046 = vmatpush1.bf16.msra.mxu1 %v7701_v54  ;;  %6032 = vmatprep.subr.bf16.mxu0 %v7703_v55  ;;  %v7734_v11 = vpack.c.bf16 %v144_v9, %v140_v8  ;;  %v146_v24 = vld [vmem:[%s8797_s5] sm:$0xf] }
  0x5d   :  { %6048 = vmatprep.subr.bf16.mxu1 %v7709_v59  ;;  %401 = vmatprep.mubr.f32.mxu0 %v7521_v0  ;;  %v153_v26 = vrot.slane %v146_v24, %v152_v23  ;;  %v157_v27 = vrot.slane %v146_v24, %v156_v25  ;;  %v165_v33 = vrot.slane %v146_v24, %v164_v28 }
  0x5e   :  { %472 = vmatprep.mubr.f32.mxu1 %v7521_v0  ;;  %v161_v45 = vrot.slane %v146_v24, %v160_v29 }
  0x5f   :  { %6034 = vmatpush1.bf16.msra.mxu0 %v7715_v2 }
  0x60   :  { %6050 = vmatpush1.bf16.msra.mxu1 %v7720_v3  ;;  %6036 = vmatprep.subr.bf16.mxu0 %v7722_v4 }
  0x61   :  { %6052 = vmatprep.subr.bf16.mxu1 %v7725_v7 }
  0x63   :  { %6038 = vmatpush1.bf16.msra.mxu0 %v7730_v10 }
  0x64   :  { %6054 = vmatpush1.bf16.msra.mxu1 %v7734_v11  ;;  %6056 = vmatprep.subr.bf16.mxu0 %v7680_v30 }
  0x65   :  { %6072 = vmatprep.subr.bf16.mxu1 %v7684_v35 }
  0x66   :  { %5652 = vmatmul.mubr.msk.f32.vlgmr.msra.gmra.mrb[4].mxu0 %vm333_vm1, %v331_v12 }
  0x67   :  { %5653 = vmatmul.mubr.msk.f32.vlgmr.msra.gmra.mrb[4].mxu1 %vm333_vm1, %v331_v12  ;;  %6058 = vmatpush1.bf16.msra.mxu0 %v7682_v34 }
  0x68   :  { %6074 = vmatpush1.bf16.msra.mxu1 %v7687_v39  ;;  %6060 = vmatprep.subr.bf16.mxu0 %v7689_v40 }
  0x69   :  { %6076 = vmatprep.subr.bf16.mxu1 %v7693_v47  ;;  %626 = vmatprep.mubr.f32.mxu0 %v7521_v0 }
  0x6a   :  { %697 = vmatprep.mubr.f32.mxu1 %v7521_v0 }
  0x6b   :  { %6062 = vmatpush1.bf16.msra.mxu0 %v7697_v50 }
  0x6c   :  { %6078 = vmatpush1.bf16.msra.mxu1 %v7701_v54  ;;  %6064 = vmatprep.subr.bf16.mxu0 %v7703_v55 }
  0x6d   :  { %6080 = vmatprep.subr.bf16.mxu1 %v7709_v59 }
  0x6f   :  { %6066 = vmatpush1.bf16.msra.mxu0 %v7715_v2 }
  0x70   :  { %6082 = vmatpush1.bf16.msra.mxu1 %v7720_v3  ;;  %6068 = vmatprep.subr.bf16.mxu0 %v7722_v4 }
  0x71   :  { %6084 = vmatprep.subr.bf16.mxu1 %v7725_v7 }
  0x73   :  { %6070 = vmatpush1.bf16.msra.mxu0 %v7730_v10 }
  0x74   :  { %6086 = vmatpush1.bf16.msra.mxu1 %v7734_v11  ;;  %6088 = vmatprep.subr.bf16.mxu0 %v7680_v30 }
  0x75   :  { %6104 = vmatprep.subr.bf16.mxu1 %v7684_v35 }
 0x129   :  { %v243_v14 = vpop.f32.mrb[0].mxu0 }
 0x12a   :  { %v245_v15 = vpop.f32.mrb[1].mxu0  ;;  %v320_v16 = vpop.f32.mrb[0].mxu1  ;;  %v7777_v31 = vadd.f32 %v243_v14, %v153_v26 }
 0x12b   :  { %v322_v17 = vpop.f32.mrb[1].mxu1  ;;  %v7779_v32 = vadd.f32 %v245_v15, %v157_v27  ;;  %v7797_v62 = vadd.f32 %v320_v16, %v161_v45 }
 0x12c   :  { %v7792_v53 = vadd.f32 %v322_v17, %v165_v33 }
 0x12d   :  { %v249_v19 = vpop.f32.mrb[2].mxu0 }
 0x12e   :  { %v251_v20 = vpop.f32.mrb[3].mxu0  ;;  %v326_v21 = vpop.f32.mrb[2].mxu1  ;;  %v7783_v37 = vadd.f32 %v249_v19, %v153_v26 }
 0x12f   :  { %v328_v22 = vpop.f32.mrb[3].mxu1  ;;  %v7786_v44 = vadd.f32 %v251_v20, %v157_v27  ;;  %v7799_v1 = vadd.f32 %v326_v21, %v161_v45 }
 0x130   :  { %v7795_v58 = vadd.f32 %v328_v22, %v165_v33  ;;  %v332_v33 = vld [vmem:[%s8794_s2] sm:$0x3] }
 0x139   :  { %v403_v36 = vpop.f32.mrb[4].mxu0 }
 0x13a   :  { %v483_v38 = vrot.slane %v403_v36, 1  ;;  %v495_v41 = vadd.f32 %v403_v36, %v7777_v31  ;;  %v405_v42 = vpop.f32.mrb[5].mxu0  ;;  %v474_v43 = vpop.f32.mrb[4].mxu1 }
 0x13b   :  { %v484_v46 = vrot.slane %v405_v42, 1  ;;  %v496_v48 = vadd.f32 %v405_v42, %v7779_v32  ;;  %v476_v49 = vpop.f32.mrb[5].mxu1  ;;  %v485_v5 = vrot.slane %v474_v43, 1  ;;  %v497_v9 = vadd.f32 %v474_v43, %v7797_v62 }
 0x13c   :  { %v499_v51 = vadd.f32 %v483_v38, %v7783_v37  ;;  %v5654_v52 = vmul.f32 -1.442695, %v495_v41  ;;  %v486_v61 = vrot.slane %v476_v49, 1  ;;  %v498_v6 = vadd.f32 %v476_v49, %v7792_v53 }
 0x13d   :  { %v500_v56 = vadd.f32 %v484_v46, %v7786_v44  ;;  %v5656_v57 = vmul.f32 -1.442695, %v496_v48  ;;  %v501_v12 = vadd.f32 %v485_v5, %v7799_v1  ;;  %v542_v42 = vrot.slane %v332_v33, 1 }
 0x13e   :  { %6967 = vpow2.f32 %v5654_v52  ;;  %v5655_v60 = vmul.f32 -1.442695, %v499_v51  ;;  %v502_v8 = vadd.f32 %v486_v61, %v7795_v58  ;;  %v5658_v13 = vmul.f32 -1.442695, %v498_v6 }
 0x13f   :  { %6969 = vpow2.f32 %v5656_v57  ;;  %v5657_v63 = vmul.f32 -1.442695, %v500_v56 }
 0x140   :  { %6971 = vpow2.f32 %v5655_v60  ;;  %v5659_v14 = vmul.f32 -1.442695, %v502_v8 }
 0x141   :  { %6973 = vpow2.f32 %v5657_v63 }
 0x142   :  { %6975 = vtanh.f32 %v497_v9 }
 0x143   :  { %6977 = vtanh.f32 %v501_v12 }
 0x144   :  { %6979 = vpow2.f32 %v5658_v13 }
 0x145   :  { %6981 = vpow2.f32 %v5659_v14 }
 0x148   :  { %v6968_v15 = vpop.eup %6967 }
 0x149   :  { %v6970_v16 = vpop.eup %6969  ;;  %v509_v17 = vadd.f32 1.0, %v6968_v15 }
 0x14a   :  { %v6972_v19 = vpop.eup %6971  ;;  %v521_v20 = vadd.f32 1.0, %v6970_v16 }
 0x14b   :  { %v6974_v21 = vpop.eup %6973  ;;  %v510_v22 = vadd.f32 1.0, %v6972_v19  ;;  %6983 = vrcp.f32 %v509_v17 }
 0x14c   :  { %v522_v24 = vadd.f32 1.0, %v6974_v21  ;;  %6985 = vrcp.f32 %v521_v20  ;;  %v6976_v26 = vpop.eup %6975 }
 0x14d   :  { %6987 = vrcp.f32 %v510_v22  ;;  %v6978_v27 = vpop.eup %6977 }
 0x14e   :  { %6989 = vrcp.f32 %v522_v24  ;;  %v6980_v36 = vpop.eup %6979 }
 0x14f   :  { %v6982_v38 = vpop.eup %6981  ;;  %v535_v46 = vadd.f32 1.0, %v6980_v36 }
 0x150   :  { %v536_v56 = vadd.f32 1.0, %v6982_v38 }
 0x151   :  { %6991 = vrcp.f32 %v535_v46 }
 0x155   :  { %v6984_v41 = vpop.eup %6983 }
 0x156   :  { %v6986_v43 = vpop.eup %6985  ;;  %v547_v45 = vmul.f32 %v6984_v41, %v6976_v26 }
 0x157   :  { %v6988_v48 = vpop.eup %6987  ;;  %v545_v49 = vmul.f32 %v6986_v43, %v332_v33 }
 0x158   :  { %v6990_v51 = vpop.eup %6989  ;;  %v548_v52 = vmul.f32 %v6988_v48, %v6978_v27 }
 0x159   :  { %v546_v57 = vmul.f32 %v6990_v51, %v542_v42  ;;  %v7808_v60 = vadd.f32 %v547_v45, %v545_v49 }
 0x15b   :  { %v7810_v61 = vadd.f32 %v548_v52, %v546_v57  ;;  %6993 = vtanh.f32 %v7808_v60  ;;  %v6992_v63 = vpop.eup %6991 }
 0x15c   :  { %6995 = vrcp.f32 %v536_v56 }
 0x15d   :  { %6997 = vtanh.f32 %v7810_v61 }
 0x165   :  { %v6994_v5 = vpop.eup %6993 }
 0x166   :  { %v6996_v6 = vpop.eup %6995  ;;  %v553_v8 = vmul.f32 %v6994_v5, %v6992_v63 }
 0x167   :  { %v6998_v9 = vpop.eup %6997 }
 0x168   :  { %v554_v12 = vmul.f32 %v6998_v9, %v6996_v6 }
 0x16a   :  { %v557_v13 = vrot.slane %v554_v12, 7 }
 0x16c   :  { %v7815_v14 = vsel %vm558_vm2, %v557_v13, %v553_v8 }
 0x16d   :  { %5660 = vmatmul.mubr.msk.f32.vlgmr.msra.gmra.mrb[6].mxu0 %vm333_vm1, %v7815_v14  ;;  %5661 = vmatmul.mubr.msk.f32.vlgmr.msra.gmra.mrb[6].mxu1 %vm333_vm1, %v7815_v14 }
 0x16e   :  { %6090 = vmatpush1.bf16.msra.mxu0 %v7682_v34  ;;  %6106 = vmatpush1.bf16.msra.mxu1 %v7687_v39 }
 0x16f   :  { %6092 = vmatprep.subr.bf16.mxu0 %v7689_v40  ;;  %6108 = vmatprep.subr.bf16.mxu1 %v7693_v47 }
 0x170   :  { %852 = vmatprep.mubr.f32.mxu0 %v7521_v0  ;;  %923 = vmatprep.mubr.f32.mxu1 %v7521_v0 }
 0x172   :  { %6094 = vmatpush1.bf16.msra.mxu0 %v7697_v50  ;;  %6110 = vmatpush1.bf16.msra.mxu1 %v7701_v54 }
 0x173   :  { %6096 = vmatprep.subr.bf16.mxu0 %v7703_v55  ;;  %6112 = vmatprep.subr.bf16.mxu1 %v7709_v59 }
 0x176   :  { %6098 = vmatpush1.bf16.msra.mxu0 %v7715_v2  ;;  %6114 = vmatpush1.bf16.msra.mxu1 %v7720_v3 }
 0x177   :  { %6100 = vmatprep.subr.bf16.mxu0 %v7722_v4  ;;  %6116 = vmatprep.subr.bf16.mxu1 %v7725_v7 }
 0x17a   :  { %6102 = vmatpush1.bf16.msra.mxu0 %v7730_v10  ;;  %6118 = vmatpush1.bf16.msra.mxu1 %v7734_v11 }
 0x17b   :  { %6120 = vmatprep.subr.bf16.mxu0 %v7680_v30  ;;  %6136 = vmatprep.subr.bf16.mxu1 %v7684_v35 }
 0x240   :  { %v628_v15 = vpop.f32.mrb[6].mxu0  ;;  %v699_v16 = vpop.f32.mrb[6].mxu1 }
 0x241   :  { %v708_v17 = vrot.slane %v628_v15, 7  ;;  %v724_v19 = vadd.f32 %v628_v15, %v7783_v37  ;;  %v630_v20 = vpop.f32.mrb[7].mxu0  ;;  %v701_v21 = vpop.f32.mrb[7].mxu1  ;;  %v710_v46 = vrot.slane %v699_v16, 7  ;;  %v726_v48 = vadd.f32 %v699_v16, %v7799_v1 }
 0x242   :  { %v709_v22 = vrot.slane %v630_v20, 7  ;;  %v725_v24 = vadd.f32 %v630_v20, %v7786_v44  ;;  %v711_v36 = vrot.slane %v701_v21, 7  ;;  %v727_v45 = vadd.f32 %v701_v21, %v7795_v58 }
 0x243   :  { %v720_v26 = vadd.f32 %v708_v17, %v7777_v31  ;;  %v5663_v27 = vmul.f32 -1.442695, %v724_v19  ;;  %v722_v56 = vadd.f32 %v710_v46, %v7797_v62 }
 0x244   :  { %v721_v33 = vadd.f32 %v709_v22, %v7779_v32  ;;  %v5665_v41 = vmul.f32 -1.442695, %v725_v24  ;;  %v723_v43 = vadd.f32 %v711_v36, %v7792_v53  ;;  %v5667_v51 = vmul.f32 -1.442695, %v727_v45 }
 0x245   :  { %v5662_v38 = vmul.f32 -1.442695, %v720_v26  ;;  %6999 = vpow2.f32 %v5663_v27  ;;  %v768_v22 = vrot.slane %v7808_v60, 7 }
 0x246   :  { %v5664_v42 = vmul.f32 -1.442695, %v721_v33  ;;  %v5666_v49 = vmul.f32 -1.442695, %v723_v43  ;;  %v769_v33 = vrot.slane %v7810_v61, 7 }
 0x247   :  { %7001 = vpow2.f32 %v5662_v38 }
 0x248   :  { %7003 = vpow2.f32 %v5664_v42 }
 0x249   :  { %7005 = vpow2.f32 %v5665_v41 }
 0x24a   :  { %7007 = vtanh.f32 %v726_v48 }
 0x24b   :  { %7009 = vpow2.f32 %v5666_v49 }
 0x24c   :  { %7011 = vpow2.f32 %v5667_v51 }
 0x24f   :  { %v7000_v52 = vpop.eup %6999 }
 0x250   :  { %v735_v57 = vadd.f32 1.0, %v7000_v52 }
 0x251   :  { %v7002_v63 = vpop.eup %7001 }
 0x252   :  { %v7004_v5 = vpop.eup %7003  ;;  %v734_v6 = vadd.f32 1.0, %v7002_v63  ;;  %7013 = vrcp.f32 %v735_v57 }
 0x253   :  { %v7006_v8 = vpop.eup %7005  ;;  %7015 = vtanh.f32 %v722_v56  ;;  %v746_v9 = vadd.f32 1.0, %v7004_v5 }
 0x254   :  { %7017 = vrcp.f32 %v734_v6  ;;  %v747_v12 = vadd.f32 1.0, %v7006_v8  ;;  %v7008_v13 = vpop.eup %7007 }
 0x255   :  { %7019 = vrcp.f32 %v746_v9  ;;  %v7010_v15 = vpop.eup %7009 }
 0x256   :  { %7021 = vrcp.f32 %v747_v12  ;;  %v7012_v16 = vpop.eup %7011  ;;  %v760_v24 = vadd.f32 1.0, %v7010_v15 }
 0x257   :  { %v761_v36 = vadd.f32 1.0, %v7012_v16 }
 0x258   :  { %7023 = vrcp.f32 %v760_v24 }
 0x259   :  { %7025 = vrcp.f32 %v761_v36 }
 0x25c   :  { %v7014_v17 = vpop.eup %7013 }
 0x25d   :  { %v7016_v19 = vpop.eup %7015  ;;  %v775_v20 = vmul.f32 %v7014_v17, %v7008_v13 }
 0x25e   :  { %v7018_v21 = vpop.eup %7017 }
 0x25f   :  { %v7020_v26 = vpop.eup %7019  ;;  %v774_v27 = vmul.f32 %v7018_v21, %v7016_v19 }
 0x260   :  { %v7022_v38 = vpop.eup %7021  ;;  %v772_v41 = vmul.f32 %v7020_v26, %v768_v22 }
 0x261   :  { %v773_v42 = vmul.f32 %v7022_v38, %v769_v33 }
 0x262   :  { %v7849_v43 = vadd.f32 %v774_v27, %v772_v41  ;;  %v7024_v60 = vpop.eup %7023 }
 0x263   :  { %v7851_v45 = vadd.f32 %v775_v20, %v773_v42  ;;  %v7026_v46 = vpop.eup %7025 }
 0x264   :  { %7027 = vtanh.f32 %v7849_v43 }
 0x265   :  { %7029 = vtanh.f32 %v7851_v45 }
 0x26e   :  { %v7028_v48 = vpop.eup %7027 }
 0x26f   :  { %v7030_v49 = vpop.eup %7029  ;;  %v780_v51 = vmul.f32 %v7028_v48, %v7024_v60 }
 0x270   :  { %v781_v61 = vmul.f32 %v7030_v49, %v7026_v46 }
 0x271   :  { %v784_v52 = vrot.slane %v780_v51, 1 }
 0x273   :  { %v7856_v56 = vsel %vm558_vm2, %v781_v61, %v784_v52 }
 0x274   :  { %5668 = vmatmul.mubr.msk.f32.vlgmr.msra.gmra.mrb[8].mxu0 %vm333_vm1, %v7856_v56  ;;  %5669 = vmatmul.mubr.msk.f32.vlgmr.msra.gmra.mrb[8].mxu1 %vm333_vm1, %v7856_v56 }
 0x275   :  { %6122 = vmatpush1.bf16.msra.mxu0 %v7682_v34  ;;  %6138 = vmatpush1.bf16.msra.mxu1 %v7687_v39 }
 0x276   :  { %6124 = vmatprep.subr.bf16.mxu0 %v7689_v40  ;;  %6140 = vmatprep.subr.bf16.mxu1 %v7693_v47 }
 0x277   :  { %1083 = vmatprep.mubr.f32.mxu0 %v7521_v0  ;;  %1154 = vmatprep.mubr.f32.mxu1 %v7521_v0 }
 0x279   :  { %6126 = vmatpush1.bf16.msra.mxu0 %v7697_v50  ;;  %6142 = vmatpush1.bf16.msra.mxu1 %v7701_v54 }
 0x27a   :  { %6128 = vmatprep.subr.bf16.mxu0 %v7703_v55  ;;  %6144 = vmatprep.subr.bf16.mxu1 %v7709_v59 }
 0x27d   :  { %6130 = vmatpush1.bf16.msra.mxu0 %v7715_v2  ;;  %6146 = vmatpush1.bf16.msra.mxu1 %v7720_v3 }
 0x27e   :  { %6132 = vmatprep.subr.bf16.mxu0 %v7722_v4  ;;  %6148 = vmatprep.subr.bf16.mxu1 %v7725_v7 }
 0x281   :  { %6134 = vmatpush1.bf16.msra.mxu0 %v7730_v10  ;;  %6150 = vmatpush1.bf16.msra.mxu1 %v7734_v11 }
 0x282   :  { %6152 = vmatprep.subr.bf16.mxu0 %v7680_v30  ;;  %6168 = vmatprep.subr.bf16.mxu1 %v7684_v35 }
 0x347   :  { %v854_v57 = vpop.f32.mrb[8].mxu0  ;;  %v925_v63 = vpop.f32.mrb[8].mxu1 }
 0x348   :  { %v934_v5 = vrot.slane %v854_v57, 6  ;;  %v938_v6 = vrot.slane %v854_v57, 7  ;;  %v856_v8 = vpop.f32.mrb[9].mxu0  ;;  %v927_v9 = vpop.f32.mrb[9].mxu1  ;;  %v936_v33 = vrot.slane %v925_v63, 6  ;;  %v940_v36 = vrot.slane %v925_v63, 7 }
 0x349   :  { %v935_v12 = vrot.slane %v856_v8, 6  ;;  %v939_v13 = vrot.slane %v856_v8, 7  ;;  %v937_v26 = vrot.slane %v927_v9, 6  ;;  %v941_v27 = vrot.slane %v927_v9, 7 }
 0x34a   :  { %v950_v15 = vadd.f32 %v934_v5, %v7777_v31  ;;  %v954_v16 = vadd.f32 %v938_v6, %v7783_v37  ;;  %v952_v42 = vadd.f32 %v936_v33, %v7797_v62  ;;  %v956_v60 = vadd.f32 %v940_v36, %v7799_v1 }
 0x34b   :  { %v951_v17 = vadd.f32 %v935_v12, %v7779_v32  ;;  %v955_v19 = vadd.f32 %v939_v13, %v7786_v44  ;;  %v953_v38 = vadd.f32 %v937_v26, %v7792_v53  ;;  %v957_v41 = vadd.f32 %v941_v27, %v7795_v58 }
 0x34c   :  { %v5670_v20 = vmul.f32 -1.442695, %v950_v15  ;;  %v5671_v21 = vmul.f32 -1.442695, %v954_v16 }
 0x34d   :  { %v5672_v22 = vmul.f32 -1.442695, %v951_v17  ;;  %v5673_v24 = vmul.f32 -1.442695, %v955_v19  ;;  %v5674_v46 = vmul.f32 -1.442695, %v953_v38 }
 0x34e   :  { %7031 = vpow2.f32 %v5670_v20  ;;  %v5675_v48 = vmul.f32 -1.442695, %v957_v41  ;;  %v998_v19 = vrot.slane %v7849_v43, 7 }
 0x34f   :  { %7033 = vpow2.f32 %v5671_v21 }
 0x350   :  { %7035 = vpow2.f32 %v5672_v22 }
 0x351   :  { %7037 = vpow2.f32 %v5673_v24  ;;  %v999_v24 = vrot.slane %v7851_v45, 7 }
 0x352   :  { %7039 = vtanh.f32 %v952_v42 }
 0x353   :  { %7041 = vtanh.f32 %v956_v60 }
 0x354   :  { %7043 = vpow2.f32 %v5674_v46 }
 0x355   :  { %7045 = vpow2.f32 %v5675_v48 }
 0x358   :  { %v7032_v49 = vpop.eup %7031 }
 0x359   :  { %v7034_v51 = vpop.eup %7033  ;;  %v964_v61 = vadd.f32 1.0, %v7032_v49 }
 0x35a   :  { %v7036_v52 = vpop.eup %7035  ;;  %v965_v57 = vadd.f32 1.0, %v7034_v51 }
 0x35b   :  { %v7038_v63 = vpop.eup %7037  ;;  %7047 = vrcp.f32 %v964_v61  ;;  %v976_v5 = vadd.f32 1.0, %v7036_v52 }
 0x35c   :  { %7049 = vrcp.f32 %v965_v57  ;;  %v977_v6 = vadd.f32 1.0, %v7038_v63  ;;  %v7040_v8 = vpop.eup %7039 }
 0x35d   :  { %7051 = vrcp.f32 %v976_v5  ;;  %v7042_v9 = vpop.eup %7041 }
 0x35e   :  { %7053 = vrcp.f32 %v977_v6  ;;  %v7044_v12 = vpop.eup %7043 }
 0x35f   :  { %v7046_v13 = vpop.eup %7045  ;;  %v990_v20 = vadd.f32 1.0, %v7044_v12 }
 0x360   :  { %v991_v26 = vadd.f32 1.0, %v7046_v13 }
 0x361   :  { %7055 = vrcp.f32 %v990_v20 }
 0x362   :  { %7057 = vrcp.f32 %v991_v26 }
 0x365   :  { %v7048_v15 = vpop.eup %7047 }
 0x366   :  { %v7050_v16 = vpop.eup %7049  ;;  %v1004_v17 = vmul.f32 %v7048_v15, %v7040_v8 }
 0x367   :  { %v7052_v21 = vpop.eup %7051  ;;  %v1005_v22 = vmul.f32 %v7050_v16, %v7042_v9 }
 0x368   :  { %v7054_v27 = vpop.eup %7053  ;;  %v1002_v33 = vmul.f32 %v7052_v21, %v998_v19 }
 0x369   :  { %v1003_v36 = vmul.f32 %v7054_v27, %v999_v24 }
 0x36a   :  { %v7890_v38 = vadd.f32 %v1004_v17, %v1002_v33 }
 0x36b   :  { %v7892_v41 = vadd.f32 %v1005_v22, %v1003_v36  ;;  %v7056_v43 = vpop.eup %7055 }
 0x36c   :  { %7059 = vtanh.f32 %v7890_v38  ;;  %v7058_v42 = vpop.eup %7057 }
 0x36d   :  { %7061 = vtanh.f32 %v7892_v41 }
 0x376   :  { %v7060_v60 = vpop.eup %7059 }
 0x377   :  { %v7062_v46 = vpop.eup %7061  ;;  %v1010_v48 = vmul.f32 %v7060_v60, %v7056_v43 }
 0x378   :  { %v1011_v45 = vmul.f32 %v7062_v46, %v7058_v42 }
 0x379   :  { %v1014_v49 = vrot.slane %v1010_v48, 2 }
 0x37a   :  { %v1015_v51 = vrot.slane %v1011_v45, 1 }
 0x37c   :  { %v7897_v61 = vsel %vm558_vm2, %v1015_v51, %v1014_v49 }
 0x37d   :  { %5676 = vmatmul.mubr.msk.f32.vlgmr.msra.gmra.mrb[10].mxu0 %vm333_vm1, %v7897_v61  ;;  %5677 = vmatmul.mubr.msk.f32.vlgmr.msra.gmra.mrb[10].mxu1 %vm333_vm1, %v7897_v61 }
 0x37e   :  { %6154 = vmatpush1.bf16.msra.mxu0 %v7682_v34  ;;  %6170 = vmatpush1.bf16.msra.mxu1 %v7687_v39 }
 0x37f   :  { %6156 = vmatprep.subr.bf16.mxu0 %v7689_v40  ;;  %6172 = vmatprep.subr.bf16.mxu1 %v7693_v47 }
 0x380   :  { %1314 = vmatprep.mubr.f32.mxu0 %v7521_v0  ;;  %1385 = vmatprep.mubr.f32.mxu1 %v7521_v0 }
 0x382   :  { %6158 = vmatpush1.bf16.msra.mxu0 %v7697_v50  ;;  %6174 = vmatpush1.bf16.msra.mxu1 %v7701_v54 }
 0x383   :  { %6160 = vmatprep.subr.bf16.mxu0 %v7703_v55  ;;  %6176 = vmatprep.subr.bf16.mxu1 %v7709_v59 }
 0x386   :  { %6162 = vmatpush1.bf16.msra.mxu0 %v7715_v2  ;;  %6178 = vmatpush1.bf16.msra.mxu1 %v7720_v3 }
 0x387   :  { %6164 = vmatprep.subr.bf16.mxu0 %v7722_v4  ;;  %6180 = vmatprep.subr.bf16.mxu1 %v7725_v7 }
 0x38a   :  { %6166 = vmatpush1.bf16.msra.mxu0 %v7730_v10  ;;  %6182 = vmatpush1.bf16.msra.mxu1 %v7734_v11 }
 0x38b   :  { %6184 = vmatprep.subr.bf16.mxu0 %v7680_v30  ;;  %6200 = vmatprep.subr.bf16.mxu1 %v7684_v35 }
 0x450   :  { %v1085_v52 = vpop.f32.mrb[10].mxu0  ;;  %v1156_v57 = vpop.f32.mrb[10].mxu1 }
 0x451   :  { %v1165_v63 = vrot.slane %v1085_v52, 5  ;;  %v1169_v5 = vrot.slane %v1085_v52, 6  ;;  %v1087_v6 = vpop.f32.mrb[11].mxu0  ;;  %v1158_v8 = vpop.f32.mrb[11].mxu1  ;;  %v1167_v27 = vrot.slane %v1156_v57, 5  ;;  %v1171_v33 = vrot.slane %v1156_v57, 6 }
 0x452   :  { %v1166_v9 = vrot.slane %v1087_v6, 5  ;;  %v1170_v12 = vrot.slane %v1087_v6, 6  ;;  %v1168_v24 = vrot.slane %v1158_v8, 5  ;;  %v1172_v26 = vrot.slane %v1158_v8, 6 }
 0x453   :  { %v1181_v13 = vadd.f32 %v1165_v63, %v7777_v31  ;;  %v1185_v15 = vadd.f32 %v1169_v5, %v7783_v37  ;;  %v1183_v42 = vadd.f32 %v1167_v27, %v7797_v62  ;;  %v1187_v60 = vadd.f32 %v1171_v33, %v7799_v1 }
 0x454   :  { %v1182_v16 = vadd.f32 %v1166_v9, %v7779_v32  ;;  %v1186_v17 = vadd.f32 %v1170_v12, %v7786_v44  ;;  %v1184_v36 = vadd.f32 %v1168_v24, %v7792_v53  ;;  %v1188_v43 = vadd.f32 %v1172_v26, %v7795_v58 }
 0x455   :  { %v5678_v19 = vmul.f32 -1.442695, %v1181_v13  ;;  %v5679_v20 = vmul.f32 -1.442695, %v1185_v15  ;;  %v1230_v24 = vrot.slane %v7892_v41, 7 }
 0x456   :  { %v5680_v21 = vmul.f32 -1.442695, %v1182_v16  ;;  %v5681_v22 = vmul.f32 -1.442695, %v1186_v17  ;;  %v5682_v46 = vmul.f32 -1.442695, %v1184_v36 }
 0x457   :  { %7063 = vpow2.f32 %v5678_v19  ;;  %v5683_v48 = vmul.f32 -1.442695, %v1188_v43  ;;  %v1229_v19 = vrot.slane %v7890_v38, 7 }
 0x458   :  { %7065 = vpow2.f32 %v5679_v20 }
 0x459   :  { %7067 = vpow2.f32 %v5680_v21 }
 0x45a   :  { %7069 = vpow2.f32 %v5681_v22 }
 0x45b   :  { %7071 = vtanh.f32 %v1183_v42 }
 0x45c   :  { %7073 = vtanh.f32 %v1187_v60 }
 0x45d   :  { %7075 = vpow2.f32 %v5682_v46 }
 0x45e   :  { %7077 = vpow2.f32 %v5683_v48 }
 0x461   :  { %v7064_v45 = vpop.eup %7063 }
 0x462   :  { %v7066_v49 = vpop.eup %7065  ;;  %v1195_v51 = vadd.f32 1.0, %v7064_v45 }
 0x463   :  { %v7068_v52 = vpop.eup %7067  ;;  %v1196_v57 = vadd.f32 1.0, %v7066_v49 }
 0x464   :  { %v7070_v63 = vpop.eup %7069  ;;  %7079 = vrcp.f32 %v1195_v51  ;;  %v1207_v5 = vadd.f32 1.0, %v7068_v52 }
 0x465   :  { %7081 = vrcp.f32 %v1196_v57  ;;  %v1208_v6 = vadd.f32 1.0, %v7070_v63  ;;  %v7072_v8 = vpop.eup %7071 }
 0x466   :  { %7083 = vrcp.f32 %v1207_v5  ;;  %v7074_v9 = vpop.eup %7073 }
 0x467   :  { %7085 = vrcp.f32 %v1208_v6  ;;  %v7076_v12 = vpop.eup %7075 }
 0x468   :  { %v7078_v13 = vpop.eup %7077  ;;  %v1221_v20 = vadd.f32 1.0, %v7076_v12 }
 0x469   :  { %v1222_v26 = vadd.f32 1.0, %v7078_v13 }
 0x46a   :  { %7087 = vrcp.f32 %v1221_v20 }
 0x46b   :  { %7089 = vrcp.f32 %v1222_v26 }
 0x46e   :  { %v7080_v15 = vpop.eup %7079 }
 0x46f   :  { %v7082_v16 = vpop.eup %7081  ;;  %v1235_v17 = vmul.f32 %v7080_v15, %v7072_v8 }
 0x470   :  { %v7084_v21 = vpop.eup %7083  ;;  %v1236_v22 = vmul.f32 %v7082_v16, %v7074_v9 }
 0x471   :  { %v7086_v27 = vpop.eup %7085  ;;  %v1233_v33 = vmul.f32 %v7084_v21, %v1229_v19 }
 0x472   :  { %v1234_v36 = vmul.f32 %v7086_v27, %v1230_v24 }
 0x473   :  { %v7931_v43 = vadd.f32 %v1235_v17, %v1233_v33 }
 0x474   :  { %v7933_v42 = vadd.f32 %v1236_v22, %v1234_v36  ;;  %v7088_v38 = vpop.eup %7087 }
 0x475   :  { %7091 = vtanh.f32 %v7931_v43  ;;  %v7090_v60 = vpop.eup %7089 }
 0x476   :  { %7093 = vtanh.f32 %v7933_v42 }
 0x47f   :  { %v7092_v46 = vpop.eup %7091 }
 0x480   :  { %v7094_v48 = vpop.eup %7093  ;;  %v1241_v45 = vmul.f32 %v7092_v46, %v7088_v38 }
 0x481   :  { %v1242_v41 = vmul.f32 %v7094_v48, %v7090_v60 }
 0x482   :  { %v1245_v49 = vrot.slane %v1241_v45, 3 }
 0x483   :  { %v1246_v51 = vrot.slane %v1242_v41, 2 }
 0x485   :  { %v7938_v52 = vsel %vm558_vm2, %v1246_v51, %v1245_v49 }
 0x486   :  { %5684 = vmatmul.mubr.msk.f32.vlgmr.msra.gmra.mrb[12].mxu0 %vm333_vm1, %v7938_v52  ;;  %5685 = vmatmul.mubr.msk.f32.vlgmr.msra.gmra.mrb[12].mxu1 %vm333_vm1, %v7938_v52 }
 0x487   :  { %6186 = vmatpush1.bf16.msra.mxu0 %v7682_v34  ;;  %6202 = vmatpush1.bf16.msra.mxu1 %v7687_v39 }
 0x488   :  { %6188 = vmatprep.subr.bf16.mxu0 %v7689_v40  ;;  %6204 = vmatprep.subr.bf16.mxu1 %v7693_v47 }
 0x489   :  { %1545 = vmatprep.mubr.f32.mxu0 %v7521_v0  ;;  %1616 = vmatprep.mubr.f32.mxu1 %v7521_v0 }
 0x48b   :  { %6190 = vmatpush1.bf16.msra.mxu0 %v7697_v50  ;;  %6206 = vmatpush1.bf16.msra.mxu1 %v7701_v54 }
 0x48c   :  { %6192 = vmatprep.subr.bf16.mxu0 %v7703_v55  ;;  %6208 = vmatprep.subr.bf16.mxu1 %v7709_v59 }
 0x48f   :  { %6194 = vmatpush1.bf16.msra.mxu0 %v7715_v2  ;;  %6210 = vmatpush1.bf16.msra.mxu1 %v7720_v3 }
 0x490   :  { %6196 = vmatprep.subr.bf16.mxu0 %v7722_v4  ;;  %6212 = vmatprep.subr.bf16.mxu1 %v7725_v7 }
 0x493   :  { %6198 = vmatpush1.bf16.msra.mxu0 %v7730_v10  ;;  %6214 = vmatpush1.bf16.msra.mxu1 %v7734_v11 }
 0x494   :  { %6216 = vmatprep.subr.bf16.mxu0 %v7680_v30  ;;  %6232 = vmatprep.subr.bf16.mxu1 %v7684_v35 }
 0x559   :  { %v1316_v57 = vpop.f32.mrb[12].mxu0  ;;  %v1387_v63 = vpop.f32.mrb[12].mxu1 }
 0x55a   :  { %v1396_v5 = vrot.slane %v1316_v57, 4  ;;  %v1400_v6 = vrot.slane %v1316_v57, 5  ;;  %v1318_v8 = vpop.f32.mrb[13].mxu0  ;;  %v1389_v9 = vpop.f32.mrb[13].mxu1  ;;  %v1398_v33 = vrot.slane %v1387_v63, 4  ;;  %v1402_v36 = vrot.slane %v1387_v63, 5 }
 0x55b   :  { %v1397_v12 = vrot.slane %v1318_v8, 4  ;;  %v1401_v13 = vrot.slane %v1318_v8, 5  ;;  %v1399_v26 = vrot.slane %v1389_v9, 4  ;;  %v1403_v27 = vrot.slane %v1389_v9, 5 }
 0x55c   :  { %v1412_v15 = vadd.f32 %v1396_v5, %v7777_v31  ;;  %v1416_v16 = vadd.f32 %v1400_v6, %v7783_v37  ;;  %v1414_v46 = vadd.f32 %v1398_v33, %v7797_v62  ;;  %v1418_v48 = vadd.f32 %v1402_v36, %v7799_v1 }
 0x55d   :  { %v1413_v17 = vadd.f32 %v1397_v12, %v7779_v32  ;;  %v1417_v19 = vadd.f32 %v1401_v13, %v7786_v44  ;;  %v1415_v38 = vadd.f32 %v1399_v26, %v7792_v53  ;;  %v1419_v60 = vadd.f32 %v1403_v27, %v7795_v58 }
 0x55e   :  { %v5686_v20 = vmul.f32 -1.442695, %v1412_v15  ;;  %v5687_v21 = vmul.f32 -1.442695, %v1416_v16  ;;  %v1461_v27 = vrot.slane %v7933_v42, 7 }
 0x55f   :  { %v5688_v22 = vmul.f32 -1.442695, %v1413_v17  ;;  %v5689_v24 = vmul.f32 -1.442695, %v1417_v19  ;;  %v5690_v45 = vmul.f32 -1.442695, %v1415_v38 }
 0x560   :  { %7095 = vpow2.f32 %v5686_v20  ;;  %v5691_v41 = vmul.f32 -1.442695, %v1419_v60 }
 0x561   :  { %7097 = vpow2.f32 %v5687_v21  ;;  %v1460_v21 = vrot.slane %v7931_v43, 7 }
 0x562   :  { %7099 = vpow2.f32 %v5688_v22 }
 0x563   :  { %7101 = vpow2.f32 %v5689_v24 }
 0x564   :  { %7103 = vtanh.f32 %v1414_v46 }
 0x565   :  { %7105 = vtanh.f32 %v1418_v48 }
 0x566   :  { %7107 = vpow2.f32 %v5690_v45 }
 0x567   :  { %7109 = vpow2.f32 %v5691_v41 }
 0x56a   :  { %v7096_v49 = vpop.eup %7095 }
 0x56b   :  { %v7098_v51 = vpop.eup %7097  ;;  %v1426_v57 = vadd.f32 1.0, %v7096_v49 }
 0x56c   :  { %v7100_v5 = vpop.eup %7099  ;;  %v1427_v63 = vadd.f32 1.0, %v7098_v51 }
 0x56d   :  { %v7102_v6 = vpop.eup %7101  ;;  %7111 = vrcp.f32 %v1426_v57  ;;  %v1438_v8 = vadd.f32 1.0, %v7100_v5 }
 0x56e   :  { %7113 = vrcp.f32 %v1427_v63  ;;  %v1439_v9 = vadd.f32 1.0, %v7102_v6  ;;  %v7104_v12 = vpop.eup %7103 }
 0x56f   :  { %7115 = vrcp.f32 %v1438_v8  ;;  %v7106_v13 = vpop.eup %7105 }
 0x570   :  { %7117 = vrcp.f32 %v1439_v9  ;;  %v7108_v15 = vpop.eup %7107 }
 0x571   :  { %v7110_v16 = vpop.eup %7109  ;;  %v1452_v22 = vadd.f32 1.0, %v7108_v15 }
 0x572   :  { %v1453_v33 = vadd.f32 1.0, %v7110_v16 }
 0x573   :  { %7119 = vrcp.f32 %v1452_v22 }
 0x574   :  { %7121 = vrcp.f32 %v1453_v33 }
 0x577   :  { %v7112_v17 = vpop.eup %7111 }
 0x578   :  { %v7114_v19 = vpop.eup %7113  ;;  %v1466_v20 = vmul.f32 %v7112_v17, %v7104_v12 }
 0x579   :  { %v7116_v24 = vpop.eup %7115  ;;  %v1467_v26 = vmul.f32 %v7114_v19, %v7106_v13 }
 0x57a   :  { %v7118_v36 = vpop.eup %7117  ;;  %v1464_v38 = vmul.f32 %v7116_v24, %v1460_v21 }
 0x57b   :  { %v1465_v60 = vmul.f32 %v7118_v36, %v1461_v27 }
 0x57c   :  { %v7972_v46 = vadd.f32 %v1466_v20, %v1464_v38 }
 0x57d   :  { %v7974_v48 = vadd.f32 %v1467_v26, %v1465_v60  ;;  %v7120_v43 = vpop.eup %7119 }
 0x57e   :  { %7123 = vtanh.f32 %v7972_v46  ;;  %v7122_v45 = vpop.eup %7121 }
 0x57f   :  { %7125 = vtanh.f32 %v7974_v48 }
 0x588   :  { %v7124_v41 = vpop.eup %7123 }
 0x589   :  { %v7126_v49 = vpop.eup %7125  ;;  %v1472_v51 = vmul.f32 %v7124_v41, %v7120_v43 }
 0x58a   :  { %v1473_v42 = vmul.f32 %v7126_v49, %v7122_v45 }
 0x58b   :  { %v1476_v57 = vrot.slane %v1472_v51, 4 }
 0x58c   :  { %v1477_v5 = vrot.slane %v1473_v42, 3 }
 0x58e   :  { %v7979_v63 = vsel %vm558_vm2, %v1477_v5, %v1476_v57 }
 0x58f   :  { %5692 = vmatmul.mubr.msk.f32.vlgmr.msra.gmra.mrb[14].mxu0 %vm333_vm1, %v7979_v63  ;;  %5693 = vmatmul.mubr.msk.f32.vlgmr.msra.gmra.mrb[14].mxu1 %vm333_vm1, %v7979_v63 }
 0x590   :  { %6218 = vmatpush1.bf16.msra.mxu0 %v7682_v34  ;;  %6234 = vmatpush1.bf16.msra.mxu1 %v7687_v39 }
 0x591   :  { %6220 = vmatprep.subr.bf16.mxu0 %v7689_v40  ;;  %6236 = vmatprep.subr.bf16.mxu1 %v7693_v47 }
 0x592   :  { %1776 = vmatprep.mubr.f32.mxu0 %v7521_v0  ;;  %1847 = vmatprep.mubr.f32.mxu1 %v7521_v0 }
 0x594   :  { %6222 = vmatpush1.bf16.msra.mxu0 %v7697_v50  ;;  %6238 = vmatpush1.bf16.msra.mxu1 %v7701_v54 }
 0x595   :  { %6224 = vmatprep.subr.bf16.mxu0 %v7703_v55  ;;  %6240 = vmatprep.subr.bf16.mxu1 %v7709_v59 }
 0x598   :  { %6226 = vmatpush1.bf16.msra.mxu0 %v7715_v2  ;;  %6242 = vmatpush1.bf16.msra.mxu1 %v7720_v3 }
 0x599   :  { %6228 = vmatprep.subr.bf16.mxu0 %v7722_v4  ;;  %6244 = vmatprep.subr.bf16.mxu1 %v7725_v7 }
 0x59c   :  { %6230 = vmatpush1.bf16.msra.mxu0 %v7730_v10  ;;  %6246 = vmatpush1.bf16.msra.mxu1 %v7734_v11 }
 0x59d   :  { %6248 = vmatprep.subr.bf16.mxu0 %v7680_v30  ;;  %6264 = vmatprep.subr.bf16.mxu1 %v7684_v35 }
 0x662   :  { %v1547_v6 = vpop.f32.mrb[14].mxu0  ;;  %v1618_v8 = vpop.f32.mrb[14].mxu1 }
 0x663   :  { %v1627_v9 = vrot.slane %v1547_v6, 3  ;;  %v1631_v12 = vrot.slane %v1547_v6, 4  ;;  %v1549_v13 = vpop.f32.mrb[15].mxu0  ;;  %v1620_v15 = vpop.f32.mrb[15].mxu1  ;;  %v1629_v36 = vrot.slane %v1618_v8, 3  ;;  %v1633_v38 = vrot.slane %v1618_v8, 4 }
 0x664   :  { %v1628_v16 = vrot.slane %v1549_v13, 3  ;;  %v1632_v17 = vrot.slane %v1549_v13, 4  ;;  %v1630_v27 = vrot.slane %v1620_v15, 3  ;;  %v1634_v33 = vrot.slane %v1620_v15, 4 }
 0x665   :  { %v1643_v19 = vadd.f32 %v1627_v9, %v7777_v31  ;;  %v1647_v20 = vadd.f32 %v1631_v12, %v7783_v37  ;;  %v1645_v45 = vadd.f32 %v1629_v36, %v7797_v62  ;;  %v1649_v41 = vadd.f32 %v1633_v38, %v7799_v1 }
 0x666   :  { %v1644_v21 = vadd.f32 %v1628_v16, %v7779_v32  ;;  %v1648_v22 = vadd.f32 %v1632_v17, %v7786_v44  ;;  %v1646_v60 = vadd.f32 %v1630_v27, %v7792_v53  ;;  %v1650_v43 = vadd.f32 %v1634_v33, %v7795_v58 }
 0x667   :  { %v5694_v24 = vmul.f32 -1.442695, %v1643_v19  ;;  %v5695_v30 = vmul.f32 -1.442695, %v1647_v20  ;;  %v1692_v27 = vrot.slane %v7974_v48, 7 }
 0x668   :  { %v5696_v26 = vmul.f32 -1.442695, %v1644_v21  ;;  %v5697_v35 = vmul.f32 -1.442695, %v1648_v22  ;;  %v5698_v49 = vmul.f32 -1.442695, %v1646_v60 }
 0x669   :  { %7127 = vpow2.f32 %v5694_v24  ;;  %v5699_v51 = vmul.f32 -1.442695, %v1650_v43  ;;  %v1691_v24 = vrot.slane %v7972_v46, 7 }
 0x66a   :  { %7129 = vpow2.f32 %v5695_v30 }
 0x66b   :  { %7131 = vpow2.f32 %v5696_v26 }
 0x66c   :  { %7133 = vpow2.f32 %v5697_v35 }
 0x66d   :  { %7135 = vtanh.f32 %v1645_v45 }
 0x66e   :  { %7137 = vtanh.f32 %v1649_v41 }
 0x66f   :  { %7139 = vpow2.f32 %v5698_v49 }
 0x670   :  { %7141 = vpow2.f32 %v5699_v51 }
 0x673   :  { %v7128_v42 = vpop.eup %7127 }
 0x674   :  { %v7130_v57 = vpop.eup %7129  ;;  %v1657_v5 = vadd.f32 1.0, %v7128_v42 }
 0x675   :  { %v7132_v6 = vpop.eup %7131  ;;  %v1658_v8 = vadd.f32 1.0, %v7130_v57 }
 0x676   :  { %v7134_v9 = vpop.eup %7133  ;;  %7143 = vrcp.f32 %v1657_v5  ;;  %v1669_v12 = vadd.f32 1.0, %v7132_v6 }
 0x677   :  { %7145 = vrcp.f32 %v1658_v8  ;;  %v1670_v13 = vadd.f32 1.0, %v7134_v9  ;;  %v7136_v15 = vpop.eup %7135 }
 0x678   :  { %7147 = vrcp.f32 %v1669_v12  ;;  %v7138_v16 = vpop.eup %7137 }
 0x679   :  { %7149 = vrcp.f32 %v1670_v13  ;;  %v7140_v17 = vpop.eup %7139 }
 0x67a   :  { %v7142_v19 = vpop.eup %7141  ;;  %v1683_v30 = vadd.f32 1.0, %v7140_v17 }
 0x67b   :  { %v1684_v33 = vadd.f32 1.0, %v7142_v19 }
 0x67c   :  { %7151 = vrcp.f32 %v1683_v30 }
 0x67d   :  { %7153 = vrcp.f32 %v1684_v33 }
 0x680   :  { %v7144_v20 = vpop.eup %7143 }
 0x681   :  { %v7146_v21 = vpop.eup %7145  ;;  %v1697_v22 = vmul.f32 %v7144_v20, %v7136_v15 }
 0x682   :  { %v7148_v26 = vpop.eup %7147  ;;  %v1698_v35 = vmul.f32 %v7146_v21, %v7138_v16 }
 0x683   :  { %v7150_v36 = vpop.eup %7149  ;;  %v1695_v38 = vmul.f32 %v7148_v26, %v1691_v24 }
 0x684   :  { %v1696_v60 = vmul.f32 %v7150_v36, %v1692_v27 }
 0x685   :  { %v8013_v43 = vadd.f32 %v1697_v22, %v1695_v38 }
 0x686   :  { %v8015_v45 = vadd.f32 %v1698_v35, %v1696_v60  ;;  %v7152_v46 = vpop.eup %7151 }
 0x687   :  { %7155 = vtanh.f32 %v8013_v43  ;;  %v7154_v41 = vpop.eup %7153 }
 0x688   :  { %7157 = vtanh.f32 %v8015_v45 }
 0x691   :  { %v7156_v49 = vpop.eup %7155 }
 0x692   :  { %v7158_v51 = vpop.eup %7157  ;;  %v1703_v42 = vmul.f32 %v7156_v49, %v7152_v46 }
 0x693   :  { %v1704_v48 = vmul.f32 %v7158_v51, %v7154_v41 }
 0x694   :  { %v1707_v57 = vrot.slane %v1703_v42, 5 }
 0x695   :  { %v1708_v5 = vrot.slane %v1704_v48, 4 }
 0x697   :  { %v8020_v6 = vsel %vm558_vm2, %v1708_v5, %v1707_v57 }
 0x698   :  { %5700 = vmatmul.mubr.msk.f32.vlgmr.msra.gmra.mrb[16].mxu0 %vm333_vm1, %v8020_v6  ;;  %5701 = vmatmul.mubr.msk.f32.vlgmr.msra.gmra.mrb[16].mxu1 %vm333_vm1, %v8020_v6 }
 0x699   :  { %6250 = vmatpush1.bf16.msra.mxu0 %v7682_v34  ;;  %6266 = vmatpush1.bf16.msra.mxu1 %v7687_v39  ;;  %v2184_v34 = vld [vmem:[#allocation7 + $0x8] sm:$0xff] }
 0x69a   :  { %6252 = vmatprep.subr.bf16.mxu0 %v7689_v40  ;;  %6268 = vmatprep.subr.bf16.mxu1 %v7693_v47  ;;  %v2188_v39 = vld [vmem:[#allocation7 + $0x28] sm:$0xff]  ;;  %v2186_v40 = vld [vmem:[#allocation7 + $0x18] sm:$0xff] }
 0x69b   :  { %2007 = vmatprep.mubr.f32.mxu0 %v7521_v0  ;;  %2078 = vmatprep.mubr.f32.mxu1 %v7521_v0  ;;  %v8042_v47 = vpack.c.bf16 %v2188_v39, %v2184_v34 }
 0x69d   :  { %6254 = vmatpush1.bf16.msra.mxu0 %v7697_v50  ;;  %6270 = vmatpush1.bf16.msra.mxu1 %v7701_v54  ;;  %v2190_v50 = vld [vmem:[#allocation7 + $0x38] sm:$0xff] }
 0x69e   :  { %6256 = vmatprep.subr.bf16.mxu0 %v7703_v55  ;;  %6272 = vmatprep.subr.bf16.mxu1 %v7709_v59  ;;  %v8044_v54 = vpack.c.bf16 %v2190_v50, %v2186_v40 }
 0x6a1   :  { %6258 = vmatpush1.bf16.msra.mxu0 %v7715_v2  ;;  %6274 = vmatpush1.bf16.msra.mxu1 %v7720_v3 }
 0x6a2   :  { %6260 = vmatprep.subr.bf16.mxu0 %v7722_v4  ;;  %6276 = vmatprep.subr.bf16.mxu1 %v7725_v7 }
 0x6a5   :  { %6262 = vmatpush1.bf16.msra.mxu0 %v7730_v10  ;;  %6278 = vmatpush1.bf16.msra.mxu1 %v7734_v11 }
 0x6a6   :  { %6280 = vmatprep.subr.bf16.mxu0 %v8042_v47  ;;  %6296 = vmatprep.subr.bf16.mxu1 %v8044_v54 }
 0x76b   :  { %v1778_v55 = vpop.f32.mrb[16].mxu0  ;;  %v1849_v59 = vpop.f32.mrb[16].mxu1 }
 0x76c   :  { %v1858_v2 = vrot.slane %v1778_v55, 2  ;;  %v1862_v3 = vrot.slane %v1778_v55, 3  ;;  %v1780_v4 = vpop.f32.mrb[17].mxu0  ;;  %v1851_v7 = vpop.f32.mrb[17].mxu1  ;;  %v1860_v22 = vrot.slane %v1849_v59, 2  ;;  %v1864_v24 = vrot.slane %v1849_v59, 3 }
 0x76d   :  { %v1859_v10 = vrot.slane %v1780_v4, 2  ;;  %v1863_v11 = vrot.slane %v1780_v4, 3  ;;  %v1861_v20 = vrot.slane %v1851_v7, 2  ;;  %v1865_v21 = vrot.slane %v1851_v7, 3 }
 0x76e   :  { %v1874_v8 = vadd.f32 %v1858_v2, %v7777_v31  ;;  %v1878_v9 = vadd.f32 %v1862_v3, %v7783_v37  ;;  %v1876_v35 = vadd.f32 %v1860_v22, %v7797_v62  ;;  %v1880_v27 = vadd.f32 %v1864_v24, %v7799_v1  ;;  %v2189_v22 = vld [vmem:[#allocation7 + $0x30] sm:$0xff]  ;;  %v2192_v24 = vld [vmem:[#allocation7 + $0x48] sm:$0xff] }
 0x76f   :  { %v1875_v12 = vadd.f32 %v1859_v10, %v7779_v32  ;;  %v1879_v13 = vadd.f32 %v1863_v11, %v7786_v44  ;;  %v1877_v30 = vadd.f32 %v1861_v20, %v7792_v53  ;;  %v1881_v26 = vadd.f32 %v1865_v21, %v7795_v58  ;;  %v2185_v21 = vld [vmem:[#allocation7 + $0x10] sm:$0xff] }
 0x770   :  { %v5702_v15 = vmul.f32 -1.442695, %v1874_v8  ;;  %v5703_v16 = vmul.f32 -1.442695, %v1878_v9  ;;  %v1922_v59 = vrot.slane %v8013_v43, 7  ;;  %v1923_v7 = vrot.slane %v8015_v45, 7 }
 0x771   :  { %v5704_v17 = vmul.f32 -1.442695, %v1875_v12  ;;  %v5705_v19 = vmul.f32 -1.442695, %v1879_v13  ;;  %v5706_v33 = vmul.f32 -1.442695, %v1877_v30 }
 0x772   :  { %7159 = vpow2.f32 %v5702_v15  ;;  %v5707_v36 = vmul.f32 -1.442695, %v1881_v26  ;;  %v2196_v26 = vld [vmem:[#allocation7 + $0x68] sm:$0xff] }
 0x773   :  { %7161 = vpow2.f32 %v5703_v16 }
 0x774   :  { %7163 = vpow2.f32 %v5704_v17  ;;  %v2183_v17 = vld [vmem:[#allocation7] sm:$0xff] }
 0x775   :  { %7165 = vpow2.f32 %v5705_v19  ;;  %v2187_v19 = vld [vmem:[#allocation7 + $0x20] sm:$0xff] }
 0x776   :  { %7167 = vtanh.f32 %v1876_v35  ;;  %v2194_v35 = vld [vmem:[#allocation7 + $0x58] sm:$0xff] }
 0x777   :  { %7169 = vtanh.f32 %v1880_v27  ;;  %v2198_v27 = vld [vmem:[#allocation7 + $0x78] sm:$0xff] }
 0x778   :  { %7171 = vpow2.f32 %v5706_v33 }
 0x779   :  { %7173 = vpow2.f32 %v5707_v36 }
 0x77c   :  { %v7160_v38 = vpop.eup %7159 }
 0x77d   :  { %v7162_v60 = vpop.eup %7161  ;;  %v1888_v46 = vadd.f32 1.0, %v7160_v38  ;;  %v8064_v38 = vpack.c.bf16 %v2187_v19, %v2183_v17  ;;  %v2207_v17 = vld [vmem:[#allocation7 + $0xc0] sm:$0xff] }
 0x77e   :  { %v7164_v41 = vpop.eup %7163  ;;  %v1889_v49 = vadd.f32 1.0, %v7162_v60  ;;  %v8066_v60 = vpack.c.bf16 %v2189_v22, %v2185_v21  ;;  %v2209_v21 = vld [vmem:[#allocation7 + $0xd0] sm:$0xff] }
 0x77f   :  { %v7166_v51 = vpop.eup %7165  ;;  %7175 = vrcp.f32 %v1888_v46  ;;  %v1900_v42 = vadd.f32 1.0, %v7164_v41  ;;  %v2191_v46 = vld [vmem:[#allocation7 + $0x40] sm:$0xff]  ;;  %v2213_v22 = vld [vmem:[#allocation7 + $0xf0] sm:$0xff] }
 0x780   :  { %7177 = vrcp.f32 %v1889_v49  ;;  %v1901_v48 = vadd.f32 1.0, %v7166_v51  ;;  %v7168_v57 = vpop.eup %7167  ;;  %v2195_v41 = vld [vmem:[#allocation7 + $0x60] sm:$0xff]  ;;  %v8068_v49 = vpack.c.bf16 %v2196_v26, %v2192_v24  ;;  %v8070_v51 = vpack.c.bf16 %v2198_v27, %v2194_v35 }
 0x781   :  { %7179 = vrcp.f32 %v1900_v42  ;;  %v7170_v5 = vpop.eup %7169  ;;  %v2193_v42 = vld [vmem:[#allocation7 + $0x50] sm:$0xff] }
 0x782   :  { %7181 = vrcp.f32 %v1901_v48  ;;  %v7172_v34 = vpop.eup %7171  ;;  %v2197_v48 = vld [vmem:[#allocation7 + $0x70] sm:$0xff] }
 0x783   :  { %v7174_v39 = vpop.eup %7173  ;;  %v1914_v2 = vadd.f32 1.0, %v7172_v34  ;;  %v2204_v34 = vld [vmem:[#allocation7 + $0xa8] sm:$0xff] }
 0x784   :  { %v1915_v10 = vadd.f32 1.0, %v7174_v39  ;;  %v2202_v39 = vld [vmem:[#allocation7 + $0x98] sm:$0xff] }
 0x785   :  { %7183 = vrcp.f32 %v1914_v2  ;;  %v2203_v2 = vld [vmem:[#allocation7 + $0xa0] sm:$0xff] }
 0x786   :  { %7185 = vrcp.f32 %v1915_v10  ;;  %v2205_v10 = vld [vmem:[#allocation7 + $0xb0] sm:$0xff] }
 0x789   :  { %v7176_v40 = vpop.eup %7175 }
 0x78a   :  { %v7178_v50 = vpop.eup %7177  ;;  %v1928_v55 = vmul.f32 %v7176_v40, %v7168_v57  ;;  %v2200_v57 = vld [vmem:[#allocation7 + $0x88] sm:$0xff]  ;;  %v2206_v40 = vld [vmem:[#allocation7 + $0xb8] sm:$0xff] }
 0x78b   :  { %v7180_v3 = vpop.eup %7179  ;;  %v1929_v4 = vmul.f32 %v7178_v50, %v7170_v5  ;;  %v8081_v50 = vpack.c.bf16 %v2195_v41, %v2191_v46 }
 0x78c   :  { %v7182_v11 = vpop.eup %7181  ;;  %v1926_v8 = vmul.f32 %v7180_v3, %v1922_v59  ;;  %v2199_v59 = vld [vmem:[#allocation7 + $0x80] sm:$0xff]  ;;  %v8087_v3 = vpack.c.bf16 %v2204_v34, %v2200_v57 }
 0x78d   :  { %v1927_v9 = vmul.f32 %v7182_v11, %v1923_v7  ;;  %v2201_v7 = vld [vmem:[#allocation7 + $0x90] sm:$0xff]  ;;  %v2208_v11 = vld [vmem:[#allocation7 + $0xc8] sm:$0xff] }
 0x78e   :  { %v8058_v12 = vadd.f32 %v1928_v55, %v1926_v8  ;;  %v8083_v55 = vpack.c.bf16 %v2197_v48, %v2193_v42  ;;  %v2212_v8 = vld [vmem:[#allocation7 + $0xe8] sm:$0xff] }
 0x78f   :  { %v8060_v13 = vadd.f32 %v1929_v4, %v1927_v9  ;;  %v7184_v43 = vpop.eup %7183  ;;  %v8089_v4 = vpack.c.bf16 %v2206_v40, %v2202_v39  ;;  %v2210_v9 = vld [vmem:[#allocation7 + $0xd8] sm:$0xff]  ;;  %v8101_v19 = vpack.c.bf16 %v2212_v8, %v2208_v11 }
 0x790   :  { %7187 = vtanh.f32 %v8058_v12  ;;  %v7186_v15 = vpop.eup %7185 }
 0x791   :  { %7189 = vtanh.f32 %v8060_v13 }
 0x79a   :  { %v7188_v16 = vpop.eup %7187 }
 0x79b   :  { %v7190_v45 = vpop.eup %7189  ;;  %v1934_v20 = vmul.f32 %v7188_v16, %v7184_v43  ;;  %v2214_v43 = vld [vmem:[#allocation7 + $0xf8] sm:$0xff]  ;;  %v8097_v16 = vpack.c.bf16 %v2205_v10, %v2201_v7 }
 0x79c   :  { %v1935_v30 = vmul.f32 %v7190_v45, %v7186_v15  ;;  %v8095_v15 = vpack.c.bf16 %v2203_v2, %v2199_v59  ;;  %v8103_v45 = vpack.c.bf16 %v2214_v43, %v2210_v9 }
 0x79d   :  { %v1938_v33 = vrot.slane %v1934_v20, 6  ;;  %v2211_v20 = vld [vmem:[#allocation7 + $0xe0] sm:$0xff] }
 0x79e   :  { %v1939_v36 = vrot.slane %v1935_v30, 5  ;;  %v8107_v24 = vpack.c.bf16 %v2211_v20, %v2207_v17  ;;  %v8109_v30 = vpack.c.bf16 %v2213_v22, %v2209_v21  ;;  %v2154_v20 = vrot.slane %v8060_v13, 7 }
 0x7a0   :  { %v8073_v5 = vsel %vm558_vm2, %v1939_v36, %v1938_v33 }
 0x7a1   :  { %5708 = vmatmul.mubr.msk.f32.vlgmr.msra.gmra.mrb[18].mxu0 %vm333_vm1, %v8073_v5  ;;  %5709 = vmatmul.mubr.msk.f32.vlgmr.msra.gmra.mrb[18].mxu1 %vm333_vm1, %v8073_v5 }
 0x7a2   :  { %6282 = vmatpush1.bf16.msra.mxu0 %v8064_v38  ;;  %6298 = vmatpush1.bf16.msra.mxu1 %v8066_v60 }
 0x7a3   :  { %6284 = vmatprep.subr.bf16.mxu0 %v8068_v49  ;;  %6300 = vmatprep.subr.bf16.mxu1 %v8070_v51 }
 0x7a4   :  { %2333 = vmatprep.mubr.f32.mxu0 %v7521_v0  ;;  %2404 = vmatprep.mubr.f32.mxu1 %v7521_v0 }
 0x7a6   :  { %6286 = vmatpush1.bf16.msra.mxu0 %v8081_v50  ;;  %6302 = vmatpush1.bf16.msra.mxu1 %v8083_v55 }
 0x7a7   :  { %6288 = vmatprep.subr.bf16.mxu0 %v8087_v3  ;;  %6304 = vmatprep.subr.bf16.mxu1 %v8089_v4 }
 0x7aa   :  { %6290 = vmatpush1.bf16.msra.mxu0 %v8095_v15  ;;  %6306 = vmatpush1.bf16.msra.mxu1 %v8097_v16 }
 0x7ab   :  { %6292 = vmatprep.subr.bf16.mxu0 %v8101_v19  ;;  %6308 = vmatprep.subr.bf16.mxu1 %v8103_v45 }
 0x7ae   :  { %6294 = vmatpush1.bf16.msra.mxu0 %v8107_v24  ;;  %6310 = vmatpush1.bf16.msra.mxu1 %v8109_v30 }
 0x7af   :  { %6312 = vmatprep.subr.bf16.mxu0 %v8042_v47  ;;  %6328 = vmatprep.subr.bf16.mxu1 %v8044_v54 }
 0x7b1   :  { %5716 = vmatmul.mubr.msk.f32.vlgmr.msra.gmra.mrb[20].mxu0 %vm333_vm1, %v7815_v14  ;;  %5717 = vmatmul.mubr.msk.f32.vlgmr.msra.gmra.mrb[20].mxu1 %vm333_vm1, %v7815_v14  ;;  %v2216_v14 = vld [vmem:[#allocation8 + $0x8] sm:$0xff] }
 0x7b2   :  { %6314 = vmatpush1.bf16.msra.mxu0 %v8064_v38  ;;  %6330 = vmatpush1.bf16.msra.mxu1 %v8066_v60 }
 0x7b3   :  { %6316 = vmatprep.subr.bf16.mxu0 %v8068_v49  ;;  %6332 = vmatprep.subr.bf16.mxu1 %v8070_v51 }
 0x7b4   :  { %2475 = vmatprep.mubr.f32.mxu0 %v7521_v0  ;;  %2546 = vmatprep.mubr.f32.mxu1 %v7521_v0 }
 0x7b6   :  { %6318 = vmatpush1.bf16.msra.mxu0 %v8081_v50  ;;  %6334 = vmatpush1.bf16.msra.mxu1 %v8083_v55 }
 0x7b7   :  { %6320 = vmatprep.subr.bf16.mxu0 %v8087_v3  ;;  %6336 = vmatprep.subr.bf16.mxu1 %v8089_v4 }
 0x7ba   :  { %6322 = vmatpush1.bf16.msra.mxu0 %v8095_v15  ;;  %6338 = vmatpush1.bf16.msra.mxu1 %v8097_v16 }
 0x7bb   :  { %6324 = vmatprep.subr.bf16.mxu0 %v8101_v19  ;;  %6340 = vmatprep.subr.bf16.mxu1 %v8103_v45 }
 0x7be   :  { %6326 = vmatpush1.bf16.msra.mxu0 %v8107_v24  ;;  %6342 = vmatpush1.bf16.msra.mxu1 %v8109_v30 }
 0x7bf   :  { %6344 = vmatprep.subr.bf16.mxu0 %v8042_v47  ;;  %6360 = vmatprep.subr.bf16.mxu1 %v8044_v54 }
 0x7c1   :  { %5718 = vmatmul.mubr.msk.f32.vlgmr.msra.gmra.mrb[22].mxu0 %vm333_vm1, %v7856_v56  ;;  %5719 = vmatmul.mubr.msk.f32.vlgmr.msra.gmra.mrb[22].mxu1 %vm333_vm1, %v7856_v56  ;;  %v2220_v56 = vld [vmem:[#allocation8 + $0x28] sm:$0xff] }
 0x7c2   :  { %6346 = vmatpush1.bf16.msra.mxu0 %v8064_v38  ;;  %6362 = vmatpush1.bf16.msra.mxu1 %v8066_v60 }
 0x7c3   :  { %6348 = vmatprep.subr.bf16.mxu0 %v8068_v49  ;;  %6364 = vmatprep.subr.bf16.mxu1 %v8070_v51 }
 0x7c4   :  { %2617 = vmatprep.mubr.f32.mxu0 %v7521_v0  ;;  %2688 = vmatprep.mubr.f32.mxu1 %v7521_v0 }
 0x7c6   :  { %6350 = vmatpush1.bf16.msra.mxu0 %v8081_v50  ;;  %6366 = vmatpush1.bf16.msra.mxu1 %v8083_v55 }
 0x7c7   :  { %6352 = vmatprep.subr.bf16.mxu0 %v8087_v3  ;;  %6368 = vmatprep.subr.bf16.mxu1 %v8089_v4 }
 0x7ca   :  { %6354 = vmatpush1.bf16.msra.mxu0 %v8095_v15  ;;  %6370 = vmatpush1.bf16.msra.mxu1 %v8097_v16 }
 0x7cb   :  { %6356 = vmatprep.subr.bf16.mxu0 %v8101_v19  ;;  %6372 = vmatprep.subr.bf16.mxu1 %v8103_v45 }
 0x7ce   :  { %6358 = vmatpush1.bf16.msra.mxu0 %v8107_v24  ;;  %6374 = vmatpush1.bf16.msra.mxu1 %v8109_v30 }
 0x7cf   :  { %6376 = vmatprep.subr.bf16.mxu0 %v8042_v47  ;;  %6392 = vmatprep.subr.bf16.mxu1 %v8044_v54 }
 0x7d1   :  { %5720 = vmatmul.mubr.msk.f32.vlgmr.msra.gmra.mrb[24].mxu0 %vm333_vm1, %v7897_v61  ;;  %5721 = vmatmul.mubr.msk.f32.vlgmr.msra.gmra.mrb[24].mxu1 %vm333_vm1, %v7897_v61  ;;  %v2218_v61 = vld [vmem:[#allocation8 + $0x18] sm:$0xff] }
 0x7d2   :  { %6378 = vmatpush1.bf16.msra.mxu0 %v8064_v38  ;;  %6394 = vmatpush1.bf16.msra.mxu1 %v8066_v60 }
 0x7d3   :  { %6380 = vmatprep.subr.bf16.mxu0 %v8068_v49  ;;  %6396 = vmatprep.subr.bf16.mxu1 %v8070_v51 }
 0x7d4   :  { %2759 = vmatprep.mubr.f32.mxu0 %v7521_v0  ;;  %2830 = vmatprep.mubr.f32.mxu1 %v7521_v0 }
 0x7d6   :  { %6382 = vmatpush1.bf16.msra.mxu0 %v8081_v50  ;;  %6398 = vmatpush1.bf16.msra.mxu1 %v8083_v55 }
 0x7d7   :  { %6384 = vmatprep.subr.bf16.mxu0 %v8087_v3  ;;  %6400 = vmatprep.subr.bf16.mxu1 %v8089_v4 }
 0x7da   :  { %6386 = vmatpush1.bf16.msra.mxu0 %v8095_v15  ;;  %6402 = vmatpush1.bf16.msra.mxu1 %v8097_v16 }
 0x7db   :  { %6388 = vmatprep.subr.bf16.mxu0 %v8101_v19  ;;  %6404 = vmatprep.subr.bf16.mxu1 %v8103_v45 }
 0x7de   :  { %6390 = vmatpush1.bf16.msra.mxu0 %v8107_v24  ;;  %6406 = vmatpush1.bf16.msra.mxu1 %v8109_v30 }
 0x7df   :  { %6408 = vmatprep.subr.bf16.mxu0 %v8042_v47  ;;  %6424 = vmatprep.subr.bf16.mxu1 %v8044_v54 }
 0x7e1   :  { %5722 = vmatmul.mubr.msk.f32.vlgmr.msra.gmra.mrb[26].mxu0 %vm333_vm1, %v7938_v52  ;;  %5723 = vmatmul.mubr.msk.f32.vlgmr.msra.gmra.mrb[26].mxu1 %vm333_vm1, %v7938_v52  ;;  %v8267_v52 = vpack.c.bf16 %v2220_v56, %v2216_v14 }
 0x7e2   :  { %6410 = vmatpush1.bf16.msra.mxu0 %v8064_v38  ;;  %6426 = vmatpush1.bf16.msra.mxu1 %v8066_v60 }
 0x7e3   :  { %6412 = vmatprep.subr.bf16.mxu0 %v8068_v49  ;;  %6428 = vmatprep.subr.bf16.mxu1 %v8070_v51 }
 0x7e4   :  { %2901 = vmatprep.mubr.f32.mxu0 %v7521_v0  ;;  %2972 = vmatprep.mubr.f32.mxu1 %v7521_v0 }
 0x7e6   :  { %6414 = vmatpush1.bf16.msra.mxu0 %v8081_v50  ;;  %6430 = vmatpush1.bf16.msra.mxu1 %v8083_v55 }
 0x7e7   :  { %6416 = vmatprep.subr.bf16.mxu0 %v8087_v3  ;;  %6432 = vmatprep.subr.bf16.mxu1 %v8089_v4 }
 0x7ea   :  { %6418 = vmatpush1.bf16.msra.mxu0 %v8095_v15  ;;  %6434 = vmatpush1.bf16.msra.mxu1 %v8097_v16 }
 0x7eb   :  { %6420 = vmatprep.subr.bf16.mxu0 %v8101_v19  ;;  %6436 = vmatprep.subr.bf16.mxu1 %v8103_v45 }
 0x7ee   :  { %6422 = vmatpush1.bf16.msra.mxu0 %v8107_v24  ;;  %6438 = vmatpush1.bf16.msra.mxu1 %v8109_v30 }
 0x7ef   :  { %6440 = vmatprep.subr.bf16.mxu0 %v8042_v47  ;;  %6456 = vmatprep.subr.bf16.mxu1 %v8044_v54 }
 0x7f1   :  { %5724 = vmatmul.mubr.msk.f32.vlgmr.msra.gmra.mrb[28].mxu0 %vm333_vm1, %v7979_v63  ;;  %5725 = vmatmul.mubr.msk.f32.vlgmr.msra.gmra.mrb[28].mxu1 %vm333_vm1, %v7979_v63  ;;  %v2222_v63 = vld [vmem:[#allocation8 + $0x38] sm:$0xff] }
 0x7f2   :  { %6442 = vmatpush1.bf16.msra.mxu0 %v8064_v38  ;;  %6458 = vmatpush1.bf16.msra.mxu1 %v8066_v60 }
 0x7f3   :  { %6444 = vmatprep.subr.bf16.mxu0 %v8068_v49  ;;  %6460 = vmatprep.subr.bf16.mxu1 %v8070_v51 }
 0x7f4   :  { %3043 = vmatprep.mubr.f32.mxu0 %v7521_v0  ;;  %3114 = vmatprep.mubr.f32.mxu1 %v7521_v0 }
 0x7f6   :  { %6446 = vmatpush1.bf16.msra.mxu0 %v8081_v50  ;;  %6462 = vmatpush1.bf16.msra.mxu1 %v8083_v55 }
 0x7f7   :  { %6448 = vmatprep.subr.bf16.mxu0 %v8087_v3  ;;  %6464 = vmatprep.subr.bf16.mxu1 %v8089_v4 }
 0x7fa   :  { %6450 = vmatpush1.bf16.msra.mxu0 %v8095_v15  ;;  %6466 = vmatpush1.bf16.msra.mxu1 %v8097_v16 }
 0x7fb   :  { %6452 = vmatprep.subr.bf16.mxu0 %v8101_v19  ;;  %6468 = vmatprep.subr.bf16.mxu1 %v8103_v45 }
 0x7fe   :  { %6454 = vmatpush1.bf16.msra.mxu0 %v8107_v24  ;;  %6470 = vmatpush1.bf16.msra.mxu1 %v8109_v30 }
 0x7ff   :  { %6472 = vmatprep.subr.bf16.mxu0 %v8042_v47  ;;  %6488 = vmatprep.subr.bf16.mxu1 %v8044_v54 }
 0x801   :  { %5726 = vmatmul.mubr.msk.f32.vlgmr.msra.gmra.mrb[30].mxu0 %vm333_vm1, %v8020_v6  ;;  %5727 = vmatmul.mubr.msk.f32.vlgmr.msra.gmra.mrb[30].mxu1 %vm333_vm1, %v8020_v6  ;;  %v8269_v6 = vpack.c.bf16 %v2222_v63, %v2218_v61 }
 0x802   :  { %6474 = vmatpush1.bf16.msra.mxu0 %v8064_v38  ;;  %6490 = vmatpush1.bf16.msra.mxu1 %v8066_v60 }
 0x803   :  { %6476 = vmatprep.subr.bf16.mxu0 %v8068_v49  ;;  %6492 = vmatprep.subr.bf16.mxu1 %v8070_v51 }
 0x804   :  { %3185 = vmatprep.mubr.f32.mxu0 %v7521_v0  ;;  %3256 = vmatprep.mubr.f32.mxu1 %v7521_v0 }
 0x806   :  { %6478 = vmatpush1.bf16.msra.mxu0 %v8081_v50  ;;  %6494 = vmatpush1.bf16.msra.mxu1 %v8083_v55 }
 0x807   :  { %6480 = vmatprep.subr.bf16.mxu0 %v8087_v3  ;;  %6496 = vmatprep.subr.bf16.mxu1 %v8089_v4 }
 0x80a   :  { %6482 = vmatpush1.bf16.msra.mxu0 %v8095_v15  ;;  %6498 = vmatpush1.bf16.msra.mxu1 %v8097_v16 }
 0x80b   :  { %6484 = vmatprep.subr.bf16.mxu0 %v8101_v19  ;;  %6500 = vmatprep.subr.bf16.mxu1 %v8103_v45 }
 0x80e   :  { %6486 = vmatpush1.bf16.msra.mxu0 %v8107_v24  ;;  %6502 = vmatpush1.bf16.msra.mxu1 %v8109_v30 }
 0x80f   :  { %6504 = vmatprep.subr.bf16.mxu0 %v8042_v47  ;;  %6520 = vmatprep.subr.bf16.mxu1 %v8044_v54 }
 0x811   :  { %5728 = vmatmul.mubr.msk.f32.vlgmr.msra.gmra.mrb[32].mxu0 %vm333_vm1, %v8073_v5  ;;  %5729 = vmatmul.mubr.msk.f32.vlgmr.msra.gmra.mrb[32].mxu1 %vm333_vm1, %v8073_v5 }
 0x812   :  { %6506 = vmatpush1.bf16.msra.mxu0 %v8064_v38  ;;  %6522 = vmatpush1.bf16.msra.mxu1 %v8066_v60 }
 0x813   :  { %6508 = vmatprep.subr.bf16.mxu0 %v8068_v49  ;;  %6524 = vmatprep.subr.bf16.mxu1 %v8070_v51 }
 0x814   :  { %3332 = vmatprep.mubr.f32.mxu0 %v7521_v0  ;;  %3403 = vmatprep.mubr.f32.mxu1 %v7521_v0 }
 0x816   :  { %6510 = vmatpush1.bf16.msra.mxu0 %v8081_v50  ;;  %6526 = vmatpush1.bf16.msra.mxu1 %v8083_v55 }
 0x817   :  { %6512 = vmatprep.subr.bf16.mxu0 %v8087_v3  ;;  %6528 = vmatprep.subr.bf16.mxu1 %v8089_v4 }
 0x81a   :  { %6514 = vmatpush1.bf16.msra.mxu0 %v8095_v15  ;;  %6530 = vmatpush1.bf16.msra.mxu1 %v8097_v16  ;;  %v2153_v16 = vrot.slane %v8058_v12, 7 }
 0x81b   :  { %6516 = vmatprep.subr.bf16.mxu0 %v8101_v19  ;;  %6532 = vmatprep.subr.bf16.mxu1 %v8103_v45 }
 0x81e   :  { %6518 = vmatpush1.bf16.msra.mxu0 %v8107_v24  ;;  %6534 = vmatpush1.bf16.msra.mxu1 %v8109_v30 }
 0x81f   :  { %6536 = vmatprep.subr.bf16.mxu0 %v8267_v52  ;;  %6552 = vmatprep.subr.bf16.mxu1 %v8269_v6 }
 0x874   :  { %v2009_v47 = vpop.f32.mrb[18].mxu0  ;;  %v2080_v54 = vpop.f32.mrb[18].mxu1 }
 0x875   :  { %v2089_v26 = vrot.slane %v2009_v47, 1  ;;  %v2093_v35 = vrot.slane %v2009_v47, 2  ;;  %v2011_v27 = vpop.f32.mrb[19].mxu0  ;;  %v2082_v33 = vpop.f32.mrb[19].mxu1  ;;  %v2091_v39 = vrot.slane %v2080_v54, 1  ;;  %v2095_v40 = vrot.slane %v2080_v54, 2 }
 0x876   :  { %v2090_v36 = vrot.slane %v2011_v27, 1  ;;  %v2094_v38 = vrot.slane %v2011_v27, 2  ;;  %v2092_v5 = vrot.slane %v2082_v33, 1  ;;  %v2096_v34 = vrot.slane %v2082_v33, 2  ;;  %v2215_v47 = vld [vmem:[#allocation8] sm:$0xff]  ;;  %v2217_v27 = vld [vmem:[#allocation8 + $0x10] sm:$0xff] }
 0x877   :  { %v2105_v60 = vadd.f32 %v2089_v26, %v7777_v31  ;;  %v2109_v46 = vadd.f32 %v2093_v35, %v7783_v37  ;;  %v2219_v54 = vld [vmem:[#allocation8 + $0x20] sm:$0xff]  ;;  %v2221_v33 = vld [vmem:[#allocation8 + $0x30] sm:$0xff] }
 0x878   :  { %v2106_v41 = vadd.f32 %v2090_v36, %v7779_v32  ;;  %v2110_v49 = vadd.f32 %v2094_v38, %v7786_v44  ;;  %v2108_v31 = vadd.f32 %v2092_v5, %v7792_v53  ;;  %v2112_v37 = vadd.f32 %v2096_v34, %v7795_v58  ;;  %v2224_v36 = vld [vmem:[#allocation8 + $0x48] sm:$0xff]  ;;  %v2227_v5 = vld [vmem:[#allocation8 + $0x60] sm:$0xff] }
 0x879   :  { %v5710_v51 = vmul.f32 -1.442695, %v2105_v60  ;;  %v5711_v42 = vmul.f32 -1.442695, %v2109_v46  ;;  %v2107_v32 = vadd.f32 %v2091_v39, %v7797_v62  ;;  %v2111_v44 = vadd.f32 %v2095_v40, %v7799_v1  ;;  %v2228_v60 = vld [vmem:[#allocation8 + $0x68] sm:$0xff]  ;;  %v2226_v46 = vld [vmem:[#allocation8 + $0x58] sm:$0xff] }
 0x87a   :  { %v5712_v48 = vmul.f32 -1.442695, %v2106_v41  ;;  %v5713_v57 = vmul.f32 -1.442695, %v2110_v49  ;;  %v5714_v50 = vmul.f32 -1.442695, %v2108_v31  ;;  %v8292_v39 = vpack.c.bf16 %v2228_v60, %v2224_v36 }
 0x87b   :  { %7191 = vpow2.f32 %v5710_v51  ;;  %v5715_v55 = vmul.f32 -1.442695, %v2112_v37  ;;  %v2230_v41 = vld [vmem:[#allocation8 + $0x78] sm:$0xff]  ;;  %v2225_v31 = vld [vmem:[#allocation8 + $0x50] sm:$0xff] }
 0x87c   :  { %7193 = vpow2.f32 %v5711_v42  ;;  %v8288_v42 = vpack.c.bf16 %v2219_v54, %v2215_v47  ;;  %v8294_v40 = vpack.c.bf16 %v2230_v41, %v2226_v46  ;;  %v2229_v37 = vld [vmem:[#allocation8 + $0x70] sm:$0xff] }
 0x87d   :  { %7195 = vpow2.f32 %v5712_v48  ;;  %v8290_v48 = vpack.c.bf16 %v2221_v33, %v2217_v27 }
 0x87e   :  { %7197 = vpow2.f32 %v5713_v57  ;;  %v2223_v57 = vld [vmem:[#allocation8 + $0x40] sm:$0xff] }
 0x87f   :  { %7199 = vtanh.f32 %v2107_v32  ;;  %v2232_v32 = vld [vmem:[#allocation8 + $0x88] sm:$0xff] }
 0x880   :  { %7201 = vtanh.f32 %v2111_v44 }
 0x881   :  { %7203 = vpow2.f32 %v5714_v50  ;;  %v2236_v50 = vld [vmem:[#allocation8 + $0xa8] sm:$0xff] }
 0x882   :  { %7205 = vpow2.f32 %v5715_v55  ;;  %v2234_v55 = vld [vmem:[#allocation8 + $0x98] sm:$0xff] }
 0x885   :  { %v7192_v59 = vpop.eup %7191 }
 0x886   :  { %v7194_v2 = vpop.eup %7193  ;;  %v2119_v3 = vadd.f32 1.0, %v7192_v59  ;;  %v2238_v59 = vld [vmem:[#allocation8 + $0xb8] sm:$0xff] }
 0x887   :  { %v7196_v4 = vpop.eup %7195  ;;  %v2120_v7 = vadd.f32 1.0, %v7194_v2  ;;  %v8302_v2 = vpack.c.bf16 %v2227_v5, %v2223_v57  ;;  %v5733_v57 = vld [vmem:[%s8794_s2 + $0x2] sm:$0x3] }
 0x888   :  { %v7198_v10 = vpop.eup %7197  ;;  %7207 = vrcp.f32 %v2119_v3  ;;  %v2131_v53 = vadd.f32 1.0, %v7196_v4  ;;  %v8304_v3 = vpack.c.bf16 %v2229_v37, %v2225_v31  ;;  %v2231_v4 = vld [vmem:[#allocation8 + $0x80] sm:$0xff] }
 0x889   :  { %7209 = vrcp.f32 %v2120_v7  ;;  %v2132_v58 = vadd.f32 1.0, %v7198_v10  ;;  %v7200_v62 = vpop.eup %7199  ;;  %v2235_v7 = vld [vmem:[#allocation8 + $0xa0] sm:$0xff]  ;;  %v8308_v10 = vpack.c.bf16 %v2236_v50, %v2232_v32 }
 0x88a   :  { %7211 = vrcp.f32 %v2131_v53  ;;  %v7202_v1 = vpop.eup %7201  ;;  %v8310_v53 = vpack.c.bf16 %v2238_v59, %v2234_v55 }
 0x88b   :  { %7213 = vrcp.f32 %v2132_v58  ;;  %v7204_v11 = vpop.eup %7203  ;;  %v2233_v58 = vld [vmem:[#allocation8 + $0x90] sm:$0xff] }
 0x88c   :  { %v7206_v8 = vpop.eup %7205  ;;  %v2145_v17 = vadd.f32 1.0, %v7204_v11  ;;  %v2244_v11 = vld [vmem:[#allocation8 + $0xe8] sm:$0xff] }
 0x88d   :  { %v2146_v21 = vadd.f32 1.0, %v7206_v8  ;;  %v2242_v8 = vld [vmem:[#allocation8 + $0xd8] sm:$0xff] }
 0x88e   :  { %7215 = vrcp.f32 %v2145_v17 }
 0x88f   :  { %7217 = vrcp.f32 %v2146_v21  ;;  %v2245_v21 = vld [vmem:[#allocation8 + $0xf0] sm:$0xff] }
 0x892   :  { %v7208_v9 = vpop.eup %7207 }
 0x893   :  { %v7210_v43 = vpop.eup %7209  ;;  %v2159_v15 = vmul.f32 %v7208_v9, %v7200_v62  ;;  %v2237_v62 = vld [vmem:[#allocation8 + $0xb0] sm:$0xff]  ;;  %v2246_v9 = vld [vmem:[#allocation8 + $0xf8] sm:$0xff] }
 0x894   :  { %v7212_v19 = vpop.eup %7211  ;;  %v2160_v45 = vmul.f32 %v7210_v43, %v7202_v1  ;;  %v2240_v1 = vld [vmem:[#allocation8 + $0xc8] sm:$0xff]  ;;  %v8316_v43 = vpack.c.bf16 %v2235_v7, %v2231_v4 }
 0x895   :  { %v7214_v22 = vpop.eup %7213  ;;  %v2157_v24 = vmul.f32 %v7212_v19, %v2153_v16  ;;  %v2239_v16 = vld [vmem:[#allocation8 + $0xc0] sm:$0xff]  ;;  %v8322_v17 = vpack.c.bf16 %v2244_v11, %v2240_v1  ;;  %v8324_v19 = vpack.c.bf16 %v2246_v9, %v2242_v8 }
 0x896   :  { %v2158_v30 = vmul.f32 %v7214_v22, %v2154_v20  ;;  %v2241_v20 = vld [vmem:[#allocation8 + $0xd0] sm:$0xff] }
 0x897   :  { %v2161_v14 = vadd.f32 %v2159_v15, %v2157_v24  ;;  %v8318_v15 = vpack.c.bf16 %v2237_v62, %v2233_v58  ;;  %v8330_v24 = vpack.c.bf16 %v2245_v21, %v2241_v20 }
 0x898   :  { %v2162_v56 = vadd.f32 %v2160_v45, %v2158_v30  ;;  %v7216_v61 = vpop.eup %7215  ;;  %v2243_v45 = vld [vmem:[#allocation8 + $0xe0] sm:$0xff] }
 0x899   :  { %7219 = vtanh.f32 %v2161_v14  ;;  %2181 = vst.msk [vmem:[#allocation13 - $0x7] sm:$0x80] %vm2172_vm3, %v2161_v14  ;;  %v7218_v63 = vpop.eup %7217  ;;  %v8328_v22 = vpack.c.bf16 %v2243_v45, %v2239_v16  ;;  %v5732_v30 = vld [vmem:[%s8793_s1 + $0x2] sm:$0x3] }
 0x89a   :  { %7221 = vtanh.f32 %v2162_v56  ;;  %v2178_v12 = vrot.slane %v2162_v56, 7  ;;  %v2247_v14 = vld [vmem:[%s8800_s8] sm:$0xf] }
 0x89b   :  { %v8366_v56 = vrot.slane %v2247_v14, %v152_v23  ;;  %v8376_v27 = vrot.slane %v2247_v14, %v164_v28 }
 0x89c   :  { %2182 = vst.msk [vmem:[#allocation13 + $0x1] sm:$0x1] %vm2174_vm4, %v2178_v12  ;;  %v8370_v12 = vrot.slane %v2247_v14, %v156_v25  ;;  %v8381_v25 = vrot.slane %v2247_v14, %v160_v29 }
 0x8a3   :  { %v7220_v13 = vpop.eup %7219 }
 0x8a4   :  { %v7222_v26 = vpop.eup %7221  ;;  %v2165_v35 = vmul.f32 %v7220_v13, %v7216_v61 }
 0x8a5   :  { %v2166_v38 = vmul.f32 %v7222_v26, %v7218_v63 }
 0x8a6   :  { %v3263_v49 = vrot.slane %v2165_v35, 7  ;;  %2173 = vst.msk [vmem:[#allocation11 - $0x7] sm:$0x80] %vm2172_vm3, %v2165_v35 }
 0x8a7   :  { %v3264_v51 = vrot.slane %v2166_v38, 6  ;;  %v2169_v34 = vrot.slane %v2166_v38, 7 }
 0x8a9   :  { %v3265_v44 = vsel %vm558_vm2, %v3264_v51, %v3263_v49  ;;  %2175 = vst.msk [vmem:[#allocation11 + $0x1] sm:$0x1] %vm2174_vm4, %v2169_v34 }
 0x8aa   :  { %5730 = vmatmul.mubr.msk.f32.vlgmr.msra.gmra.mrb[34].mxu0 %vm333_vm1, %v3265_v44  ;;  %5731 = vmatmul.mubr.msk.f32.vlgmr.msra.gmra.mrb[34].mxu1 %vm333_vm1, %v3265_v44 }
 0x8ab   :  { %6538 = vmatpush1.bf16.msra.mxu0 %v8288_v42  ;;  %6554 = vmatpush1.bf16.msra.mxu1 %v8290_v48 }
 0x8ac   :  { %6540 = vmatprep.subr.bf16.mxu0 %v8292_v39  ;;  %6556 = vmatprep.subr.bf16.mxu1 %v8294_v40 }
 0x8ad   :  { %3481 = vmatprep.mubr.f32.mxu0 %v7521_v0  ;;  %3552 = vmatprep.mubr.f32.mxu1 %v7521_v0 }
 0x8af   :  { %6542 = vmatpush1.bf16.msra.mxu0 %v8302_v2  ;;  %6558 = vmatpush1.bf16.msra.mxu1 %v8304_v3 }
 0x8b0   :  { %6544 = vmatprep.subr.bf16.mxu0 %v8308_v10  ;;  %6560 = vmatprep.subr.bf16.mxu1 %v8310_v53 }
 0x8b3   :  { %6546 = vmatpush1.bf16.msra.mxu0 %v8316_v43  ;;  %6562 = vmatpush1.bf16.msra.mxu1 %v8318_v15 }
 0x8b4   :  { %6548 = vmatprep.subr.bf16.mxu0 %v8322_v17  ;;  %6564 = vmatprep.subr.bf16.mxu1 %v8324_v19 }
 0x8b7   :  { %6550 = vmatpush1.bf16.msra.mxu0 %v8328_v22  ;;  %6566 = vmatpush1.bf16.msra.mxu1 %v8330_v24 }
 0x8b8   :  { %6568 = vmatprep.subr.bf16.mxu0 %v8267_v52  ;;  %6584 = vmatprep.subr.bf16.mxu1 %v8269_v6 }
 0x8ba   :  { %5734 = vmatmul.mubr.msk.f32.vlgmr.msra.gmra.mrb[20].mxu0 %vm333_vm1, %v5732_v30  ;;  %5735 = vmatmul.mubr.msk.f32.vlgmr.msra.gmra.mrb[20].mxu1 %vm333_vm1, %v5732_v30 }
 0x8bb   :  { %6570 = vmatpush1.bf16.msra.mxu0 %v8288_v42  ;;  %6586 = vmatpush1.bf16.msra.mxu1 %v8290_v48 }
 0x8bc   :  { %6572 = vmatprep.subr.bf16.mxu0 %v8292_v39  ;;  %6588 = vmatprep.subr.bf16.mxu1 %v8294_v40 }
 0x8bd   :  { %3654 = vmatprep.mubr.f32.mxu0 %v7521_v0  ;;  %3725 = vmatprep.mubr.f32.mxu1 %v7521_v0 }
 0x8bf   :  { %6574 = vmatpush1.bf16.msra.mxu0 %v8302_v2  ;;  %6590 = vmatpush1.bf16.msra.mxu1 %v8304_v3 }
 0x8c0   :  { %6576 = vmatprep.subr.bf16.mxu0 %v8308_v10  ;;  %6592 = vmatprep.subr.bf16.mxu1 %v8310_v53 }
 0x8c3   :  { %6578 = vmatpush1.bf16.msra.mxu0 %v8316_v43  ;;  %6594 = vmatpush1.bf16.msra.mxu1 %v8318_v15 }
 0x8c4   :  { %6580 = vmatprep.subr.bf16.mxu0 %v8322_v17  ;;  %6596 = vmatprep.subr.bf16.mxu1 %v8324_v19 }
 0x8c7   :  { %6582 = vmatpush1.bf16.msra.mxu0 %v8328_v22  ;;  %6598 = vmatpush1.bf16.msra.mxu1 %v8330_v24 }
 0x8c8   :  { %6600 = vmatprep.subr.bf16.mxu0 %v8267_v52  ;;  %6616 = vmatprep.subr.bf16.mxu1 %v8269_v6 }
 0x98d   :  { %v3483_v61 = vpop.f32.mrb[20].mxu0  ;;  %v3554_v63 = vpop.f32.mrb[20].mxu1 }
 0x98e   :  { %v6887_v13 = vadd.f32 %v3483_v61, %v8366_v56  ;;  %v3485_v47 = vpop.f32.mrb[21].mxu0  ;;  %v3556_v54 = vpop.f32.mrb[21].mxu1  ;;  %v6889_v38 = vadd.f32 %v3554_v63, %v8381_v25 }
 0x98f   :  { %v6888_v26 = vadd.f32 %v3485_v47, %v8370_v12  ;;  %v6890_v23 = vadd.f32 %v3556_v54, %v8376_v27 }
 0x990   :  { %v5736_v35 = vmul.f32 -1.442695, %v6887_v13 }
 0x991   :  { %v5737_v33 = vmul.f32 -1.442695, %v6888_v26  ;;  %v5738_v36 = vmul.f32 -1.442695, %v6890_v23 }
 0x992   :  { %7223 = vpow2.f32 %v5736_v35 }
 0x993   :  { %7225 = vpow2.f32 %v5737_v33 }
 0x994   :  { %7227 = vpow2.f32 %v5738_v36 }
 0x995   :  { %7229 = vtanh.f32 %v6889_v38 }
 0x99c   :  { %v7224_v60 = vpop.eup %7223 }
 0x99d   :  { %v7226_v46 = vpop.eup %7225  ;;  %v3566_v41 = vadd.f32 1.0, %v7224_v60 }
 0x99e   :  { %v3572_v49 = vadd.f32 1.0, %v7226_v46  ;;  %v7228_v28 = vpop.eup %7227 }
 0x99f   :  { %7231 = vrcp.f32 %v3566_v41  ;;  %v7230_v51 = vpop.eup %7229  ;;  %v3579_v31 = vadd.f32 1.0, %v7228_v28 }
 0x9a0   :  { %7233 = vrcp.f32 %v3572_v49 }
 0x9a1   :  { %7235 = vrcp.f32 %v3579_v31 }
 0x9a9   :  { %v7232_v5 = vpop.eup %7231 }
 0x9aa   :  { %v7234_v29 = vpop.eup %7233  ;;  %v3583_v34 = vmul.f32 %v7232_v5, %v7230_v51 }
 0x9ab   :  { %v3582_v37 = vmul.f32 %v7234_v29, %v5733_v57  ;;  %v7236_v44 = vpop.eup %7235 }
 0x9ad   :  { %v3584_v32 = vadd.f32 %v3583_v34, %v3582_v37 }
 0x9af   :  { %7237 = vtanh.f32 %v3584_v32 }
 0x9b9   :  { %v7238_v50 = vpop.eup %7237 }
 0x9ba   :  { %v8387_v55 = vmul.f32 %v7238_v50, %v7236_v44 }
 0x9bc   :  { %5739 = vmatmul.mubr.msk.f32.vlgmr.msra.gmra.mrb[22].mxu0 %vm333_vm1, %v8387_v55  ;;  %5740 = vmatmul.mubr.msk.f32.vlgmr.msra.gmra.mrb[22].mxu1 %vm333_vm1, %v8387_v55 }
 0x9bd   :  { %6602 = vmatpush1.bf16.msra.mxu0 %v8288_v42  ;;  %6618 = vmatpush1.bf16.msra.mxu1 %v8290_v48 }
 0x9be   :  { %6604 = vmatprep.subr.bf16.mxu0 %v8292_v39  ;;  %6620 = vmatprep.subr.bf16.mxu1 %v8294_v40 }
 0x9bf   :  { %3827 = vmatprep.mubr.f32.mxu0 %v7521_v0  ;;  %3898 = vmatprep.mubr.f32.mxu1 %v7521_v0 }
 0x9c1   :  { %6606 = vmatpush1.bf16.msra.mxu0 %v8302_v2  ;;  %6622 = vmatpush1.bf16.msra.mxu1 %v8304_v3 }
 0x9c2   :  { %6608 = vmatprep.subr.bf16.mxu0 %v8308_v10  ;;  %6624 = vmatprep.subr.bf16.mxu1 %v8310_v53 }
 0x9c5   :  { %6610 = vmatpush1.bf16.msra.mxu0 %v8316_v43  ;;  %6626 = vmatpush1.bf16.msra.mxu1 %v8318_v15 }
 0x9c6   :  { %6612 = vmatprep.subr.bf16.mxu0 %v8322_v17  ;;  %6628 = vmatprep.subr.bf16.mxu1 %v8324_v19 }
 0x9c9   :  { %6614 = vmatpush1.bf16.msra.mxu0 %v8328_v22  ;;  %6630 = vmatpush1.bf16.msra.mxu1 %v8330_v24 }
 0x9ca   :  { %6632 = vmatprep.subr.bf16.mxu0 %v8267_v52  ;;  %6648 = vmatprep.subr.bf16.mxu1 %v8269_v6 }
 0xa8f   :  { %v3656_v59 = vpop.f32.mrb[22].mxu0  ;;  %v3727_v4 = vpop.f32.mrb[22].mxu1 }
 0xa90   :  { %v6891_v7 = vadd.f32 %v3656_v59, %v8366_v56  ;;  %v3658_v58 = vpop.f32.mrb[23].mxu0  ;;  %v3729_v62 = vpop.f32.mrb[23].mxu1  ;;  %v6893_v45 = vadd.f32 %v3727_v4, %v8381_v25 }
 0xa91   :  { %v6892_v1 = vadd.f32 %v3658_v58, %v8370_v12  ;;  %v6894_v9 = vadd.f32 %v3729_v62, %v8376_v27 }
 0xa92   :  { %v5741_v11 = vmul.f32 -1.442695, %v6891_v7 }
 0xa93   :  { %v5742_v8 = vmul.f32 -1.442695, %v6892_v1  ;;  %v5743_v16 = vmul.f32 -1.442695, %v6894_v9 }
 0xa94   :  { %7239 = vpow2.f32 %v5741_v11 }
 0xa95   :  { %7241 = vpow2.f32 %v5742_v8 }
 0xa96   :  { %7243 = vpow2.f32 %v5743_v16 }
 0xa97   :  { %7245 = vtanh.f32 %v6893_v45 }
 0xa9e   :  { %v7240_v20 = vpop.eup %7239 }
 0xa9f   :  { %v7242_v21 = vpop.eup %7241  ;;  %v3739_v30 = vadd.f32 1.0, %v7240_v20 }
 0xaa0   :  { %v3745_v14 = vadd.f32 1.0, %v7242_v21  ;;  %v7244_v61 = vpop.eup %7243 }
 0xaa1   :  { %7247 = vrcp.f32 %v3739_v30  ;;  %v7246_v63 = vpop.eup %7245  ;;  %v3752_v26 = vadd.f32 1.0, %v7244_v61 }
 0xaa2   :  { %7249 = vrcp.f32 %v3745_v14 }
 0xaa3   :  { %7251 = vrcp.f32 %v3752_v26 }
 0xaab   :  { %v7248_v13 = vpop.eup %7247 }
 0xaac   :  { %v7250_v47 = vpop.eup %7249  ;;  %v3756_v54 = vmul.f32 %v7248_v13, %v7246_v63 }
 0xaad   :  { %v3755_v35 = vmul.f32 %v7250_v47, %v3584_v32  ;;  %v7252_v23 = vpop.eup %7251 }
 0xaaf   :  { %v3757_v33 = vadd.f32 %v3756_v54, %v3755_v35 }
 0xab1   :  { %7253 = vtanh.f32 %v3757_v33 }
 0xabb   :  { %v7254_v36 = vpop.eup %7253 }
 0xabc   :  { %v8415_v38 = vmul.f32 %v7254_v36, %v7252_v23 }
 0xabe   :  { %5744 = vmatmul.mubr.msk.f32.vlgmr.msra.gmra.mrb[24].mxu0 %vm333_vm1, %v8415_v38  ;;  %5745 = vmatmul.mubr.msk.f32.vlgmr.msra.gmra.mrb[24].mxu1 %vm333_vm1, %v8415_v38 }
 0xabf   :  { %6634 = vmatpush1.bf16.msra.mxu0 %v8288_v42  ;;  %6650 = vmatpush1.bf16.msra.mxu1 %v8290_v48 }
 0xac0   :  { %6636 = vmatprep.subr.bf16.mxu0 %v8292_v39  ;;  %6652 = vmatprep.subr.bf16.mxu1 %v8294_v40 }
 0xac1   :  { %4000 = vmatprep.mubr.f32.mxu0 %v7521_v0  ;;  %4071 = vmatprep.mubr.f32.mxu1 %v7521_v0 }
 0xac3   :  { %6638 = vmatpush1.bf16.msra.mxu0 %v8302_v2  ;;  %6654 = vmatpush1.bf16.msra.mxu1 %v8304_v3 }
 0xac4   :  { %6640 = vmatprep.subr.bf16.mxu0 %v8308_v10  ;;  %6656 = vmatprep.subr.bf16.mxu1 %v8310_v53 }
 0xac7   :  { %6642 = vmatpush1.bf16.msra.mxu0 %v8316_v43  ;;  %6658 = vmatpush1.bf16.msra.mxu1 %v8318_v15 }
 0xac8   :  { %6644 = vmatprep.subr.bf16.mxu0 %v8322_v17  ;;  %6660 = vmatprep.subr.bf16.mxu1 %v8324_v19 }
 0xacb   :  { %6646 = vmatpush1.bf16.msra.mxu0 %v8328_v22  ;;  %6662 = vmatpush1.bf16.msra.mxu1 %v8330_v24 }
 0xacc   :  { %6664 = vmatprep.subr.bf16.mxu0 %v8267_v52  ;;  %6680 = vmatprep.subr.bf16.mxu1 %v8269_v6 }
 0xb91   :  { %v3829_v60 = vpop.f32.mrb[24].mxu0  ;;  %v3900_v46 = vpop.f32.mrb[24].mxu1 }
 0xb92   :  { %v6895_v41 = vadd.f32 %v3829_v60, %v8366_v56  ;;  %v3831_v49 = vpop.f32.mrb[25].mxu0  ;;  %v3902_v28 = vpop.f32.mrb[25].mxu1  ;;  %v6897_v31 = vadd.f32 %v3900_v46, %v8381_v25 }
 0xb93   :  { %v6896_v51 = vadd.f32 %v3831_v49, %v8370_v12  ;;  %v6898_v29 = vadd.f32 %v3902_v28, %v8376_v27 }
 0xb94   :  { %v5746_v57 = vmul.f32 -1.442695, %v6895_v41 }
 0xb95   :  { %v5747_v5 = vmul.f32 -1.442695, %v6896_v51  ;;  %v5748_v34 = vmul.f32 -1.442695, %v6898_v29 }
 0xb96   :  { %7255 = vpow2.f32 %v5746_v57 }
 0xb97   :  { %7257 = vpow2.f32 %v5747_v5 }
 0xb98   :  { %7259 = vpow2.f32 %v5748_v34 }
 0xb99   :  { %7261 = vtanh.f32 %v6897_v31 }
 0xba0   :  { %v7256_v37 = vpop.eup %7255 }
 0xba1   :  { %v7258_v32 = vpop.eup %7257  ;;  %v3912_v44 = vadd.f32 1.0, %v7256_v37 }
 0xba2   :  { %v3918_v50 = vadd.f32 1.0, %v7258_v32  ;;  %v7260_v59 = vpop.eup %7259 }
 0xba3   :  { %7263 = vrcp.f32 %v3912_v44  ;;  %v7262_v4 = vpop.eup %7261  ;;  %v3925_v1 = vadd.f32 1.0, %v7260_v59 }
 0xba4   :  { %7265 = vrcp.f32 %v3918_v50 }
 0xba5   :  { %7267 = vrcp.f32 %v3925_v1 }
 0xbad   :  { %v7264_v7 = vpop.eup %7263 }
 0xbae   :  { %v7266_v58 = vpop.eup %7265  ;;  %v3929_v62 = vmul.f32 %v7264_v7, %v7262_v4 }
 0xbaf   :  { %v3928_v11 = vmul.f32 %v7266_v58, %v3757_v33  ;;  %v7268_v9 = vpop.eup %7267 }
 0xbb1   :  { %v3930_v8 = vadd.f32 %v3929_v62, %v3928_v11 }
 0xbb3   :  { %7269 = vtanh.f32 %v3930_v8 }
 0xbbd   :  { %v7270_v16 = vpop.eup %7269 }
 0xbbe   :  { %v8443_v45 = vmul.f32 %v7270_v16, %v7268_v9 }
 0xbc0   :  { %5749 = vmatmul.mubr.msk.f32.vlgmr.msra.gmra.mrb[26].mxu0 %vm333_vm1, %v8443_v45  ;;  %5750 = vmatmul.mubr.msk.f32.vlgmr.msra.gmra.mrb[26].mxu1 %vm333_vm1, %v8443_v45 }
 0xbc1   :  { %6666 = vmatpush1.bf16.msra.mxu0 %v8288_v42  ;;  %6682 = vmatpush1.bf16.msra.mxu1 %v8290_v48 }
 0xbc2   :  { %6668 = vmatprep.subr.bf16.mxu0 %v8292_v39  ;;  %6684 = vmatprep.subr.bf16.mxu1 %v8294_v40 }
 0xbc3   :  { %4173 = vmatprep.mubr.f32.mxu0 %v7521_v0  ;;  %4244 = vmatprep.mubr.f32.mxu1 %v7521_v0 }
 0xbc5   :  { %6670 = vmatpush1.bf16.msra.mxu0 %v8302_v2  ;;  %6686 = vmatpush1.bf16.msra.mxu1 %v8304_v3 }
 0xbc6   :  { %6672 = vmatprep.subr.bf16.mxu0 %v8308_v10  ;;  %6688 = vmatprep.subr.bf16.mxu1 %v8310_v53 }
 0xbc9   :  { %6674 = vmatpush1.bf16.msra.mxu0 %v8316_v43  ;;  %6690 = vmatpush1.bf16.msra.mxu1 %v8318_v15 }
 0xbca   :  { %6676 = vmatprep.subr.bf16.mxu0 %v8322_v17  ;;  %6692 = vmatprep.subr.bf16.mxu1 %v8324_v19 }
 0xbcd   :  { %6678 = vmatpush1.bf16.msra.mxu0 %v8328_v22  ;;  %6694 = vmatpush1.bf16.msra.mxu1 %v8330_v24 }
 0xbce   :  { %6696 = vmatprep.subr.bf16.mxu0 %v8267_v52  ;;  %6712 = vmatprep.subr.bf16.mxu1 %v8269_v6 }
 0xc93   :  { %v4002_v20 = vpop.f32.mrb[26].mxu0  ;;  %v4073_v21 = vpop.f32.mrb[26].mxu1 }
 0xc94   :  { %v6899_v30 = vadd.f32 %v4002_v20, %v8366_v56  ;;  %v4004_v14 = vpop.f32.mrb[27].mxu0  ;;  %v4075_v61 = vpop.f32.mrb[27].mxu1  ;;  %v6901_v35 = vadd.f32 %v4073_v21, %v8381_v25 }
 0xc95   :  { %v6900_v63 = vadd.f32 %v4004_v14, %v8370_v12  ;;  %v6902_v54 = vadd.f32 %v4075_v61, %v8376_v27 }
 0xc96   :  { %v5751_v13 = vmul.f32 -1.442695, %v6899_v30 }
 0xc97   :  { %v5752_v47 = vmul.f32 -1.442695, %v6900_v63  ;;  %v5753_v26 = vmul.f32 -1.442695, %v6902_v54 }
 0xc98   :  { %7271 = vpow2.f32 %v5751_v13 }
 0xc99   :  { %7273 = vpow2.f32 %v5752_v47 }
 0xc9a   :  { %7275 = vpow2.f32 %v5753_v26 }
 0xc9b   :  { %7277 = vtanh.f32 %v6901_v35 }
 0xca2   :  { %v7272_v33 = vpop.eup %7271 }
 0xca3   :  { %v7274_v23 = vpop.eup %7273  ;;  %v4085_v36 = vadd.f32 1.0, %v7272_v33 }
 0xca4   :  { %v4091_v60 = vadd.f32 1.0, %v7274_v23  ;;  %v7276_v46 = vpop.eup %7275 }
 0xca5   :  { %7279 = vrcp.f32 %v4085_v36  ;;  %v7278_v41 = vpop.eup %7277  ;;  %v4098_v57 = vadd.f32 1.0, %v7276_v46 }
 0xca6   :  { %7281 = vrcp.f32 %v4091_v60 }
 0xca7   :  { %7283 = vrcp.f32 %v4098_v57 }
 0xcaf   :  { %v7280_v49 = vpop.eup %7279 }
 0xcb0   :  { %v7282_v28 = vpop.eup %7281  ;;  %v4102_v51 = vmul.f32 %v7280_v49, %v7278_v41 }
 0xcb1   :  { %v4101_v5 = vmul.f32 %v7282_v28, %v3930_v8  ;;  %v7284_v34 = vpop.eup %7283 }
 0xcb3   :  { %v4103_v29 = vadd.f32 %v4102_v51, %v4101_v5 }
 0xcb5   :  { %7285 = vtanh.f32 %v4103_v29 }
 0xcbf   :  { %v7286_v31 = vpop.eup %7285 }
 0xcc0   :  { %v8471_v37 = vmul.f32 %v7286_v31, %v7284_v34 }
 0xcc2   :  { %5754 = vmatmul.mubr.msk.f32.vlgmr.msra.gmra.mrb[28].mxu0 %vm333_vm1, %v8471_v37  ;;  %5755 = vmatmul.mubr.msk.f32.vlgmr.msra.gmra.mrb[28].mxu1 %vm333_vm1, %v8471_v37 }
 0xcc3   :  { %6698 = vmatpush1.bf16.msra.mxu0 %v8288_v42  ;;  %6714 = vmatpush1.bf16.msra.mxu1 %v8290_v48 }
 0xcc4   :  { %6700 = vmatprep.subr.bf16.mxu0 %v8292_v39  ;;  %6716 = vmatprep.subr.bf16.mxu1 %v8294_v40 }
 0xcc5   :  { %4346 = vmatprep.mubr.f32.mxu0 %v7521_v0  ;;  %4417 = vmatprep.mubr.f32.mxu1 %v7521_v0 }
 0xcc7   :  { %6702 = vmatpush1.bf16.msra.mxu0 %v8302_v2  ;;  %6718 = vmatpush1.bf16.msra.mxu1 %v8304_v3 }
 0xcc8   :  { %6704 = vmatprep.subr.bf16.mxu0 %v8308_v10  ;;  %6720 = vmatprep.subr.bf16.mxu1 %v8310_v53 }
 0xccb   :  { %6706 = vmatpush1.bf16.msra.mxu0 %v8316_v43  ;;  %6722 = vmatpush1.bf16.msra.mxu1 %v8318_v15 }
 0xccc   :  { %6708 = vmatprep.subr.bf16.mxu0 %v8322_v17  ;;  %6724 = vmatprep.subr.bf16.mxu1 %v8324_v19 }
 0xccf   :  { %6710 = vmatpush1.bf16.msra.mxu0 %v8328_v22  ;;  %6726 = vmatpush1.bf16.msra.mxu1 %v8330_v24 }
 0xcd0   :  { %6728 = vmatprep.subr.bf16.mxu0 %v8267_v52  ;;  %6744 = vmatprep.subr.bf16.mxu1 %v8269_v6 }
 0xd95   :  { %v4175_v32 = vpop.f32.mrb[28].mxu0  ;;  %v4246_v44 = vpop.f32.mrb[28].mxu1 }
 0xd96   :  { %v6903_v50 = vadd.f32 %v4175_v32, %v8366_v56  ;;  %v4177_v59 = vpop.f32.mrb[29].mxu0  ;;  %v4248_v4 = vpop.f32.mrb[29].mxu1  ;;  %v6905_v8 = vadd.f32 %v4246_v44, %v8381_v25 }
 0xd97   :  { %v6904_v7 = vadd.f32 %v4177_v59, %v8370_v12  ;;  %v6906_v1 = vadd.f32 %v4248_v4, %v8376_v27 }
 0xd98   :  { %v5756_v58 = vmul.f32 -1.442695, %v6903_v50 }
 0xd99   :  { %v5757_v62 = vmul.f32 -1.442695, %v6904_v7  ;;  %v5758_v11 = vmul.f32 -1.442695, %v6906_v1 }
 0xd9a   :  { %7287 = vpow2.f32 %v5756_v58 }
 0xd9b   :  { %7289 = vpow2.f32 %v5757_v62 }
 0xd9c   :  { %7291 = vpow2.f32 %v5758_v11 }
 0xd9d   :  { %7293 = vtanh.f32 %v6905_v8 }
 0xda4   :  { %v7288_v9 = vpop.eup %7287 }
 0xda5   :  { %v7290_v16 = vpop.eup %7289  ;;  %v4258_v20 = vadd.f32 1.0, %v7288_v9 }
 0xda6   :  { %v4264_v21 = vadd.f32 1.0, %v7290_v16  ;;  %v7292_v30 = vpop.eup %7291 }
 0xda7   :  { %7295 = vrcp.f32 %v4258_v20  ;;  %v7294_v14 = vpop.eup %7293  ;;  %v4271_v47 = vadd.f32 1.0, %v7292_v30 }
 0xda8   :  { %7297 = vrcp.f32 %v4264_v21 }
 0xda9   :  { %7299 = vrcp.f32 %v4271_v47 }
 0xdb1   :  { %v7296_v61 = vpop.eup %7295 }
 0xdb2   :  { %v7298_v63 = vpop.eup %7297  ;;  %v4275_v13 = vmul.f32 %v7296_v61, %v7294_v14 }
 0xdb3   :  { %v4274_v54 = vmul.f32 %v7298_v63, %v4103_v29  ;;  %v7300_v35 = vpop.eup %7299 }
 0xdb5   :  { %v4276_v26 = vadd.f32 %v4275_v13, %v4274_v54 }
 0xdb7   :  { %7301 = vtanh.f32 %v4276_v26 }
 0xdc1   :  { %v7302_v33 = vpop.eup %7301 }
 0xdc2   :  { %v8499_v23 = vmul.f32 %v7302_v33, %v7300_v35  ;;  %v4804_v35 = vld [vmem:[%s8801_s9 + $0x8] sm:$0xff] }
 0xdc4   :  { %5759 = vmatmul.mubr.msk.f32.vlgmr.msra.gmra.mrb[30].mxu0 %vm333_vm1, %v8499_v23  ;;  %5760 = vmatmul.mubr.msk.f32.vlgmr.msra.gmra.mrb[30].mxu1 %vm333_vm1, %v8499_v23 }
 0xdc5   :  { %6730 = vmatpush1.bf16.msra.mxu0 %v8288_v42  ;;  %6746 = vmatpush1.bf16.msra.mxu1 %v8290_v48 }
 0xdc6   :  { %6732 = vmatprep.subr.bf16.mxu0 %v8292_v39  ;;  %6748 = vmatprep.subr.bf16.mxu1 %v8294_v40 }
 0xdc7   :  { %4519 = vmatprep.mubr.f32.mxu0 %v7521_v0  ;;  %4590 = vmatprep.mubr.f32.mxu1 %v7521_v0 }
 0xdc9   :  { %6734 = vmatpush1.bf16.msra.mxu0 %v8302_v2  ;;  %6750 = vmatpush1.bf16.msra.mxu1 %v8304_v3 }
 0xdca   :  { %6736 = vmatprep.subr.bf16.mxu0 %v8308_v10  ;;  %6752 = vmatprep.subr.bf16.mxu1 %v8310_v53 }
 0xdcd   :  { %6738 = vmatpush1.bf16.msra.mxu0 %v8316_v43  ;;  %6754 = vmatpush1.bf16.msra.mxu1 %v8318_v15 }
 0xdce   :  { %6740 = vmatprep.subr.bf16.mxu0 %v8322_v17  ;;  %6756 = vmatprep.subr.bf16.mxu1 %v8324_v19 }
 0xdd1   :  { %6742 = vmatpush1.bf16.msra.mxu0 %v8328_v22  ;;  %6758 = vmatpush1.bf16.msra.mxu1 %v8330_v24 }
 0xdd2   :  { %6760 = vmatprep.subr.bf16.mxu0 %v8267_v52  ;;  %6776 = vmatprep.subr.bf16.mxu1 %v8269_v6 }
 0xe97   :  { %v4348_v36 = vpop.f32.mrb[30].mxu0  ;;  %v4419_v60 = vpop.f32.mrb[30].mxu1 }
 0xe98   :  { %v6907_v46 = vadd.f32 %v4348_v36, %v8366_v56  ;;  %v4350_v41 = vpop.f32.mrb[31].mxu0  ;;  %v4421_v49 = vpop.f32.mrb[31].mxu1  ;;  %v6909_v34 = vadd.f32 %v4419_v60, %v8381_v25 }
 0xe99   :  { %v6908_v28 = vadd.f32 %v4350_v41, %v8370_v12  ;;  %v6910_v5 = vadd.f32 %v4421_v49, %v8376_v27  ;;  %v4805_v41 = vld [vmem:[%s8801_s9 + $0x10] sm:$0xff]  ;;  %v4806_v49 = vld [vmem:[%s8801_s9 + $0x18] sm:$0xff] }
 0xe9a   :  { %v5761_v51 = vmul.f32 -1.442695, %v6907_v46 }
 0xe9b   :  { %v5762_v57 = vmul.f32 -1.442695, %v6908_v28  ;;  %v5763_v29 = vmul.f32 -1.442695, %v6910_v5  ;;  %v8580_v28 = vpack.c.bf16 %v4806_v49, %v4805_v41 }
 0xe9c   :  { %7303 = vpow2.f32 %v5761_v51  ;;  %v4807_v51 = vld [vmem:[%s8801_s9 + $0x20] sm:$0xff] }
 0xe9d   :  { %7305 = vpow2.f32 %v5762_v57  ;;  %v4808_v57 = vld [vmem:[%s8801_s9 + $0x28] sm:$0xff] }
 0xe9e   :  { %7307 = vpow2.f32 %v5763_v29  ;;  %v8596_v5 = vpack.c.bf16 %v4808_v57, %v4807_v51  ;;  %v4809_v29 = vld [vmem:[%s8801_s9 + $0x30] sm:$0xff] }
 0xe9f   :  { %7309 = vtanh.f32 %v6909_v34  ;;  %v4810_v34 = vld [vmem:[%s8801_s9 + $0x38] sm:$0xff] }
 0xea6   :  { %v7304_v52 = vpop.eup %7303 }
 0xea7   :  { %v7306_v31 = vpop.eup %7305  ;;  %v4431_v6 = vadd.f32 1.0, %v7304_v52  ;;  %v8608_v52 = vpack.c.bf16 %v4810_v34, %v4809_v29 }
 0xea8   :  { %v4437_v32 = vadd.f32 1.0, %v7306_v31  ;;  %v7308_v44 = vpop.eup %7307 }
 0xea9   :  { %7311 = vrcp.f32 %v4431_v6  ;;  %v7310_v50 = vpop.eup %7309  ;;  %v4444_v58 = vadd.f32 1.0, %v7308_v44 }
 0xeaa   :  { %7313 = vrcp.f32 %v4437_v32  ;;  %v7524_v32 = vmov 1966171168  }
 0xeab   :  { %7315 = vrcp.f32 %v4444_v58  ;;  %v4890_v44 = vunpack.c.l.s4 %v7524_v32 }
 0xeb3   :  { %v7312_v59 = vpop.eup %7311 }
 0xeb4   :  { %v7314_v4 = vpop.eup %7313  ;;  %v4448_v7 = vmul.f32 %v7312_v59, %v7310_v50  ;;  %v4891_v59 = vunpack.c.0.s8 %v4890_v44 }
 0xeb5   :  { %v4447_v62 = vmul.f32 %v7314_v4, %v4276_v26  ;;  %v7316_v11 = vpop.eup %7315  ;;  %v4803_v26 = vld [vmem:[%s8801_s9] sm:$0xff] }
 0xeb6   :  { %v8564_v60 = vpack.c.bf16 %v4804_v35, %v4803_v26 }
 0xeb7   :  { %v4449_v1 = vadd.f32 %v4448_v7, %v4447_v62 }
 0xeb9   :  { %7317 = vtanh.f32 %v4449_v1 }
 0xec3   :  { %v7318_v8 = vpop.eup %7317 }
 0xec4   :  { %v8527_v9 = vmul.f32 %v7318_v8, %v7316_v11 }
 0xec6   :  { %5764 = vmatmul.mubr.msk.f32.vlgmr.msra.gmra.mrb[32].mxu0 %vm333_vm1, %v8527_v9  ;;  %5765 = vmatmul.mubr.msk.f32.vlgmr.msra.gmra.mrb[32].mxu1 %vm333_vm1, %v8527_v9 }
 0xec7   :  { %6762 = vmatpush1.bf16.msra.mxu0 %v8288_v42  ;;  %6778 = vmatpush1.bf16.msra.mxu1 %v8290_v48  ;;  %v7522_v42 = vmov 0.0|0.0  }
 0xec8   :  { %6764 = vmatprep.subr.bf16.mxu0 %v8292_v39  ;;  %6780 = vmatprep.subr.bf16.mxu1 %v8294_v40 }
 0xec9   :  { %4692 = vmatprep.mubr.f32.mxu0 %v7521_v0  ;;  %4763 = vmatprep.mubr.f32.mxu1 %v7521_v0 }
 0xecb   :  { %6766 = vmatpush1.bf16.msra.mxu0 %v8302_v2  ;;  %6782 = vmatpush1.bf16.msra.mxu1 %v8304_v3 }
 0xecc   :  { %6768 = vmatprep.subr.bf16.mxu0 %v8308_v10  ;;  %6784 = vmatprep.subr.bf16.mxu1 %v8310_v53 }
 0xecf   :  { %6770 = vmatpush1.bf16.msra.mxu0 %v8316_v43  ;;  %6786 = vmatpush1.bf16.msra.mxu1 %v8318_v15 }
 0xed0   :  { %6772 = vmatprep.subr.bf16.mxu0 %v8322_v17  ;;  %6788 = vmatprep.subr.bf16.mxu1 %v8324_v19 }
 0xed3   :  { %6774 = vmatpush1.bf16.msra.mxu0 %v8328_v22  ;;  %6790 = vmatpush1.bf16.msra.mxu1 %v8330_v24 }
 0xed4   :  { %6791 = vmatprep.subr.bf16.mxu0 %v7522_v42  ;;  %6803 = vmatprep.subr.bf16.mxu1 %v7522_v42 }
 0xf99   :  { %v4521_v48 = vpop.f32.mrb[32].mxu0  ;;  %v4592_v39 = vpop.f32.mrb[32].mxu1 }
 0xf9a   :  { %v6911_v40 = vadd.f32 %v4521_v48, %v8366_v56  ;;  %v4523_v2 = vpop.f32.mrb[33].mxu0  ;;  %v4594_v3 = vpop.f32.mrb[33].mxu1  ;;  %v6913_v19 = vadd.f32 %v4592_v39, %v8381_v25 }
 0xf9b   :  { %v6912_v10 = vadd.f32 %v4523_v2, %v8370_v12  ;;  %v6914_v15 = vadd.f32 %v4594_v3, %v8376_v27 }
 0xf9c   :  { %v5766_v53 = vmul.f32 -1.442695, %v6911_v40 }
 0xf9d   :  { %v5767_v43 = vmul.f32 -1.442695, %v6912_v10  ;;  %v5768_v17 = vmul.f32 -1.442695, %v6914_v15 }
 0xf9e   :  { %7319 = vpow2.f32 %v5766_v53 }
 0xf9f   :  { %7321 = vpow2.f32 %v5767_v43 }
 0xfa0   :  { %7323 = vpow2.f32 %v5768_v17 }
 0xfa1   :  { %7325 = vtanh.f32 %v6913_v19 }
 0xfa8   :  { %v7320_v22 = vpop.eup %7319 }
 0xfa9   :  { %v7322_v24 = vpop.eup %7321  ;;  %v4604_v16 = vadd.f32 1.0, %v7320_v22 }
 0xfaa   :  { %v4610_v20 = vadd.f32 1.0, %v7322_v24  ;;  %v7324_v21 = vpop.eup %7323 }
 0xfab   :  { %7327 = vrcp.f32 %v4604_v16  ;;  %v7326_v30 = vpop.eup %7325  ;;  %v4617_v13 = vadd.f32 1.0, %v7324_v21 }
 0xfac   :  { %7329 = vrcp.f32 %v4610_v20 }
 0xfad   :  { %7331 = vrcp.f32 %v4617_v13 }
 0xfb5   :  { %v7328_v14 = vpop.eup %7327 }
 0xfb6   :  { %v7330_v61 = vpop.eup %7329  ;;  %v4621_v63 = vmul.f32 %v7328_v14, %v7326_v30 }
 0xfb7   :  { %v4620_v47 = vmul.f32 %v7330_v61, %v4449_v1  ;;  %v7332_v33 = vpop.eup %7331 }
 0xfb9   :  { %v8555_v54 = vadd.f32 %v4621_v63, %v4620_v47 }
 0xfbb   :  { %7333 = vtanh.f32 %v8555_v54 }
 0xfc5   :  { %v7334_v36 = vpop.eup %7333 }
 0xfc6   :  { %v8566_v46 = vmul.f32 %v7334_v36, %v7332_v33 }
 0xfc8   :  { %5769 = vmatmul.mubr.msk.f32.vlgmr.msra.gmra.mrb[34].mxu0 %vm333_vm1, %v8566_v46  ;;  %5770 = vmatmul.mubr.msk.f32.vlgmr.msra.gmra.mrb[34].mxu1 %vm333_vm1, %v8566_v46 }
 0xfc9   :  { %6793 = vmatpush3.bf16.msra.mxu0 %v8564_v60  ;;  %6805 = vmatpush3.bf16.msra.mxu1 %v8564_v60 }
 0xfca   :  { %6794 = vmatprep.subr.bf16.mxu0 %v7522_v42  ;;  %6806 = vmatprep.subr.bf16.mxu1 %v7522_v42 }
 0xfcb   :  { %5871 = vmatprep.mubr.msk.f32.mxu0 %vm7523_vm5, %v7521_v0  ;;  %5890 = vmatprep.mubr.msk.f32.mxu1 %vm7523_vm5, %v7521_v0 }
 0xfcd   :  { %6796 = vmatpush3.bf16.msra.mxu0 %v8580_v28  ;;  %6808 = vmatpush3.bf16.msra.mxu1 %v8580_v28 }
 0xfce   :  { %6797 = vmatprep.subr.bf16.mxu0 %v7522_v42  ;;  %6809 = vmatprep.subr.bf16.mxu1 %v7522_v42 }
 0xfd1   :  { %6799 = vmatpush3.bf16.msra.mxu0 %v8596_v5  ;;  %6811 = vmatpush3.bf16.msra.mxu1 %v8596_v5 }
 0xfd2   :  { %6800 = vmatprep.subr.bf16.mxu0 %v7522_v42  ;;  %6812 = vmatprep.subr.bf16.mxu1 %v7522_v42 }
 0xfd5   :  { %6802 = vmatpush3.bf16.msra.mxu0 %v8608_v52  ;;  %6814 = vmatpush3.bf16.msra.mxu1 %v8608_v52 }
 0xfd6   :  { %6815 = vmatprep.subr.bf16.mxu0 %v7522_v42  ;;  %6827 = vmatprep.subr.bf16.mxu1 %v7522_v42 }
 0xfd8   :  { %5872 = vmatmul.mubr.msk.f32.vlgmr.msra.gmra.mrb[36].mxu0 %vm333_vm1, %v8387_v55  ;;  %5891 = vmatmul.mubr.msk.f32.vlgmr.msra.gmra.mrb[36].mxu1 %vm333_vm1, %v8415_v38 }
 0xfd9   :  { %6817 = vmatpush3.bf16.msra.mxu0 %v8564_v60  ;;  %6829 = vmatpush3.bf16.msra.mxu1 %v8564_v60 }
 0xfda   :  { %6818 = vmatprep.subr.bf16.mxu0 %v7522_v42  ;;  %6830 = vmatprep.subr.bf16.mxu1 %v7522_v42 }
 0xfdb   :  { %5909 = vmatprep.mubr.msk.f32.mxu0 %vm7523_vm5, %v7521_v0  ;;  %5928 = vmatprep.mubr.msk.f32.mxu1 %vm7523_vm5, %v7521_v0 }
 0xfdd   :  { %6820 = vmatpush3.bf16.msra.mxu0 %v8580_v28  ;;  %6832 = vmatpush3.bf16.msra.mxu1 %v8580_v28 }
 0xfde   :  { %6821 = vmatprep.subr.bf16.mxu0 %v7522_v42  ;;  %6833 = vmatprep.subr.bf16.mxu1 %v7522_v42 }
 0xfe1   :  { %6823 = vmatpush3.bf16.msra.mxu0 %v8596_v5  ;;  %6835 = vmatpush3.bf16.msra.mxu1 %v8596_v5 }
 0xfe2   :  { %6824 = vmatprep.subr.bf16.mxu0 %v7522_v42  ;;  %6836 = vmatprep.subr.bf16.mxu1 %v7522_v42 }
 0xfe5   :  { %6826 = vmatpush3.bf16.msra.mxu0 %v8608_v52  ;;  %6838 = vmatpush3.bf16.msra.mxu1 %v8608_v52 }
 0xfe6   :  { %6839 = vmatprep.subr.bf16.mxu0 %v7522_v42  ;;  %6851 = vmatprep.subr.bf16.mxu1 %v7522_v42 }
 0xfe8   :  { %5910 = vmatmul.mubr.msk.f32.vlgmr.msra.gmra.mrb[38].mxu0 %vm333_vm1, %v8443_v45  ;;  %5929 = vmatmul.mubr.msk.f32.vlgmr.msra.gmra.mrb[38].mxu1 %vm333_vm1, %v8471_v37 }
 0xfe9   :  { %6841 = vmatpush3.bf16.msra.mxu0 %v8564_v60  ;;  %6853 = vmatpush3.bf16.msra.mxu1 %v8564_v60 }
 0xfea   :  { %6842 = vmatprep.subr.bf16.mxu0 %v7522_v42  ;;  %6854 = vmatprep.subr.bf16.mxu1 %v7522_v42 }
 0xfeb   :  { %5947 = vmatprep.mubr.msk.f32.mxu0 %vm7523_vm5, %v7521_v0  ;;  %5966 = vmatprep.mubr.msk.f32.mxu1 %vm7523_vm5, %v7521_v0 }
 0xfed   :  { %6844 = vmatpush3.bf16.msra.mxu0 %v8580_v28  ;;  %6856 = vmatpush3.bf16.msra.mxu1 %v8580_v28 }
 0xfee   :  { %6845 = vmatprep.subr.bf16.mxu0 %v7522_v42  ;;  %6857 = vmatprep.subr.bf16.mxu1 %v7522_v42 }
 0xff1   :  { %6847 = vmatpush3.bf16.msra.mxu0 %v8596_v5  ;;  %6859 = vmatpush3.bf16.msra.mxu1 %v8596_v5 }
 0xff2   :  { %6848 = vmatprep.subr.bf16.mxu0 %v7522_v42  ;;  %6860 = vmatprep.subr.bf16.mxu1 %v7522_v42 }
 0xff5   :  { %6850 = vmatpush3.bf16.msra.mxu0 %v8608_v52  ;;  %6862 = vmatpush3.bf16.msra.mxu1 %v8608_v52 }
 0xff6   :  { %6863 = vmatprep.subr.bf16.mxu0 %v7522_v42  ;;  %6875 = vmatprep.subr.bf16.mxu1 %v7522_v42 }
 0xff8   :  { %5948 = vmatmul.mubr.msk.f32.vlgmr.msra.gmra.mrb[40].mxu0 %vm333_vm1, %v8499_v23  ;;  %5967 = vmatmul.mubr.msk.f32.vlgmr.msra.gmra.mrb[40].mxu1 %vm333_vm1, %v8527_v9 }
 0xff9   :  { %6865 = vmatpush3.bf16.msra.mxu0 %v8564_v60  ;;  %5985 = vmatprep.mubr.msk.f32.mxu0 %vm7523_vm5, %v7521_v0 }
 0xffa   :  { %6866 = vmatprep.subr.bf16.mxu0 %v7522_v42  ;;  %6877 = vmatpush3.bf16.msra.mxu1 %v8564_v60 }
 0xffb   :  { %6878 = vmatprep.subr.bf16.mxu1 %v7522_v42  ;;  %6004 = vmatprep.mubr.msk.f32.mxu1 %vm7523_vm5, %v7521_v0 }
 0xffd   :  { %6868 = vmatpush3.bf16.msra.mxu0 %v8580_v28 }
 0xffe   :  { %6869 = vmatprep.subr.bf16.mxu0 %v7522_v42  ;;  %6880 = vmatpush3.bf16.msra.mxu1 %v8580_v28 }
 0xfff   :  { %6881 = vmatprep.subr.bf16.mxu1 %v7522_v42 }
0x1001   :  { %6871 = vmatpush3.bf16.msra.mxu0 %v8596_v5 }
0x1002   :  { %6872 = vmatprep.subr.bf16.mxu0 %v7522_v42  ;;  %6883 = vmatpush3.bf16.msra.mxu1 %v8596_v5 }
0x1003   :  { %6884 = vmatprep.subr.bf16.mxu1 %v7522_v42 }
0x1005   :  { %6874 = vmatpush3.bf16.msra.mxu0 %v8608_v52 }
0x1006   :  { %6886 = vmatpush3.bf16.msra.mxu1 %v8608_v52 }
0x1008   :  { %5986 = vmatmul.mubr.msk.f32.vlgmr.msra.gmra.mrb[42].mxu0 %vm333_vm1, %v8566_v46 }
0x109b   :  { %v4694_v0 = vpop.f32.mrb[34].mxu0  ;;  %v4765_v55 = vpop.f32.mrb[34].mxu1 }
0x109c   :  { %v6915_v38 = vadd.f32 %v4694_v0, %v8366_v56  ;;  %v4696_v45 = vpop.f32.mrb[35].mxu0  ;;  %v4767_v37 = vpop.f32.mrb[35].mxu1  ;;  %v6917_v7 = vadd.f32 %v4765_v55, %v8381_v25  ;;  %v8695_v56 = vld [vmem:[%s8802_s10] ss:$0 sm:$0xff]  ;;  %s7525_s10 = smov [#allocation11]  }
0x109d   :  { %v6916_v23 = vadd.f32 %v4696_v45, %v8370_v12  ;;  %v6918_v50 = vadd.f32 %v4767_v37, %v8376_v27  ;;  %v8698_v12 = vsub.s32 %v4891_v59, %v7764_v18  ;;  %s5615_s5 = sshll.u32 %s7525_s10, 4  ;;  %s5616_s5 = int_to_ptr.vmem [resolvable:$true] %s5615_s5 }
0x109e   :  { %v5771_v31 = vmul.f32 -1.442695, %v6915_v38  ;;  %s7439_s3 = scalar_lea.vmem %s5616_s5, 64  ;;  %p7444_p5 = scmp.lt.s32.totalorder %s5616_s5, %s5616_s5 }
0x109f   :  { %v5772_v6 = vmul.f32 -1.442695, %v6916_v23  ;;  %v5773_v4 = vmul.f32 -1.442695, %v6918_v50  ;;  %p7440_p4 = scmp.ne.s32.totalorder %s5616_s5, %s7439_s3  ;;  %p7445_p6 = scmp.lt.s32.totalorder %s7439_s3, %s7439_s3 }
0x10a0   :  { %7335 = vpow2.f32 %v5771_v31 }
0x10a1   :  { %7337 = vpow2.f32 %v5772_v6  ;;  %p7446_p7 = por %p7445_p6, %p7444_p5 }
0x10a2   :  { %7339 = vpow2.f32 %v5773_v4 }
0x10a3   :  { %7341 = vtanh.f32 %v6917_v7  ;;  %p7447_p8 = pnand %p7446_p7, %p7440_p4 }
0x10aa   :  { %v7336_v58 = vpop.eup %7335 }
0x10ab   :  { %v7338_v62 = vpop.eup %7337  ;;  %v4777_v1 = vadd.f32 1.0, %v7336_v58  ;;  %v4884_v11 = vpop.f32.mrb[36].mxu0 }
0x10ac   :  { %v4982_v8 = vpop.f32.mrb[36].mxu1  ;;  %v4783_v27 = vadd.f32 1.0, %v7338_v62  ;;  %v4885_v9 = vadd.f32 %v8695_v56, %v4884_v11  ;;  %v5873_v42 = vpop.f32.mrb[37].mxu0 }
0x10ad   :  { %v4983_v25 = vadd.f32 %v8695_v56, %v4982_v8  ;;  %v5892_v48 = vpop.f32.mrb[37].mxu1  ;;  %7343 = vrcp.f32 %v4777_v1  ;;  %v7340_v15 = vpop.eup %7339 }
0x10ae   :  { %7345 = vrcp.f32 %v4783_v27  ;;  %v4895_v39 = vrot.slane %v4885_v9, %v8698_v12  ;;  %v7342_v17 = vpop.eup %7341  ;;  %v4790_v16 = vadd.f32 1.0, %v7340_v15 }
0x10af   :  { %v4993_v18 = vrot.slane %v4983_v25, %v8698_v12 }
0x10b0   :  { %v4896_v40 = vcombine.high %v4895_v39, %v4895_v39  ;;  %v4903_v2 = vrot.slane %v4895_v39, %v8698_v12  ;;  %7347 = vrcp.f32 %v4790_v16 }
0x10b1   :  { %v4994_v3 = vcombine.high %v4993_v18, %v4993_v18  ;;  %v5001_v10 = vrot.slane %v4993_v18, %v8698_v12 }
0x10b2   :  { %v4910_v53 = vrot.slane %v4896_v40, %v8698_v12  ;;  %4914 = vst.msk [vmem:[#allocation10] sm:$0x1] %vm4913_vm6, %v4903_v2 }
0x10b3   :  { %v5008_v43 = vrot.slane %v4994_v3, %v8698_v12  ;;  %5011 = vst.msk [vmem:[#allocation10 + $0x1] sm:$0x1] %vm4913_vm6, %v5001_v10 }
0x10b4   :  { %4915 = vst.msk [vmem:[#allocation10 + $0x8] sm:$0x1] %vm4913_vm6, %v4910_v53 }
0x10b5   :  { %5012 = vst.msk [vmem:[#allocation10 + $0x9] sm:$0x1] %vm4913_vm6, %v5008_v43 }
0x10b7   :  { %v7344_v19 = vpop.eup %7343 }
0x10b8   :  { %v7346_v22 = vpop.eup %7345  ;;  %v4794_v24 = vmul.f32 %v7344_v19, %v7342_v17 }
0x10b9   :  { %v4793_v20 = vmul.f32 %v7346_v22, %v8555_v54 }
0x10ba   :  { %v7348_v49 = vpop.eup %7347 }
0x10bb   :  { %v4795_v21 = vadd.f32 %v4794_v24, %v4793_v20  ;;  %v5079_v30 = vpop.f32.mrb[38].mxu0  ;;  %v5176_v14 = vpop.f32.mrb[38].mxu1 }
0x10bc   :  { %v5080_v61 = vadd.f32 %v8695_v56, %v5079_v30  ;;  %v5177_v63 = vadd.f32 %v8695_v56, %v5176_v14  ;;  %v5911_v13 = vpop.f32.mrb[39].mxu0  ;;  %v5930_v47 = vpop.f32.mrb[39].mxu1 }
0x10bd   :  { %7349 = vtanh.f32 %v4795_v21  ;;  %4802 = vst.msk [vmem:[#allocation13 + $0x2] sm:$0x3] %vm4799_vm7, %v4795_v21 }
0x10be   :  { %v5090_v26 = vrot.slane %v5080_v61, %v8698_v12  ;;  %v5187_v35 = vrot.slane %v5177_v63, %v8698_v12 }
0x10c0   :  { %v5091_v33 = vcombine.high %v5090_v26, %v5090_v26  ;;  %v5098_v54 = vrot.slane %v5090_v26, %v8698_v12  ;;  %v5188_v36 = vcombine.high %v5187_v35, %v5187_v35  ;;  %v5195_v60 = vrot.slane %v5187_v35, %v8698_v12 }
0x10c2   :  { %v5105_v46 = vrot.slane %v5091_v33, %v8698_v12  ;;  %5108 = vst.msk [vmem:[#allocation10 + $0x2] sm:$0x1] %vm4913_vm6, %v5098_v54  ;;  %v5202_v41 = vrot.slane %v5188_v36, %v8698_v12  ;;  %5205 = vst.msk [vmem:[#allocation10 + $0x3] sm:$0x1] %vm4913_vm6, %v5195_v60 }
0x10c4   :  { %5109 = vst.msk [vmem:[#allocation10 + $0xa] sm:$0x1] %vm4913_vm6, %v5105_v46  ;;  %5206 = vst.msk [vmem:[#allocation10 + $0xb] sm:$0x1] %vm4913_vm6, %v5202_v41 }
0x10c7   :  { %v7350_v28 = vpop.eup %7349 }
0x10c8   :  { %v4797_v51 = vmul.f32 %v7350_v28, %v7348_v49 }
0x10ca   :  { %6005 = vmatmul.mubr.msk.f32.vlgmr.msra.gmra.mrb[42].mxu1 %vm333_vm1, %v4797_v51  ;;  %4800 = vst.msk [vmem:[#allocation11 + $0x2] sm:$0x3] %vm4799_vm7, %v4797_v51 }
0x10cb   :  { %v5273_v57 = vpop.f32.mrb[40].mxu0  ;;  %v5370_v5 = vpop.f32.mrb[40].mxu1 }
0x10cc   :  { %v5274_v29 = vadd.f32 %v8695_v56, %v5273_v57  ;;  %v5371_v34 = vadd.f32 %v8695_v56, %v5370_v5  ;;  %v5949_v52 = vpop.f32.mrb[41].mxu0  ;;  %v5968_v0 = vpop.f32.mrb[41].mxu1 }
0x10ce   :  { %v5284_v55 = vrot.slane %v5274_v29, %v8698_v12  ;;  %v5381_v38 = vrot.slane %v5371_v34, %v8698_v12 }
0x10d0   :  { %v5285_v45 = vcombine.high %v5284_v55, %v5284_v55  ;;  %v5292_v37 = vrot.slane %v5284_v55, %v8698_v12  ;;  %v5382_v23 = vcombine.high %v5381_v38, %v5381_v38  ;;  %v5389_v31 = vrot.slane %v5381_v38, %v8698_v12 }
0x10d2   :  { %v5299_v6 = vrot.slane %v5285_v45, %v8698_v12  ;;  %5302 = vst.msk [vmem:[#allocation10 + $0x4] sm:$0x1] %vm4913_vm6, %v5292_v37  ;;  %v5396_v32 = vrot.slane %v5382_v23, %v8698_v12  ;;  %5399 = vst.msk [vmem:[#allocation10 + $0x5] sm:$0x1] %vm4913_vm6, %v5389_v31 }
0x10d4   :  { %5303 = vst.msk [vmem:[#allocation10 + $0xc] sm:$0x1] %vm4913_vm6, %v5299_v6  ;;  %5400 = vst.msk [vmem:[#allocation10 + $0xd] sm:$0x1] %vm4913_vm6, %v5396_v32 }
0x10db   :  { %v5467_v44 = vpop.f32.mrb[42].mxu0 }
0x10dc   :  { %v5468_v50 = vadd.f32 %v8695_v56, %v5467_v44  ;;  %v5987_v59 = vpop.f32.mrb[43].mxu0 }
0x10de   :  { %v5478_v4 = vrot.slane %v5468_v50, %v8698_v12 }
0x10e0   :  { %v5479_v7 = vcombine.high %v5478_v4, %v5478_v4  ;;  %v5486_v58 = vrot.slane %v5478_v4, %v8698_v12 }
0x10e2   :  { %v5493_v62 = vrot.slane %v5479_v7, %v8698_v12  ;;  %5496 = vst.msk [vmem:[#allocation10 + $0x6] sm:$0x1] %vm4913_vm6, %v5486_v58 }
0x10e4   :  { %5497 = vst.msk [vmem:[#allocation10 + $0xe] sm:$0x1] %vm4913_vm6, %v5493_v62 }
0x10e5   :  { %7450 = shalt.err (!%p7447_p8)
}
0x10e6   :  { %s7451_s1 = scalar_lea.hbm %s8804_s12, 64 }
0x10e7   :  { %p7452_p9 = scmp.ne.s32.totalorder %s8804_s12, %s7451_s1  ;;  %p7455_p10 = scmp.lt.u32.totalorder %s7451_s1, %s8804_s12 }
0x10e9   :  { %p7457_p11 = pnand %p7455_p10, %p7452_p9 }
0x10eb   :  { %7460 = shalt.err (!%p7457_p11)
}
0x10ec   :  { %s7526_s26 = smov 2   ;;  %s7527_s23 = smov [#allocation13]  }
0x10ed   :  { %5621 = dma.vmem_to_hbm [thread:$0]  %s5616_s5, 64, %s8804_s12, [#allocation12], %s7518_s21, %s7518_s21, %s7526_s26  }
0x10ee   :  { %s5627_s24 = sshll.u32 %s7527_s23, 4  ;;  %s5628_s24 = int_to_ptr.vmem [resolvable:$true] %s5627_s24 }
0x10ef   :  { %s7461_s25 = scalar_lea.vmem %s5628_s24, 64  ;;  %p7466_p13 = scmp.lt.s32.totalorder %s5628_s24, %s5628_s24 }
0x10f0   :  { %p7462_p12 = scmp.ne.s32.totalorder %s5628_s24, %s7461_s25  ;;  %p7467_p0 = scmp.lt.s32.totalorder %s7461_s25, %s7461_s25 }
0x10f2   :  { %p7468_p1 = por %p7467_p0, %p7466_p13 }
0x10f4   :  { %p7469_p2 = pnand %p7468_p1, %p7462_p12 }
0x10f6   :  { %7472 = shalt.err (!%p7469_p2)
}
0x10f7   :  { %s7473_s7 = scalar_lea.hbm %s8805_s13, 64 }
0x10f8   :  { %p7474_p3 = scmp.ne.s32.totalorder %s8805_s13, %s7473_s7  ;;  %p7477_p4 = scmp.lt.u32.totalorder %s7473_s7, %s8805_s13 }
0x10fa   :  { %p7479_p5 = pnand %p7477_p4, %p7474_p3 }
0x10fc   :  { %7482 = shalt.err (!%p7479_p5)
}
0x10fd   :  { %5633 = dma.vmem_to_hbm [thread:$0]  %s5628_s24, 64, %s8805_s13, [#allocation12], %s7518_s21, %s7518_s21, %s7526_s26  }
0x10fe   :  { %s7528_s30 = smov [#allocation10]  }
0x10ff   :  { %s5603_s9 = sshll.u32 %s7528_s30, 4  ;;  %s5604_s9 = int_to_ptr.vmem [resolvable:$true] %s5603_s9 }
0x1100   :  { %s7483_s14 = scalar_lea.vmem %s5604_s9, 256  ;;  %p7488_p7 = scmp.lt.s32.totalorder %s5604_s9, %s5604_s9 }
0x1101   :  { %p7484_p6 = scmp.ne.s32.totalorder %s5604_s9, %s7483_s14  ;;  %p7489_p8 = scmp.lt.s32.totalorder %s7483_s14, %s7483_s14 }
0x1103   :  { %p7490_p9 = por %p7489_p8, %p7488_p7 }
0x1105   :  { %p7491_p10 = pnand %p7490_p9, %p7484_p6 }
0x119d   :  { %v5567_v1 = vpop.f32.mrb[42].mxu1 }
0x119e   :  { %v5568_v11 = vadd.f32 %v8695_v56, %v5567_v1  ;;  %v6006_v8 = vpop.f32.mrb[43].mxu1 }
0x11a0   :  { %v5578_v27 = vrot.slane %v5568_v11, %v8698_v12 }
0x11a2   :  { %v5579_v9 = vcombine.high %v5578_v27, %v5578_v27  ;;  %v5586_v25 = vrot.slane %v5578_v27, %v8698_v12 }
0x11a4   :  { %v5593_v42 = vrot.slane %v5579_v9, %v8698_v12  ;;  %5596 = vst.msk [vmem:[#allocation10 + $0x7] sm:$0x1] %vm4913_vm6, %v5586_v25 }
0x11a6   :  { %5597 = vst.msk [vmem:[#allocation10 + $0xf] sm:$0x1] %vm4913_vm6, %v5593_v42 }
0x11a7   :  { %7494 = shalt.err (!%p7491_p10)
}
0x11a8   :  { %s7495_s10 = scalar_lea.hbm %s8803_s11, 256 }
0x11a9   :  { %p7496_p11 = scmp.ne.s32.totalorder %s8803_s11, %s7495_s10  ;;  %p7499_p12 = scmp.lt.u32.totalorder %s7495_s10, %s8803_s11 }
0x11ab   :  { %p7501_p13 = pnand %p7499_p12, %p7496_p11 }
0x11ad   :  { %7504 = shalt.err (!%p7501_p13)
}
0x11ae   :  { %s7529_s1 = smov 128   ;;  %s7530_s16 = smov 8  }
0x11af   :  { %5609 = dma.vmem_to_hbm [thread:$0]  %s5604_s9, 256, %s8803_s11, [#allocation4], %s7529_s1, %s7529_s1, %s7530_s16  }
0x11b0   :  { %7511 = dma.done.wait [#allocation4], 256  }
0x11b1   :  { %7512 = vsyncadd [#allocation4], 4294967040 }
0x11b2   :  { %7513 = dma.done.wait [#allocation12], 128  }
0x11b3   :  { %7514 = vsyncadd [#allocation12], 4294967168 }
0x11b4   :  { %5643 = vsyncpa [#allocation3], 1 }
0x11b5   :  { %5644 = vsyncpa [#allocation6], 1 }
0x11b6   :  { %5645 = vsyncpa [#allocation9], 1 }
0x11b7   :  { %5646 = vsyncpa [#allocation4], 1 }
0x11b8   :  { %5647 = vsyncpa [#allocation12], 1 }

</bundles_post_ra>
